<compile_context>
chip_gen: v6e
topology: v6e:2x2x1
jax: 0.10.0
libtpu: 0.0.40
codegen_flags: <defaults>
</compile_context>

<pallas_src>
import functools

import jax
import jax.numpy as jnp
from jax import lax
from jax.experimental import pallas as pl
from jax.experimental.pallas import tpu as pltpu

EPS = 1e-5  # nn.BatchNorm1d default


# ----------------------------------------------------------------------------
# Pallas kernel: full decoder forward, everything resident in VMEM (small shapes).
# ----------------------------------------------------------------------------
def _decoder_kernel(B, T, H, n_blocks,
                    p_ref, c_ref, gbw_ref, gbb_ref, wp_ref, bp_ref,
                    f0w_ref, f0b_ref, f1w_ref, f1b_ref,
                    wout_ref, bout_ref, out_ref):
    BT = B * T

    # --- all conditional gammas / betas in ONE fused MXU matmul (hoisted off the layer
    #     critical path).  gb: (B, 2*(2*n_blocks+1)*H); slot 2k = gamma of CBN layer k,
    #     slot 2k+1 = beta of CBN layer k.  Kept in f32 (tiny matmul, done once).
    gb = jnp.dot(c_ref[...], gbw_ref[...],
                 preferred_element_type=jnp.float32) + gbb_ref[...]

    def gamma_beta(k):
        g = gb[:, (2 * k) * H:(2 * k + 1) * H][:, None, :]        # (B, 1, H)
        b = gb[:, (2 * k + 1) * H:(2 * k + 2) * H][:, None, :]    # (B, 1, H)
        return g, b

    def cbn(x2, k):
        # Train-mode BatchNorm1d(affine=False): single-pass batch stats over all B*T rows.
        mean = jnp.mean(x2, axis=0, keepdims=True)                # (1, H) f32
        meansq = jnp.mean(x2 * x2, axis=0, keepdims=True)         # (1, H) f32
        var = jnp.maximum(meansq - mean * mean, 0.0)              # biased variance
        xn = (x2 - mean) * lax.rsqrt(var + EPS)                   # (BT, H) f32
        g, b = gamma_beta(k)
        # (B,1,H) gamma/beta broadcast over the sublane (T) axis of the (B,T,H) view —
        # no per-batch slicing, no concatenate.  Reshape is layout-free when T % 8 == 0.
        return g * xn.reshape(B, T, x2.shape[-1]) + b             # (B, T, H) f32

    def fc(y3, w_bf16, bias_f32):
        # relu -> 1x1 Conv1d as a 2-D MXU matmul: bf16 operands, f32 accumulation.
        y2 = jnp.maximum(y3, 0.0).reshape(BT, y3.shape[-1]).astype(jnp.bfloat16)
        return jnp.dot(y2, w_bf16, preferred_element_type=jnp.float32) + bias_f32

    # conv_p: (BT, dim) -> (BT, H).  dim == 3, so this matmul is negligible; kept f32.
    net = jnp.dot(p_ref[...], wp_ref[...],
                  preferred_element_type=jnp.float32) + bp_ref[...]

    # n_blocks x CResnetBlockConv1d (size_in == size_out -> identity shortcut)
    for i in range(n_blocks):
        h = fc(cbn(net, 2 * i), f0w_ref[i], f0b_ref[i])
        dx = fc(cbn(h, 2 * i + 1), f1w_ref[i], f1b_ref[i])
        net = net + dx

    # final CBN -> relu -> conv_out.  conv_out has one output channel, so it is a VPU
    # multiply + lane reduction and the store is a lane-dense (B, T) tile.
    hf = jnp.maximum(cbn(net, 2 * n_blocks), 0.0)                 # (B, T, H) f32
    out_ref[...] = jnp.sum(hf * wout_ref[...], axis=-1) + bout_ref[...]   # (B, T)


# ----------------------------------------------------------------------------
# Wrapper (glue): parameter packing, dtype prep, pallas_call.
# ----------------------------------------------------------------------------
def _pack_gamma_beta(params):
    """Concatenate every conv_gamma / conv_beta weight & bias along the output axis.

    Slot order (each slot is H wide): for block i -> [gamma0_i, beta0_i, gamma1_i, beta1_i],
    then [gamma_final, beta_final].  Matches gamma_beta() slot indexing in the kernel.
    """
    n_blocks = params["b0gw"].shape[0]
    ws, bs = [], []
    for i in range(n_blocks):
        ws += [params["b0gw"][i], params["b0bw"][i], params["b1gw"][i], params["b1bw"][i]]
        bs += [params["b0gb"][i], params["b0bb"][i], params["b1gb"][i], params["b1bb"][i]]
    ws += [params["bfgw"], params["bfbw"]]
    bs += [params["bfgb"], params["bfbb"]]
    gbw = jnp.concatenate(ws, axis=-1).astype(jnp.float32)   # (c_dim, 2*(2n+1)*H)
    gbb = jnp.concatenate(bs, axis=-1).astype(jnp.float32)   # (1,     2*(2n+1)*H)
    return gbw, gbb


def decoder_cbatchnorm_forward(p, c, params):
    """p: (B, T, dim) query points, c: (B, c_dim) latent code -> (B, T) occupancy logits."""
    B, T, dim = p.shape
    H = params["wp"].shape[1]
    n_blocks = params["b0gw"].shape[0]
    BT = B * T

    gbw, gbb = _pack_gamma_beta(params)
    inputs = [
        p.reshape(BT, dim).astype(jnp.float32),
        c.astype(jnp.float32),
        gbw, gbb,
        params["wp"].astype(jnp.float32), params["bp"].astype(jnp.float32),
        # bf16 operands for the H x H fc matmuls (f32 accumulation inside the kernel).
        params["f0w"].astype(jnp.bfloat16), params["f0b"].astype(jnp.float32),
        params["f1w"].astype(jnp.bfloat16), params["f1b"].astype(jnp.float32),
        params["wout"].reshape(1, 1, H).astype(jnp.float32),   # (H,1) -> (1,1,H) row
        params["bout"].reshape(1, 1).astype(jnp.float32),
    ]

    in_bytes = sum(int(a.size) * a.dtype.itemsize for a in inputs)
    out_bytes = BT * 4
    # Advisory cost estimate: matmuls + BN/relu/scale-shift elementwise work.
    flops = (2 * BT * dim * H                     # conv_p
             + n_blocks * 2 * 2 * BT * H * H      # fc_0 / fc_1 per block
             + 2 * BT * H                         # conv_out (mul + reduce)
             + 2 * B * c.shape[1] * gbw.shape[1]  # fused gamma/beta matmul
             + (2 * n_blocks + 1) * 8 * BT * H)   # BN stats / normalize / affine / relu
    cost = pl.CostEstimate(flops=flops,
                           transcendentals=(2 * n_blocks + 1) * H,
                           bytes_accessed=in_bytes + out_bytes)

    # Scoped-VMEM limit sized to the real footprint with headroom (clamped under the
    # v7x 64 MiB physical ceiling); at demo shapes the floor dominates.
    vmem_need = 2 * in_bytes + 8 * BT * H * 4 + 2 * out_bytes
    vmem_limit = int(min(max(vmem_need, 32 * 1024 * 1024), 48 * 1024 * 1024))

    kernel = functools.partial(_decoder_kernel, B, T, H, n_blocks)
    out = pl.pallas_call(
        kernel,
        out_shape=jax.ShapeDtypeStruct((B, T), jnp.float32),
        in_specs=[pl.BlockSpec(memory_space=pltpu.MemorySpace.VMEM) for _ in inputs],
        out_specs=pl.BlockSpec(memory_space=pltpu.MemorySpace.VMEM),
        compiler_params=pltpu.CompilerParams(vmem_limit_bytes=vmem_limit),
        cost_estimate=cost,
    )(*inputs)
    # matches torch: out.squeeze(1) on (B, 1, T) -> (B, T)
    return out


# ----------------------------------------------------------------------------
# Deterministic parameter init (shapes from the module's __init__; z_dim = 0).
# ----------------------------------------------------------------------------
def init_params(key, dim, c_dim, hidden, n_blocks):
    def conv_w(k, cin, cout, lead=()):
        # PyTorch Conv1d weight is (cout, cin, 1); squeeze + transpose -> (..., cin, cout)
        w = 0.2 * jax.random.normal(k, lead + (cout, cin, 1), jnp.float32)
        return jnp.swapaxes(jnp.squeeze(w, axis=-1), -1, -2)

    def conv_b(k, cout, lead=()):
        return 0.2 * jax.random.normal(k, lead + (1, cout), jnp.float32)

    ks = iter(jax.random.split(key, 40))
    nb = (n_blocks,)
    return {
        # conv_p
        "wp": conv_w(next(ks), dim, hidden), "bp": conv_b(next(ks), hidden),
        # per-block bn_0 (conv_gamma / conv_beta), bn_1, fc_0, fc_1 (stacked over blocks)
        "b0gw": conv_w(next(ks), c_dim, hidden, nb), "b0gb": conv_b(next(ks), hidden, nb),
        "b0bw": conv_w(next(ks), c_dim, hidden, nb), "b0bb": conv_b(next(ks), hidden, nb),
        "b1gw": conv_w(next(ks), c_dim, hidden, nb), "b1gb": conv_b(next(ks), hidden, nb),
        "b1bw": conv_w(next(ks), c_dim, hidden, nb), "b1bb": conv_b(next(ks), hidden, nb),
        "f0w": conv_w(next(ks), hidden, hidden, nb), "f0b": conv_b(next(ks), hidden, nb),
        "f1w": conv_w(next(ks), hidden, hidden, nb), "f1b": conv_b(next(ks), hidden, nb),
        # final CBatchNorm1d + conv_out
        "bfgw": conv_w(next(ks), c_dim, hidden), "bfgb": conv_b(next(ks), hidden),
        "bfbw": conv_w(next(ks), c_dim, hidden), "bfbb": conv_b(next(ks), hidden),
        "wout": conv_w(next(ks), hidden, 1), "bout": conv_b(next(ks), 1),
    }


# ----------------------------------------------------------------------------
# Pure-JAX reference (same math, written independently of the kernel; the H x H fc
# matmuls use the same bf16-operand / f32-accumulate contraction the kernel uses).
# ----------------------------------------------------------------------------
def decoder_reference(p, c, params):
    B, T, dim = p.shape
    x = p.reshape(B * T, dim).astype(jnp.float32)
    c = c.astype(jnp.float32)

    def mm_bf16(a, w):
        return jnp.dot(a.astype(jnp.bfloat16), w.astype(jnp.bfloat16),
                       preferred_element_type=jnp.float32)

    def cbn(x2, gw, gb_, bw, bb):
        gamma = c @ gw + gb_
        beta = c @ bw + bb
        mean = x2.mean(axis=0, keepdims=True)
        var = ((x2 - mean) ** 2).mean(axis=0, keepdims=True)
        xn = (x2 - mean) / jnp.sqrt(var + EPS)
        F = x2.shape[1]
        y = gamma[:, None, :] * xn.reshape(B, T, F) + beta[:, None, :]
        return y.reshape(B * T, F)

    relu = lambda v: jnp.maximum(v, 0.0)
    net = x @ params["wp"] + params["bp"]
    n_blocks = params["b0gw"].shape[0]
    for i in range(n_blocks):
        h = mm_bf16(relu(cbn(net, params["b0gw"][i], params["b0gb"][i],
                             params["b0bw"][i], params["b0bb"][i])),
                    params["f0w"][i]) + params["f0b"][i]
        dx = mm_bf16(relu(cbn(h, params["b1gw"][i], params["b1gb"][i],
                              params["b1bw"][i], params["b1bb"][i])),
                     params["f1w"][i]) + params["f1b"][i]
        net = net + dx
    hf = relu(cbn(net, params["bfgw"], params["bfgb"], params["bfbw"], params["bfbb"]))
    return (hf @ params["wout"] + params["bout"]).reshape(B, T)


if __name__ == "__main__":
    # Small shapes consistent with the module (dim=3 points, latent code c, hidden features).
    # T is a multiple of 8 so the in-kernel (B*T, H) <-> (B, T, H) views are layout-free.
    B, T, DIM, C_DIM, HIDDEN, N_BLOCKS = 2, 64, 3, 16, 32, 3

    key = jax.random.PRNGKey(0)
    kp, kc, kw = jax.random.split(key, 3)
    p = jax.random.normal(kp, (B, T, DIM), jnp.float32)   # query points
    c = jax.random.normal(kc, (B, C_DIM), jnp.float32)    # conditioning code (z_dim == 0)
    params = init_params(kw, DIM, C_DIM, HIDDEN, N_BLOCKS)

    out = jax.block_until_ready(decoder_cbatchnorm_forward(p, c, params))
    ref = decoder_reference(p, c, params)

    assert out.shape == (B, T), out.shape
    max_diff = float(jnp.max(jnp.abs(out - ref)))
    if not bool(jnp.allclose(out, ref, atol=2e-3, rtol=2e-3)):
        raise AssertionError(f"kernel vs reference mismatch, max |diff| = {max_diff:e}")

    print("KERNEL_OK")
</pallas_src>

<mosaic_0001>
module attributes {stable_mosaic.version = 11 : i64} {
  func.func @_decoder_kernel(%arg0: memref<128x3xf32, #tpu.memory_space<vmem>>, %arg1: memref<2x16xf32, #tpu.memory_space<vmem>>, %arg2: memref<16x448xf32, #tpu.memory_space<vmem>>, %arg3: memref<1x448xf32, #tpu.memory_space<vmem>>, %arg4: memref<3x32xf32, #tpu.memory_space<vmem>>, %arg5: memref<1x32xf32, #tpu.memory_space<vmem>>, %arg6: memref<3x32x32xbf16, #tpu.memory_space<vmem>>, %arg7: memref<3x1x32xf32, #tpu.memory_space<vmem>>, %arg8: memref<3x32x32xbf16, #tpu.memory_space<vmem>>, %arg9: memref<3x1x32xf32, #tpu.memory_space<vmem>>, %arg10: memref<1x1x32xf32, #tpu.memory_space<vmem>>, %arg11: memref<1x1xf32, #tpu.memory_space<vmem>>, %arg12: memref<2x64xf32, #tpu.memory_space<vmem>>) attributes {dimension_semantics = [], scalar_prefetch = 0 : i64, scratch_operands = 0 : i64, tpu.core_type = #tpu.core_type<tc>} {
    %c0 = arith.constant 0 : index
    %c0_0 = arith.constant 0 : index
    %0 = vector.load %arg1[%c0, %c0_0] : memref<2x16xf32, #tpu.memory_space<vmem>>, vector<2x16xf32>
    %c0_1 = arith.constant 0 : index
    %c0_2 = arith.constant 0 : index
    %1 = vector.load %arg2[%c0_1, %c0_2] : memref<16x448xf32, #tpu.memory_space<vmem>>, vector<16x448xf32>
    %cst = arith.constant dense<0.000000e+00> : vector<2x448xf32>
    %2 = tpu.matmul %0, %1, %cst {dimension_numbers = #tpu.dot_dimension_numbers<[1], [0], [0], [1], [0, 0, 1, 1], [], []>} : vector<2x16xf32>, vector<16x448xf32>, vector<2x448xf32> -> vector<2x448xf32>
    %c0_3 = arith.constant 0 : index
    %c0_4 = arith.constant 0 : index
    %3 = vector.load %arg3[%c0_3, %c0_4] : memref<1x448xf32, #tpu.memory_space<vmem>>, vector<1x448xf32>
    %4 = vector.broadcast %3 : vector<1x448xf32> to vector<2x448xf32>
    %5 = arith.addf %2, %4 : vector<2x448xf32>
    %c0_5 = arith.constant 0 : index
    %c0_6 = arith.constant 0 : index
    %6 = vector.load %arg0[%c0_5, %c0_6] : memref<128x3xf32, #tpu.memory_space<vmem>>, vector<128x3xf32>
    %c0_7 = arith.constant 0 : index
    %c0_8 = arith.constant 0 : index
    %7 = vector.load %arg4[%c0_7, %c0_8] : memref<3x32xf32, #tpu.memory_space<vmem>>, vector<3x32xf32>
    %cst_9 = arith.constant dense<0.000000e+00> : vector<128x32xf32>
    %8 = tpu.matmul %6, %7, %cst_9 {dimension_numbers = #tpu.dot_dimension_numbers<[1], [0], [0], [1], [0, 0, 1, 1], [], []>} : vector<128x3xf32>, vector<3x32xf32>, vector<128x32xf32> -> vector<128x32xf32>
    %c0_10 = arith.constant 0 : index
    %c0_11 = arith.constant 0 : index
    %9 = vector.load %arg5[%c0_10, %c0_11] : memref<1x32xf32, #tpu.memory_space<vmem>>, vector<1x32xf32>
    %10 = vector.broadcast %9 : vector<1x32xf32> to vector<128x32xf32>
    %11 = arith.addf %8, %10 : vector<128x32xf32>
    %cst_12 = arith.constant dense<0.000000e+00> : vector<32xf32>
    %12 = vector.multi_reduction <add>, %11, %cst_12 [0] : vector<128x32xf32> to vector<32xf32>
    %13 = vector.shape_cast %12 : vector<32xf32> to vector<1x32xf32>
    %cst_13 = arith.constant 1.280000e+02 : f32
    %14 = vector.broadcast %cst_13 : f32 to vector<1x32xf32>
    %15 = arith.divf %13, %14 : vector<1x32xf32>
    %16 = arith.mulf %11, %11 : vector<128x32xf32>
    %cst_14 = arith.constant dense<0.000000e+00> : vector<32xf32>
    %17 = vector.multi_reduction <add>, %16, %cst_14 [0] : vector<128x32xf32> to vector<32xf32>
    %18 = vector.shape_cast %17 : vector<32xf32> to vector<1x32xf32>
    %cst_15 = arith.constant 1.280000e+02 : f32
    %19 = vector.broadcast %cst_15 : f32 to vector<1x32xf32>
    %20 = arith.divf %18, %19 : vector<1x32xf32>
    %21 = arith.mulf %15, %15 : vector<1x32xf32>
    %22 = arith.subf %20, %21 : vector<1x32xf32>
    %cst_16 = arith.constant 0.000000e+00 : f32
    %23 = vector.broadcast %cst_16 : f32 to vector<1x32xf32>
    %24 = arith.maximumf %22, %23 : vector<1x32xf32>
    %25 = vector.broadcast %15 : vector<1x32xf32> to vector<128x32xf32>
    %26 = arith.subf %11, %25 : vector<128x32xf32>
    %cst_17 = arith.constant 9.99999974E-6 : f32
    %27 = vector.broadcast %cst_17 : f32 to vector<1x32xf32>
    %28 = arith.addf %24, %27 : vector<1x32xf32>
    %29 = math.rsqrt %28 : vector<1x32xf32>
    %30 = vector.broadcast %29 : vector<1x32xf32> to vector<128x32xf32>
    %31 = arith.mulf %26, %30 : vector<128x32xf32>
    %32 = vector.extract_strided_slice %5 {offsets = [0, 0], sizes = [2, 32], strides = [1, 1]} : vector<2x448xf32> to vector<2x32xf32>
    %33 = vector.shape_cast %32 : vector<2x32xf32> to vector<2x1x32xf32>
    %34 = vector.extract_strided_slice %5 {offsets = [0, 32], sizes = [2, 32], strides = [1, 1]} : vector<2x448xf32> to vector<2x32xf32>
    %35 = vector.shape_cast %34 : vector<2x32xf32> to vector<2x1x32xf32>
    %36 = vector.shape_cast %31 : vector<128x32xf32> to vector<2x64x32xf32>
    %37 = vector.broadcast %33 : vector<2x1x32xf32> to vector<2x64x32xf32>
    %38 = arith.mulf %37, %36 : vector<2x64x32xf32>
    %39 = vector.broadcast %35 : vector<2x1x32xf32> to vector<2x64x32xf32>
    %40 = arith.addf %38, %39 : vector<2x64x32xf32>
    %c0_18 = arith.constant 0 : index
    %c0_19 = arith.constant 0 : index
    %c0_20 = arith.constant 0 : index
    %41 = vector.load %arg6[%c0_18, %c0_19, %c0_20] : memref<3x32x32xbf16, #tpu.memory_space<vmem>>, vector<1x32x32xbf16>
    %42 = vector.shape_cast %41 : vector<1x32x32xbf16> to vector<32x32xbf16>
    %c0_21 = arith.constant 0 : index
    %c0_22 = arith.constant 0 : index
    %c0_23 = arith.constant 0 : index
    %43 = vector.load %arg7[%c0_21, %c0_22, %c0_23] : memref<3x1x32xf32, #tpu.memory_space<vmem>>, vector<1x1x32xf32>
    %44 = vector.shape_cast %43 : vector<1x1x32xf32> to vector<1x32xf32>
    %cst_24 = arith.constant 0.000000e+00 : f32
    %45 = vector.broadcast %cst_24 : f32 to vector<2x64x32xf32>
    %46 = arith.maximumf %40, %45 : vector<2x64x32xf32>
    %47 = vector.shape_cast %46 : vector<2x64x32xf32> to vector<128x32xf32>
    %48 = arith.truncf %47 : vector<128x32xf32> to vector<128x32xbf16>
    %cst_25 = arith.constant dense<0.000000e+00> : vector<128x32xf32>
    %49 = tpu.matmul %48, %42, %cst_25 {dimension_numbers = #tpu.dot_dimension_numbers<[1], [0], [0], [1], [0, 0, 1, 1], [], []>} : vector<128x32xbf16>, vector<32x32xbf16>, vector<128x32xf32> -> vector<128x32xf32>
    %50 = vector.broadcast %44 : vector<1x32xf32> to vector<128x32xf32>
    %51 = arith.addf %49, %50 : vector<128x32xf32>
    %cst_26 = arith.constant dense<0.000000e+00> : vector<32xf32>
    %52 = vector.multi_reduction <add>, %51, %cst_26 [0] : vector<128x32xf32> to vector<32xf32>
    %53 = vector.shape_cast %52 : vector<32xf32> to vector<1x32xf32>
    %cst_27 = arith.constant 1.280000e+02 : f32
    %54 = vector.broadcast %cst_27 : f32 to vector<1x32xf32>
    %55 = arith.divf %53, %54 : vector<1x32xf32>
    %56 = arith.mulf %51, %51 : vector<128x32xf32>
    %cst_28 = arith.constant dense<0.000000e+00> : vector<32xf32>
    %57 = vector.multi_reduction <add>, %56, %cst_28 [0] : vector<128x32xf32> to vector<32xf32>
    %58 = vector.shape_cast %57 : vector<32xf32> to vector<1x32xf32>
    %cst_29 = arith.constant 1.280000e+02 : f32
    %59 = vector.broadcast %cst_29 : f32 to vector<1x32xf32>
    %60 = arith.divf %58, %59 : vector<1x32xf32>
    %61 = arith.mulf %55, %55 : vector<1x32xf32>
    %62 = arith.subf %60, %61 : vector<1x32xf32>
    %cst_30 = arith.constant 0.000000e+00 : f32
    %63 = vector.broadcast %cst_30 : f32 to vector<1x32xf32>
    %64 = arith.maximumf %62, %63 : vector<1x32xf32>
    %65 = vector.broadcast %55 : vector<1x32xf32> to vector<128x32xf32>
    %66 = arith.subf %51, %65 : vector<128x32xf32>
    %cst_31 = arith.constant 9.99999974E-6 : f32
    %67 = vector.broadcast %cst_31 : f32 to vector<1x32xf32>
    %68 = arith.addf %64, %67 : vector<1x32xf32>
    %69 = math.rsqrt %68 : vector<1x32xf32>
    %70 = vector.broadcast %69 : vector<1x32xf32> to vector<128x32xf32>
    %71 = arith.mulf %66, %70 : vector<128x32xf32>
    %72 = vector.extract_strided_slice %5 {offsets = [0, 64], sizes = [2, 32], strides = [1, 1]} : vector<2x448xf32> to vector<2x32xf32>
    %73 = vector.shape_cast %72 : vector<2x32xf32> to vector<2x1x32xf32>
    %74 = vector.extract_strided_slice %5 {offsets = [0, 96], sizes = [2, 32], strides = [1, 1]} : vector<2x448xf32> to vector<2x32xf32>
    %75 = vector.shape_cast %74 : vector<2x32xf32> to vector<2x1x32xf32>
    %76 = vector.shape_cast %71 : vector<128x32xf32> to vector<2x64x32xf32>
    %77 = vector.broadcast %73 : vector<2x1x32xf32> to vector<2x64x32xf32>
    %78 = arith.mulf %77, %76 : vector<2x64x32xf32>
    %79 = vector.broadcast %75 : vector<2x1x32xf32> to vector<2x64x32xf32>
    %80 = arith.addf %78, %79 : vector<2x64x32xf32>
    %c0_32 = arith.constant 0 : index
    %c0_33 = arith.constant 0 : index
    %c0_34 = arith.constant 0 : index
    %81 = vector.load %arg8[%c0_32, %c0_33, %c0_34] : memref<3x32x32xbf16, #tpu.memory_space<vmem>>, vector<1x32x32xbf16>
    %82 = vector.shape_cast %81 : vector<1x32x32xbf16> to vector<32x32xbf16>
    %c0_35 = arith.constant 0 : index
    %c0_36 = arith.constant 0 : index
    %c0_37 = arith.constant 0 : index
    %83 = vector.load %arg9[%c0_35, %c0_36, %c0_37] : memref<3x1x32xf32, #tpu.memory_space<vmem>>, vector<1x1x32xf32>
    %84 = vector.shape_cast %83 : vector<1x1x32xf32> to vector<1x32xf32>
    %cst_38 = arith.constant 0.000000e+00 : f32
    %85 = vector.broadcast %cst_38 : f32 to vector<2x64x32xf32>
    %86 = arith.maximumf %80, %85 : vector<2x64x32xf32>
    %87 = vector.shape_cast %86 : vector<2x64x32xf32> to vector<128x32xf32>
    %88 = arith.truncf %87 : vector<128x32xf32> to vector<128x32xbf16>
    %cst_39 = arith.constant dense<0.000000e+00> : vector<128x32xf32>
    %89 = tpu.matmul %88, %82, %cst_39 {dimension_numbers = #tpu.dot_dimension_numbers<[1], [0], [0], [1], [0, 0, 1, 1], [], []>} : vector<128x32xbf16>, vector<32x32xbf16>, vector<128x32xf32> -> vector<128x32xf32>
    %90 = vector.broadcast %84 : vector<1x32xf32> to vector<128x32xf32>
    %91 = arith.addf %89, %90 : vector<128x32xf32>
    %92 = arith.addf %11, %91 : vector<128x32xf32>
    %cst_40 = arith.constant dense<0.000000e+00> : vector<32xf32>
    %93 = vector.multi_reduction <add>, %92, %cst_40 [0] : vector<128x32xf32> to vector<32xf32>
    %94 = vector.shape_cast %93 : vector<32xf32> to vector<1x32xf32>
    %cst_41 = arith.constant 1.280000e+02 : f32
    %95 = vector.broadcast %cst_41 : f32 to vector<1x32xf32>
    %96 = arith.divf %94, %95 : vector<1x32xf32>
    %97 = arith.mulf %92, %92 : vector<128x32xf32>
    %cst_42 = arith.constant dense<0.000000e+00> : vector<32xf32>
    %98 = vector.multi_reduction <add>, %97, %cst_42 [0] : vector<128x32xf32> to vector<32xf32>
    %99 = vector.shape_cast %98 : vector<32xf32> to vector<1x32xf32>
    %cst_43 = arith.constant 1.280000e+02 : f32
    %100 = vector.broadcast %cst_43 : f32 to vector<1x32xf32>
    %101 = arith.divf %99, %100 : vector<1x32xf32>
    %102 = arith.mulf %96, %96 : vector<1x32xf32>
    %103 = arith.subf %101, %102 : vector<1x32xf32>
    %cst_44 = arith.constant 0.000000e+00 : f32
    %104 = vector.broadcast %cst_44 : f32 to vector<1x32xf32>
    %105 = arith.maximumf %103, %104 : vector<1x32xf32>
    %106 = vector.broadcast %96 : vector<1x32xf32> to vector<128x32xf32>
    %107 = arith.subf %92, %106 : vector<128x32xf32>
    %cst_45 = arith.constant 9.99999974E-6 : f32
    %108 = vector.broadcast %cst_45 : f32 to vector<1x32xf32>
    %109 = arith.addf %105, %108 : vector<1x32xf32>
    %110 = math.rsqrt %109 : vector<1x32xf32>
    %111 = vector.broadcast %110 : vector<1x32xf32> to vector<128x32xf32>
    %112 = arith.mulf %107, %111 : vector<128x32xf32>
    %113 = vector.extract_strided_slice %5 {offsets = [0, 128], sizes = [2, 32], strides = [1, 1]} : vector<2x448xf32> to vector<2x32xf32>
    %114 = vector.shape_cast %113 : vector<2x32xf32> to vector<2x1x32xf32>
    %115 = vector.extract_strided_slice %5 {offsets = [0, 160], sizes = [2, 32], strides = [1, 1]} : vector<2x448xf32> to vector<2x32xf32>
    %116 = vector.shape_cast %115 : vector<2x32xf32> to vector<2x1x32xf32>
    %117 = vector.shape_cast %112 : vector<128x32xf32> to vector<2x64x32xf32>
    %118 = vector.broadcast %114 : vector<2x1x32xf32> to vector<2x64x32xf32>
    %119 = arith.mulf %118, %117 : vector<2x64x32xf32>
    %120 = vector.broadcast %116 : vector<2x1x32xf32> to vector<2x64x32xf32>
    %121 = arith.addf %119, %120 : vector<2x64x32xf32>
    %c1 = arith.constant 1 : index
    %c0_46 = arith.constant 0 : index
    %c0_47 = arith.constant 0 : index
    %122 = vector.load %arg6[%c1, %c0_46, %c0_47] : memref<3x32x32xbf16, #tpu.memory_space<vmem>>, vector<1x32x32xbf16>
    %123 = vector.shape_cast %122 : vector<1x32x32xbf16> to vector<32x32xbf16>
    %c1_48 = arith.constant 1 : index
    %c0_49 = arith.constant 0 : index
    %c0_50 = arith.constant 0 : index
    %124 = vector.load %arg7[%c1_48, %c0_49, %c0_50] : memref<3x1x32xf32, #tpu.memory_space<vmem>>, vector<1x1x32xf32>
    %125 = vector.shape_cast %124 : vector<1x1x32xf32> to vector<1x32xf32>
    %cst_51 = arith.constant 0.000000e+00 : f32
    %126 = vector.broadcast %cst_51 : f32 to vector<2x64x32xf32>
    %127 = arith.maximumf %121, %126 : vector<2x64x32xf32>
    %128 = vector.shape_cast %127 : vector<2x64x32xf32> to vector<128x32xf32>
    %129 = arith.truncf %128 : vector<128x32xf32> to vector<128x32xbf16>
    %cst_52 = arith.constant dense<0.000000e+00> : vector<128x32xf32>
    %130 = tpu.matmul %129, %123, %cst_52 {dimension_numbers = #tpu.dot_dimension_numbers<[1], [0], [0], [1], [0, 0, 1, 1], [], []>} : vector<128x32xbf16>, vector<32x32xbf16>, vector<128x32xf32> -> vector<128x32xf32>
    %131 = vector.broadcast %125 : vector<1x32xf32> to vector<128x32xf32>
    %132 = arith.addf %130, %131 : vector<128x32xf32>
    %cst_53 = arith.constant dense<0.000000e+00> : vector<32xf32>
    %133 = vector.multi_reduction <add>, %132, %cst_53 [0] : vector<128x32xf32> to vector<32xf32>
    %134 = vector.shape_cast %133 : vector<32xf32> to vector<1x32xf32>
    %cst_54 = arith.constant 1.280000e+02 : f32
    %135 = vector.broadcast %cst_54 : f32 to vector<1x32xf32>
    %136 = arith.divf %134, %135 : vector<1x32xf32>
    %137 = arith.mulf %132, %132 : vector<128x32xf32>
    %cst_55 = arith.constant dense<0.000000e+00> : vector<32xf32>
    %138 = vector.multi_reduction <add>, %137, %cst_55 [0] : vector<128x32xf32> to vector<32xf32>
    %139 = vector.shape_cast %138 : vector<32xf32> to vector<1x32xf32>
    %cst_56 = arith.constant 1.280000e+02 : f32
    %140 = vector.broadcast %cst_56 : f32 to vector<1x32xf32>
    %141 = arith.divf %139, %140 : vector<1x32xf32>
    %142 = arith.mulf %136, %136 : vector<1x32xf32>
    %143 = arith.subf %141, %142 : vector<1x32xf32>
    %cst_57 = arith.constant 0.000000e+00 : f32
    %144 = vector.broadcast %cst_57 : f32 to vector<1x32xf32>
    %145 = arith.maximumf %143, %144 : vector<1x32xf32>
    %146 = vector.broadcast %136 : vector<1x32xf32> to vector<128x32xf32>
    %147 = arith.subf %132, %146 : vector<128x32xf32>
    %cst_58 = arith.constant 9.99999974E-6 : f32
    %148 = vector.broadcast %cst_58 : f32 to vector<1x32xf32>
    %149 = arith.addf %145, %148 : vector<1x32xf32>
    %150 = math.rsqrt %149 : vector<1x32xf32>
    %151 = vector.broadcast %150 : vector<1x32xf32> to vector<128x32xf32>
    %152 = arith.mulf %147, %151 : vector<128x32xf32>
    %153 = vector.extract_strided_slice %5 {offsets = [0, 192], sizes = [2, 32], strides = [1, 1]} : vector<2x448xf32> to vector<2x32xf32>
    %154 = vector.shape_cast %153 : vector<2x32xf32> to vector<2x1x32xf32>
    %155 = vector.extract_strided_slice %5 {offsets = [0, 224], sizes = [2, 32], strides = [1, 1]} : vector<2x448xf32> to vector<2x32xf32>
    %156 = vector.shape_cast %155 : vector<2x32xf32> to vector<2x1x32xf32>
    %157 = vector.shape_cast %152 : vector<128x32xf32> to vector<2x64x32xf32>
    %158 = vector.broadcast %154 : vector<2x1x32xf32> to vector<2x64x32xf32>
    %159 = arith.mulf %158, %157 : vector<2x64x32xf32>
    %160 = vector.broadcast %156 : vector<2x1x32xf32> to vector<2x64x32xf32>
    %161 = arith.addf %159, %160 : vector<2x64x32xf32>
    %c1_59 = arith.constant 1 : index
    %c0_60 = arith.constant 0 : index
    %c0_61 = arith.constant 0 : index
    %162 = vector.load %arg8[%c1_59, %c0_60, %c0_61] : memref<3x32x32xbf16, #tpu.memory_space<vmem>>, vector<1x32x32xbf16>
    %163 = vector.shape_cast %162 : vector<1x32x32xbf16> to vector<32x32xbf16>
    %c1_62 = arith.constant 1 : index
    %c0_63 = arith.constant 0 : index
    %c0_64 = arith.constant 0 : index
    %164 = vector.load %arg9[%c1_62, %c0_63, %c0_64] : memref<3x1x32xf32, #tpu.memory_space<vmem>>, vector<1x1x32xf32>
    %165 = vector.shape_cast %164 : vector<1x1x32xf32> to vector<1x32xf32>
    %cst_65 = arith.constant 0.000000e+00 : f32
    %166 = vector.broadcast %cst_65 : f32 to vector<2x64x32xf32>
    %167 = arith.maximumf %161, %166 : vector<2x64x32xf32>
    %168 = vector.shape_cast %167 : vector<2x64x32xf32> to vector<128x32xf32>
    %169 = arith.truncf %168 : vector<128x32xf32> to vector<128x32xbf16>
    %cst_66 = arith.constant dense<0.000000e+00> : vector<128x32xf32>
    %170 = tpu.matmul %169, %163, %cst_66 {dimension_numbers = #tpu.dot_dimension_numbers<[1], [0], [0], [1], [0, 0, 1, 1], [], []>} : vector<128x32xbf16>, vector<32x32xbf16>, vector<128x32xf32> -> vector<128x32xf32>
    %171 = vector.broadcast %165 : vector<1x32xf32> to vector<128x32xf32>
    %172 = arith.addf %170, %171 : vector<128x32xf32>
    %173 = arith.addf %92, %172 : vector<128x32xf32>
    %cst_67 = arith.constant dense<0.000000e+00> : vector<32xf32>
    %174 = vector.multi_reduction <add>, %173, %cst_67 [0] : vector<128x32xf32> to vector<32xf32>
    %175 = vector.shape_cast %174 : vector<32xf32> to vector<1x32xf32>
    %cst_68 = arith.constant 1.280000e+02 : f32
    %176 = vector.broadcast %cst_68 : f32 to vector<1x32xf32>
    %177 = arith.divf %175, %176 : vector<1x32xf32>
    %178 = arith.mulf %173, %173 : vector<128x32xf32>
    %cst_69 = arith.constant dense<0.000000e+00> : vector<32xf32>
    %179 = vector.multi_reduction <add>, %178, %cst_69 [0] : vector<128x32xf32> to vector<32xf32>
    %180 = vector.shape_cast %179 : vector<32xf32> to vector<1x32xf32>
    %cst_70 = arith.constant 1.280000e+02 : f32
    %181 = vector.broadcast %cst_70 : f32 to vector<1x32xf32>
    %182 = arith.divf %180, %181 : vector<1x32xf32>
    %183 = arith.mulf %177, %177 : vector<1x32xf32>
    %184 = arith.subf %182, %183 : vector<1x32xf32>
    %cst_71 = arith.constant 0.000000e+00 : f32
    %185 = vector.broadcast %cst_71 : f32 to vector<1x32xf32>
    %186 = arith.maximumf %184, %185 : vector<1x32xf32>
    %187 = vector.broadcast %177 : vector<1x32xf32> to vector<128x32xf32>
    %188 = arith.subf %173, %187 : vector<128x32xf32>
    %cst_72 = arith.constant 9.99999974E-6 : f32
    %189 = vector.broadcast %cst_72 : f32 to vector<1x32xf32>
    %190 = arith.addf %186, %189 : vector<1x32xf32>
    %191 = math.rsqrt %190 : vector<1x32xf32>
    %192 = vector.broadcast %191 : vector<1x32xf32> to vector<128x32xf32>
    %193 = arith.mulf %188, %192 : vector<128x32xf32>
    %194 = vector.extract_strided_slice %5 {offsets = [0, 256], sizes = [2, 32], strides = [1, 1]} : vector<2x448xf32> to vector<2x32xf32>
    %195 = vector.shape_cast %194 : vector<2x32xf32> to vector<2x1x32xf32>
    %196 = vector.extract_strided_slice %5 {offsets = [0, 288], sizes = [2, 32], strides = [1, 1]} : vector<2x448xf32> to vector<2x32xf32>
    %197 = vector.shape_cast %196 : vector<2x32xf32> to vector<2x1x32xf32>
    %198 = vector.shape_cast %193 : vector<128x32xf32> to vector<2x64x32xf32>
    %199 = vector.broadcast %195 : vector<2x1x32xf32> to vector<2x64x32xf32>
    %200 = arith.mulf %199, %198 : vector<2x64x32xf32>
    %201 = vector.broadcast %197 : vector<2x1x32xf32> to vector<2x64x32xf32>
    %202 = arith.addf %200, %201 : vector<2x64x32xf32>
    %c2 = arith.constant 2 : index
    %c0_73 = arith.constant 0 : index
    %c0_74 = arith.constant 0 : index
    %203 = vector.load %arg6[%c2, %c0_73, %c0_74] : memref<3x32x32xbf16, #tpu.memory_space<vmem>>, vector<1x32x32xbf16>
    %204 = vector.shape_cast %203 : vector<1x32x32xbf16> to vector<32x32xbf16>
    %c2_75 = arith.constant 2 : index
    %c0_76 = arith.constant 0 : index
    %c0_77 = arith.constant 0 : index
    %205 = vector.load %arg7[%c2_75, %c0_76, %c0_77] : memref<3x1x32xf32, #tpu.memory_space<vmem>>, vector<1x1x32xf32>
    %206 = vector.shape_cast %205 : vector<1x1x32xf32> to vector<1x32xf32>
    %cst_78 = arith.constant 0.000000e+00 : f32
    %207 = vector.broadcast %cst_78 : f32 to vector<2x64x32xf32>
    %208 = arith.maximumf %202, %207 : vector<2x64x32xf32>
    %209 = vector.shape_cast %208 : vector<2x64x32xf32> to vector<128x32xf32>
    %210 = arith.truncf %209 : vector<128x32xf32> to vector<128x32xbf16>
    %cst_79 = arith.constant dense<0.000000e+00> : vector<128x32xf32>
    %211 = tpu.matmul %210, %204, %cst_79 {dimension_numbers = #tpu.dot_dimension_numbers<[1], [0], [0], [1], [0, 0, 1, 1], [], []>} : vector<128x32xbf16>, vector<32x32xbf16>, vector<128x32xf32> -> vector<128x32xf32>
    %212 = vector.broadcast %206 : vector<1x32xf32> to vector<128x32xf32>
    %213 = arith.addf %211, %212 : vector<128x32xf32>
    %cst_80 = arith.constant dense<0.000000e+00> : vector<32xf32>
    %214 = vector.multi_reduction <add>, %213, %cst_80 [0] : vector<128x32xf32> to vector<32xf32>
    %215 = vector.shape_cast %214 : vector<32xf32> to vector<1x32xf32>
    %cst_81 = arith.constant 1.280000e+02 : f32
    %216 = vector.broadcast %cst_81 : f32 to vector<1x32xf32>
    %217 = arith.divf %215, %216 : vector<1x32xf32>
    %218 = arith.mulf %213, %213 : vector<128x32xf32>
    %cst_82 = arith.constant dense<0.000000e+00> : vector<32xf32>
    %219 = vector.multi_reduction <add>, %218, %cst_82 [0] : vector<128x32xf32> to vector<32xf32>
    %220 = vector.shape_cast %219 : vector<32xf32> to vector<1x32xf32>
    %cst_83 = arith.constant 1.280000e+02 : f32
    %221 = vector.broadcast %cst_83 : f32 to vector<1x32xf32>
    %222 = arith.divf %220, %221 : vector<1x32xf32>
    %223 = arith.mulf %217, %217 : vector<1x32xf32>
    %224 = arith.subf %222, %223 : vector<1x32xf32>
    %cst_84 = arith.constant 0.000000e+00 : f32
    %225 = vector.broadcast %cst_84 : f32 to vector<1x32xf32>
    %226 = arith.maximumf %224, %225 : vector<1x32xf32>
    %227 = vector.broadcast %217 : vector<1x32xf32> to vector<128x32xf32>
    %228 = arith.subf %213, %227 : vector<128x32xf32>
    %cst_85 = arith.constant 9.99999974E-6 : f32
    %229 = vector.broadcast %cst_85 : f32 to vector<1x32xf32>
    %230 = arith.addf %226, %229 : vector<1x32xf32>
    %231 = math.rsqrt %230 : vector<1x32xf32>
    %232 = vector.broadcast %231 : vector<1x32xf32> to vector<128x32xf32>
    %233 = arith.mulf %228, %232 : vector<128x32xf32>
    %234 = vector.extract_strided_slice %5 {offsets = [0, 320], sizes = [2, 32], strides = [1, 1]} : vector<2x448xf32> to vector<2x32xf32>
    %235 = vector.shape_cast %234 : vector<2x32xf32> to vector<2x1x32xf32>
    %236 = vector.extract_strided_slice %5 {offsets = [0, 352], sizes = [2, 32], strides = [1, 1]} : vector<2x448xf32> to vector<2x32xf32>
    %237 = vector.shape_cast %236 : vector<2x32xf32> to vector<2x1x32xf32>
    %238 = vector.shape_cast %233 : vector<128x32xf32> to vector<2x64x32xf32>
    %239 = vector.broadcast %235 : vector<2x1x32xf32> to vector<2x64x32xf32>
    %240 = arith.mulf %239, %238 : vector<2x64x32xf32>
    %241 = vector.broadcast %237 : vector<2x1x32xf32> to vector<2x64x32xf32>
    %242 = arith.addf %240, %241 : vector<2x64x32xf32>
    %c2_86 = arith.constant 2 : index
    %c0_87 = arith.constant 0 : index
    %c0_88 = arith.constant 0 : index
    %243 = vector.load %arg8[%c2_86, %c0_87, %c0_88] : memref<3x32x32xbf16, #tpu.memory_space<vmem>>, vector<1x32x32xbf16>
    %244 = vector.shape_cast %243 : vector<1x32x32xbf16> to vector<32x32xbf16>
    %c2_89 = arith.constant 2 : index
    %c0_90 = arith.constant 0 : index
    %c0_91 = arith.constant 0 : index
    %245 = vector.load %arg9[%c2_89, %c0_90, %c0_91] : memref<3x1x32xf32, #tpu.memory_space<vmem>>, vector<1x1x32xf32>
    %246 = vector.shape_cast %245 : vector<1x1x32xf32> to vector<1x32xf32>
    %cst_92 = arith.constant 0.000000e+00 : f32
    %247 = vector.broadcast %cst_92 : f32 to vector<2x64x32xf32>
    %248 = arith.maximumf %242, %247 : vector<2x64x32xf32>
    %249 = vector.shape_cast %248 : vector<2x64x32xf32> to vector<128x32xf32>
    %250 = arith.truncf %249 : vector<128x32xf32> to vector<128x32xbf16>
    %cst_93 = arith.constant dense<0.000000e+00> : vector<128x32xf32>
    %251 = tpu.matmul %250, %244, %cst_93 {dimension_numbers = #tpu.dot_dimension_numbers<[1], [0], [0], [1], [0, 0, 1, 1], [], []>} : vector<128x32xbf16>, vector<32x32xbf16>, vector<128x32xf32> -> vector<128x32xf32>
    %252 = vector.broadcast %246 : vector<1x32xf32> to vector<128x32xf32>
    %253 = arith.addf %251, %252 : vector<128x32xf32>
    %254 = arith.addf %173, %253 : vector<128x32xf32>
    %cst_94 = arith.constant dense<0.000000e+00> : vector<32xf32>
    %255 = vector.multi_reduction <add>, %254, %cst_94 [0] : vector<128x32xf32> to vector<32xf32>
    %256 = vector.shape_cast %255 : vector<32xf32> to vector<1x32xf32>
    %cst_95 = arith.constant 1.280000e+02 : f32
    %257 = vector.broadcast %cst_95 : f32 to vector<1x32xf32>
    %258 = arith.divf %256, %257 : vector<1x32xf32>
    %259 = arith.mulf %254, %254 : vector<128x32xf32>
    %cst_96 = arith.constant dense<0.000000e+00> : vector<32xf32>
    %260 = vector.multi_reduction <add>, %259, %cst_96 [0] : vector<128x32xf32> to vector<32xf32>
    %261 = vector.shape_cast %260 : vector<32xf32> to vector<1x32xf32>
    %cst_97 = arith.constant 1.280000e+02 : f32
    %262 = vector.broadcast %cst_97 : f32 to vector<1x32xf32>
    %263 = arith.divf %261, %262 : vector<1x32xf32>
    %264 = arith.mulf %258, %258 : vector<1x32xf32>
    %265 = arith.subf %263, %264 : vector<1x32xf32>
    %cst_98 = arith.constant 0.000000e+00 : f32
    %266 = vector.broadcast %cst_98 : f32 to vector<1x32xf32>
    %267 = arith.maximumf %265, %266 : vector<1x32xf32>
    %268 = vector.broadcast %258 : vector<1x32xf32> to vector<128x32xf32>
    %269 = arith.subf %254, %268 : vector<128x32xf32>
    %cst_99 = arith.constant 9.99999974E-6 : f32
    %270 = vector.broadcast %cst_99 : f32 to vector<1x32xf32>
    %271 = arith.addf %267, %270 : vector<1x32xf32>
    %272 = math.rsqrt %271 : vector<1x32xf32>
    %273 = vector.broadcast %272 : vector<1x32xf32> to vector<128x32xf32>
    %274 = arith.mulf %269, %273 : vector<128x32xf32>
    %275 = vector.extract_strided_slice %5 {offsets = [0, 384], sizes = [2, 32], strides = [1, 1]} : vector<2x448xf32> to vector<2x32xf32>
    %276 = vector.shape_cast %275 : vector<2x32xf32> to vector<2x1x32xf32>
    %277 = vector.extract_strided_slice %5 {offsets = [0, 416], sizes = [2, 32], strides = [1, 1]} : vector<2x448xf32> to vector<2x32xf32>
    %278 = vector.shape_cast %277 : vector<2x32xf32> to vector<2x1x32xf32>
    %279 = vector.shape_cast %274 : vector<128x32xf32> to vector<2x64x32xf32>
    %280 = vector.broadcast %276 : vector<2x1x32xf32> to vector<2x64x32xf32>
    %281 = arith.mulf %280, %279 : vector<2x64x32xf32>
    %282 = vector.broadcast %278 : vector<2x1x32xf32> to vector<2x64x32xf32>
    %283 = arith.addf %281, %282 : vector<2x64x32xf32>
    %cst_100 = arith.constant 0.000000e+00 : f32
    %284 = vector.broadcast %cst_100 : f32 to vector<2x64x32xf32>
    %285 = arith.maximumf %283, %284 : vector<2x64x32xf32>
    %c0_101 = arith.constant 0 : index
    %c0_102 = arith.constant 0 : index
    %c0_103 = arith.constant 0 : index
    %286 = vector.load %arg10[%c0_101, %c0_102, %c0_103] : memref<1x1x32xf32, #tpu.memory_space<vmem>>, vector<1x1x32xf32>
    %287 = vector.broadcast %286 : vector<1x1x32xf32> to vector<2x64x32xf32>
    %288 = arith.mulf %285, %287 : vector<2x64x32xf32>
    %cst_104 = arith.constant dense<0.000000e+00> : vector<2x64xf32>
    %289 = vector.multi_reduction <add>, %288, %cst_104 [2] : vector<2x64x32xf32> to vector<2x64xf32>
    %c0_105 = arith.constant 0 : index
    %c0_106 = arith.constant 0 : index
    %290 = vector.load %arg11[%c0_105, %c0_106] : memref<1x1xf32, #tpu.memory_space<vmem>>, vector<1x1xf32>
    %291 = vector.broadcast %290 : vector<1x1xf32> to vector<2x64xf32>
    %292 = arith.addf %289, %291 : vector<2x64xf32>
    %c0_107 = arith.constant 0 : index
    %c0_108 = arith.constant 0 : index
    %293 = vector.load %arg12[%c0_107, %c0_108] : memref<2x64xf32, #tpu.memory_space<vmem>>, vector<2x64xf32>
    tpu.vector_store %arg12[%c0_107, %c0_108], %292 {strides = array<i32>} : memref<2x64xf32, #tpu.memory_space<vmem>>, vector<2x64xf32>,
    return
  }
}

</mosaic_0001>

<bundles_post_ra>
// kernel: tpu_custom_call.1
= control target key start
LH: loop header
LB: loop body
LE: loop exit
PB: predicated region body
PF: predicated region fallthrough
CT: control target
= control target key end

     0   :  { %s5683_s0 = inlined_call_operand.vmem [shape: f32[128,3], index: 0, kind: input, shape index: {}]   ;;  %s5684_s1 = inlined_call_operand.vmem [shape: f32[2,16], index: 1, kind: input, shape index: {}]   ;;  %s5685_s2 = inlined_call_operand.vmem [shape: f32[16,448], index: 2, kind: input, shape index: {}]   ;;  %s5686_s3 = inlined_call_operand.vmem [shape: f32[1,448], index: 3, kind: input, shape index: {}]   ;;  %s5687_s4 = inlined_call_operand.vmem [shape: f32[3,32], index: 4, kind: input, shape index: {}]   ;;  %s5688_s5 = inlined_call_operand.vmem [shape: f32[1,32], index: 5, kind: input, shape index: {}]   ;;  %s5689_s6 = inlined_call_operand.vmem [shape: bf16[3,32,32], index: 6, kind: input, shape index: {}]   ;;  %s5690_s7 = inlined_call_operand.vmem [shape: f32[3,1,32], index: 7, kind: input, shape index: {}]   ;;  %s5691_s8 = inlined_call_operand.hbm [shape: bf16[3,32,32], index: 8, kind: input, shape index: {}]   ;;  %s5692_s9 = inlined_call_operand.vmem [shape: f32[3,1,32], index: 9, kind: input, shape index: {}]   ;;  %s5693_s10 = inlined_call_operand.vmem [shape: f32[1,1,32], index: 10, kind: input, shape index: {}]   ;;  %s5694_s11 = inlined_call_operand.<no memory space> [shape: f32[1,1], index: 11, kind: input, shape index: {}]   ;;  %s5695_s12 = inlined_call_operand.hbm [shape: f32[2,64], index: 12, kind: output, shape index: {}]  }
   0x1   :  { %v17_v0 = vstv %s5694_s11 }
   0x2   :  { %18 = vst [vmem:[#allocation2] sm:$0x1] %v17_v0 }
   0x3   :  { %19 = vsyncpa [#allocation4], 0 }
   0x4   :  { %20 = vsyncpa [#allocation5], 0  ;;  %s3719_s23 = smov [#allocation3]  }
   0x5   :  { %s42_s24 = sshll.u32 %s3719_s23, 4  ;;  %s43_s24 = int_to_ptr.vmem [resolvable:$true] %s42_s24 }
   0x6   :  { %s3683_s25 = scalar_lea.vmem %s43_s24, 768  ;;  %p3688_p1 = scmp.lt.s32.totalorder %s43_s24, %s43_s24 }
   0x7   :  { %p3684_p0 = scmp.ne.s32.totalorder %s43_s24, %s3683_s25  ;;  %p3689_p2 = scmp.lt.s32.totalorder %s3683_s25, %s3683_s25 }
   0x9   :  { %p3690_p3 = por %p3689_p2, %p3688_p1 }
   0xb   :  { %p3691_p4 = pnand %p3690_p3, %p3684_p0 }
   0xd   :  { %3694 = shalt.err (!%p3691_p4)
}
   0xe   :  { %s3720_s26 = smov 64   ;;  %s3721_s27 = smov 4  }
   0xf   :  { %48 = dma.hbm_to_vmem [thread:$0]  %s5691_s8, 768, %s43_s24, [#allocation4], %s3720_s26, %s3720_s26, %s3721_s27  }
  0x10   :  { %3715 = dma.done.wait [#allocation4], 768  }
  0x11   :  { %3716 = vsyncadd [#allocation4], 4294966528  ;;  %v3722_v1 = vmov 0.0   ;;  %v65_v2 = vld [vmem:[%s5685_s2 + $0x28] sm:$0xff]  ;;  %v64_v3 = vld [vmem:[%s5685_s2 + $0x20] sm:$0xff]  ;;  %vm90_vm0 = vcmask 130048   ;;  %v5696_v30 = vlaneseq }
  0x12   :  { %158 = vmatprep.mubr.f32.mxu0 %v3722_v1  ;;  %229 = vmatprep.mubr.f32.mxu1 %v3722_v1  ;;  %v61_v4 = vld [vmem:[%s5685_s2 + $0x8] sm:$0xff]  ;;  %v60_v5 = vld [vmem:[%s5685_s2] sm:$0xff]  ;;  %vm309_vm1 = vcmask 1042432   ;;  %vm260_vm2 = vcmask 23552   ;;  %v67_v9 = vld [vmem:[%s5685_s2 + $0x38] sm:$0xff]  ;;  %vm458_vm3 = vcmask 261120  }
  0x13   :  { %122 = vmatprep.subr.mxu0 %v65_v2  ;;  %v59_v6 = vld [vmem:[%s5684_s1] sm:$0x3]  ;;  %193 = vmatprep.subr.mxu1 %v67_v9  ;;  %v66_v10 = vld [vmem:[%s5685_s2 + $0x30] sm:$0xff]  ;;  %v63_v11 = vld [vmem:[%s5685_s2 + $0x18] sm:$0xff]  ;;  %v3907_v31 = vshrl.u32 %v5696_v30, 7  ;;  %vm3211_vm4 = vcmask 130112  }
  0x14   :  { %123 = vmatpush1.msra.mxu0 %v64_v3  ;;  %v252_v7 = vld [vmem:[%s5687_s4] sm:$0x7]  ;;  %v237_v12 = vld [vmem:[%s5683_s0 + $0x8] sm:$0xff]  ;;  %v62_v13 = vld [vmem:[%s5685_s2 + $0x10] sm:$0xff]  ;;  %194 = vmatpush1.msra.mxu1 %v66_v10  ;;  %v3723_v32 = vmov 1966171168  }
  0x15   :  { %124 = vmatprep.subr.mxu0 %v61_v4  ;;  %v236_v8 = vld [vmem:[%s5683_s0] sm:$0xff]  ;;  %v238_v14 = vld [vmem:[%s5683_s0 + $0x10] sm:$0xff]  ;;  %v239_v15 = vld [vmem:[%s5683_s0 + $0x18] sm:$0xff]  ;;  %195 = vmatprep.subr.mxu1 %v63_v11  ;;  %5701 = vst [vmem:[#allocation9_spill] sm:$0xff] %v3907_v31  ;;  %v591_v33 = vunpack.c.l.s4 %v3723_v32  ;;  %v3910_v34 = vsub.s32 0, %v3907_v31  ;;  %v76_v37 = vsub.s32 1, %v3907_v31 }
  0x16   :  { %125 = vmatpush1.msra.mxu0 %v60_v5  ;;  %v244_v16 = vld [vmem:[%s5683_s0 + $0x40] sm:$0xff]  ;;  %196 = vmatpush1.msra.mxu1 %v62_v13  ;;  %v245_v18 = vld [vmem:[%s5683_s0 + $0x48] sm:$0xff]  ;;  %v246_v19 = vld [vmem:[%s5683_s0 + $0x50] sm:$0xff]  ;;  %v80_v39 = vsub.s32 2, %v3907_v31  ;;  %v84_v50 = vsub.s32 3, %v3907_v31  ;;  %vm3218_vm5 = vcmask 195712  }
  0x17   :  { %3314 = vmatmul.mubr.msk.f32.vlgmr.msra.gmra.mxu0 %vm90_vm0, %v59_v6  ;;  %3491 = vmatprep.subr.msk.mxu0 %vm309_vm1, %v252_v7  ;;  %v240_v17 = vld [vmem:[%s5683_s0 + $0x20] sm:$0xff]  ;;  %v241_v20 = vld [vmem:[%s5683_s0 + $0x28] sm:$0xff]  ;;  %v242_v21 = vld [vmem:[%s5683_s0 + $0x30] sm:$0xff]  ;;  %v592_v36 = vunpack.c.0.s8 %v591_v33  ;;  %vm3225_vm6 = vcmask 261312   ;;  %vm3232_vm7 = vcmask 326912   ;;  %vm3239_vm8 = vcmask 392512  }
  0x18   :  { %3492 = vmatpush3.msk.msra.mxu0 %vm309_vm1, %v252_v7  ;;  %3493 = vmatprep.mubr.msk.f32.mxu0 %vm260_vm2, %v236_v8  ;;  %v247_v22 = vld [vmem:[%s5683_s0 + $0x58] sm:$0xff]  ;;  %v248_v23 = vld [vmem:[%s5683_s0 + $0x60] sm:$0xff]  ;;  %v249_v25 = vld [vmem:[%s5683_s0 + $0x68] sm:$0xff]  ;;  %vm3246_vm9 = vcmask 458112   ;;  %vm3253_vm10 = vcmask 523712   ;;  %vm3294_vm11 = vcmask 1041409  }
  0x19   :  { %3315 = vmatmul.mubr.msk.f32.vlgmr.msra.gmra.mxu1 %vm90_vm0, %v59_v6  ;;  %3637 = vmatprep.subr.msk.mxu1 %vm309_vm1, %v252_v7  ;;  %v243_v24 = vld [vmem:[%s5683_s0 + $0x38] sm:$0xff]  ;;  %v250_v26 = vld [vmem:[%s5683_s0 + $0x70] sm:$0xff]  ;;  %v3649_v28 = vld [vmem:[%s5689_s6 + $0x8] sm:$0xff]   ;;  %v3919_v40 = vsub.s32 %v592_v36, %v3907_v31  ;;  %vm3297_vm12 = vcmask 517120  }
  0x1a   :  { %3505 = vmatprep.mubr.msk.f32.mxu1 %vm260_vm2, %v244_v16  ;;  %3638 = vmatpush3.msk.msra.mxu1 %vm309_vm1, %v252_v7  ;;  %v251_v27 = vld [vmem:[%s5683_s0 + $0x78] sm:$0xff]  ;;  %v3650_v29 = vld [vmem:[%s5689_s6] sm:$0xff]  }
  0x1b   :  { %3494 = vmatmul.mubr.msk.f32.vlgmr.msra.gmra.mxu0 %vm260_vm2, %v237_v12  ;;  %3517 = vmatprep.subr.bf16.mxu1 %v3649_v28  ;;  %v68_v35 = vld [vmem:[%s5686_s3] sm:$0xf]  ;;  %s3724_s3 = smov 96  }
  0x1c   :  { %3496 = vmatprep.mubr.msk.f32.mxu0 %vm260_vm2, %v238_v14  ;;  %v73_v38 = vrot.slane %v68_v35, %v3910_v34  ;;  %v77_v41 = vrot.slane %v68_v35, %v76_v37  ;;  %v3924_v45 = vld [vmem:[%s5688_s5] ss:$0 sm:$0xff]  ;;  %v81_v46 = vrot.slane %v68_v35, %v80_v39  ;;  %v85_v6 = vrot.slane %v68_v35, %v84_v50 }
  0x1d   :  { %3506 = vmatmul.mubr.msk.f32.vlgmr.msra.gmra.mxu1 %vm260_vm2, %v245_v18 }
  0x1e   :  { %3508 = vmatprep.mubr.msk.f32.mxu1 %vm260_vm2, %v246_v19  ;;  %3518 = vmatpush3.bf16.msra.mxu1 %v3649_v28 }
  0x1f   :  { %3497 = vmatmul.mubr.msk.f32.gmra.mxu0 %vm260_vm2, %v239_v15  ;;  %3519 = vmatprep.subr.bf16.mxu1 %v3650_v29 }
  0x20   :  { %3499 = vmatprep.mubr.msk.f32.mxu0 %vm260_vm2, %v240_v17 }
  0x21   :  { %3509 = vmatmul.mubr.msk.f32.gmra.mxu1 %vm260_vm2, %v247_v22 }
  0x22   :  { %3511 = vmatprep.mubr.msk.f32.mxu1 %vm260_vm2, %v248_v23  ;;  %3520 = vmatpush3.bf16.msra.mxu1 %v3650_v29 }
  0x23   :  { %3500 = vmatmul.mubr.msk.f32.gmra.mxu0 %vm260_vm2, %v241_v20 }
  0x24   :  { %3502 = vmatprep.mubr.msk.f32.mxu0 %vm260_vm2, %v242_v21 }
  0x25   :  { %3512 = vmatmul.mubr.msk.f32.gmra.mxu1 %vm260_vm2, %v249_v25 }
  0x26   :  { %3514 = vmatprep.mubr.msk.f32.mxu1 %vm260_vm2, %v250_v26 }
  0x27   :  { %3503 = vmatmul.mubr.msk.f32.gmra.mxu0 %vm260_vm2, %v243_v24 }
  0x29   :  { %3515 = vmatmul.mubr.msk.f32.gmra.mxu1 %vm260_vm2, %v251_v27 }
  0xd7   :  { %v160_v42 = vpop.f32.mrf.mxu0 }
  0xd8   :  { %v161_v43 = vadd.f32 %v160_v42, %v73_v38 }
  0xd9   :  { %v162_v44 = vpop.f32.mrf.mxu0  ;;  %v231_v55 = vpop.f32.mrf.mxu1 }
  0xda   :  { %v596_v47 = vrot.slane %v161_v43, %v3919_v40  ;;  %v163_v48 = vadd.f32 %v162_v44, %v77_v41  ;;  %v232_v57 = vadd.f32 %v231_v55, %v81_v46 }
  0xdb   :  { %v3495_v49 = vpop.f32.mrf.mxu0  ;;  %v233_v62 = vpop.f32.mrf.mxu1 }
  0xdc   :  { %v597_v51 = vcombine.high %v596_v47, %v596_v47  ;;  %v604_v52 = vrot.slane %v596_v47, %v3919_v40  ;;  %v3930_v53 = vrot.slane %v163_v48, %v3919_v40  ;;  %v3933_v54 = vadd.f32 %v3495_v49, %v3924_v45 }
  0xdd   :  { %v379_v56 = vpop.f32.mrf.mxu0  ;;  %v3951_v3 = vrot.slane %v232_v57, %v3919_v40  ;;  %v3507_v15 = vpop.f32.mrf.mxu1  ;;  %v234_v23 = vadd.f32 %v233_v62, %v85_v6 }
  0xde   :  { %v611_v58 = vrot.slane %v597_v51, %v3919_v40  ;;  %v3937_v59 = vrot.slane %v604_v52, %v3910_v34  ;;  %v1398_v60 = vcombine.high %v3930_v53, %v3930_v53  ;;  %v460_v63 = vsel %vm458_vm3, %v3933_v54, 0.0 }
  0xdf   :  { %v499_v0 = vmul.f32 %v3933_v54, %v3933_v54  ;;  %v3948_v1 = vadd.f32 %v3924_v45, %v379_v56  ;;  %v3498_v2 = vpop.f32.mrf.mxu0  ;;  %5702 = vst [vmem:[#allocation10_spill] sm:$0xff] %v3951_v3  ;;  %v2203_v11 = vcombine.high %v3951_v3, %v3951_v3  ;;  %v419_v32 = vpop.f32.mrf.mxu1  ;;  %v4001_v38 = vrot.slane %v234_v23, %v3919_v40 }
  0xe0   :  { %v3954_v4 = vrot.slane %v1398_v60, %v3919_v40  ;;  %v3957_v5 = vadd.f32 %v3498_v2, %v3924_v45  ;;  %638 = vrot.lane.b32.xlu0 %v3937_v59, %s3724_s3  ;;  %v3969_v12 = vrot.slane %v611_v58, %v3910_v34  ;;  %v4020_v55 = vadd.f32 %v3924_v45, %v419_v32 }
  0xe1   :  { %v515_v7 = vsel %vm458_vm3, %v499_v0, 0.0  ;;  %v459_v8 = vsel %vm458_vm3, %v3948_v1, 0.0  ;;  %v498_v9 = vmul.f32 %v3948_v1, %v3948_v1  ;;  %v389_v10 = vpop.f32.mrf.mxu0  ;;  %v3980_v20 = vrot.slane %v2203_v11, %v3919_v40  ;;  %5704 = vst [vmem:[#allocation12_spill] sm:$0xff] %v4001_v38  ;;  %v3510_v56 = vpop.f32.mrf.mxu1 }
  0xe2   :  { %v461_v13 = vadd.f32 %v460_v63, %v459_v8  ;;  %v501_v14 = vmul.f32 %v3957_v5, %v3957_v5  ;;  %v3975_v17 = vadd.f32 %v3924_v45, %v389_v10  ;;  %v464_v24 = vsel %vm458_vm3, %v3957_v5, 0.0 }
  0xe3   :  { %v514_v16 = vsel %vm458_vm3, %v498_v9, 0.0  ;;  %v3501_v18 = vpop.f32.mrf.mxu0  ;;  %5703 = vst [vmem:[#allocation11_spill] sm:$0xff] %v3980_v20  ;;  %v3008_v47 = vcombine.high %v4001_v38, %v4001_v38  ;;  %v4036_v8 = vadd.f32 %v3507_v15, %v3924_v45  ;;  %v506_v11 = vmul.f32 %v4020_v55, %v4020_v55 }
  0xe4   :  { %v516_v21 = vadd.f32 %v515_v7, %v514_v16  ;;  %v3983_v22 = vadd.f32 %v3501_v18, %v3924_v45  ;;  %640 = vrot.lane.b32.xlu0 %v3969_v12, %s3724_s3  ;;  %v462_v25 = vsel %vm458_vm3, %v3975_v17, 0.0  ;;  %v500_v26 = vmul.f32 %v3975_v17, %v3975_v17 }
  0xe5   :  { %v399_v27 = vpop.f32.mrf.mxu0  ;;  %v463_v28 = vadd.f32 %v462_v25, %v461_v13  ;;  %v519_v33 = vsel %vm458_vm3, %v501_v14, 0.0  ;;  %v4027_v62 = vrot.slane %v3008_v47, %v3919_v40  ;;  %v429_v13 = vpop.f32.mrf.mxu1  ;;  %v474_v18 = vsel %vm458_vm3, %v4020_v55, 0.0 }
  0xe6   :  { %v3994_v29 = vadd.f32 %v3924_v45, %v399_v27  ;;  %v517_v35 = vsel %vm458_vm3, %v500_v26, 0.0  ;;  %v503_v36 = vmul.f32 %v3983_v22, %v3983_v22  ;;  %v468_v41 = vsel %vm458_vm3, %v3983_v22, 0.0 }
  0xe7   :  { %v3504_v37 = vpop.f32.mrf.mxu0  ;;  %v518_v39 = vadd.f32 %v517_v35, %v516_v21  ;;  %v465_v42 = vadd.f32 %v464_v24, %v463_v28  ;;  %5705 = vst [vmem:[#allocation13_spill] sm:$0xff] %v4027_v62  ;;  %v476_v24 = vsel %vm458_vm3, %v4036_v8, 0.0  ;;  %v507_v15 = vmul.f32 %v4036_v8, %v4036_v8  ;;  %v3513_v32 = vpop.f32.mrf.mxu1 }
  0xe8   :  { %v466_v43 = vsel %vm458_vm3, %v3994_v29, 0.0  ;;  %v502_v44 = vmul.f32 %v3994_v29, %v3994_v29  ;;  %v4010_v46 = vadd.f32 %v3504_v37, %v3924_v45  ;;  %v523_v57 = vsel %vm458_vm3, %v503_v36, 0.0 }
  0xe9   :  { %v409_v49 = vpop.f32.mrf.mxu0  ;;  %v467_v50 = vadd.f32 %v466_v43, %v465_v42  ;;  %v520_v51 = vadd.f32 %v519_v33, %v518_v39  ;;  %v529_v25 = vsel %vm458_vm3, %v506_v11, 0.0  ;;  %v4050_v26 = vadd.f32 %v3924_v45, %v429_v13  ;;  %v439_v42 = vpop.f32.mrf.mxu1 }
  0xea   :  { %v4017_v52 = vadd.f32 %v3924_v45, %v409_v49  ;;  %v521_v58 = vsel %vm458_vm3, %v502_v44, 0.0  ;;  %v505_v60 = vmul.f32 %v4010_v46, %v4010_v46  ;;  %v472_v6 = vsel %vm458_vm3, %v4010_v46, 0.0 }
  0xeb   :  { %v522_v63 = vadd.f32 %v521_v58, %v520_v51  ;;  %v469_v0 = vadd.f32 %v468_v41, %v467_v50  ;;  %v531_v36 = vsel %vm458_vm3, %v507_v15, 0.0  ;;  %v4054_v37 = vadd.f32 %v3510_v56, %v3924_v45  ;;  %v3516_v56 = vpop.f32.mrf.mxu1 }
  0xec   :  { %v470_v2 = vsel %vm458_vm3, %v4017_v52, 0.0  ;;  %v504_v7 = vmul.f32 %v4017_v52, %v4017_v52  ;;  %v527_v14 = vsel %vm458_vm3, %v505_v60, 0.0  ;;  %v478_v39 = vsel %vm458_vm3, %v4050_v26, 0.0 }
  0xed   :  { %v471_v9 = vadd.f32 %v470_v2, %v469_v0  ;;  %v524_v10 = vadd.f32 %v523_v57, %v522_v63  ;;  %v508_v41 = vmul.f32 %v4050_v26, %v4050_v26  ;;  %v480_v47 = vsel %vm458_vm3, %v4054_v37, 0.0 }
  0xee   :  { %v525_v16 = vsel %vm458_vm3, %v504_v7, 0.0  ;;  %v509_v49 = vmul.f32 %v4054_v37, %v4054_v37  ;;  %v4066_v51 = vadd.f32 %v3924_v45, %v439_v42  ;;  %v4070_v63 = vadd.f32 %v3513_v32, %v3924_v45 }
  0xef   :  { %v526_v21 = vadd.f32 %v525_v16, %v524_v10  ;;  %v473_v23 = vadd.f32 %v472_v6, %v471_v9  ;;  %v533_v50 = vsel %vm458_vm3, %v508_v41, 0.0  ;;  %v449_v6 = vpop.f32.mrf.mxu1 }
  0xf0   :  { %v535_v60 = vsel %vm458_vm3, %v509_v49, 0.0  ;;  %v482_v0 = vsel %vm458_vm3, %v4066_v51, 0.0  ;;  %v510_v2 = vmul.f32 %v4066_v51, %v4066_v51  ;;  %v484_v10 = vsel %vm458_vm3, %v4070_v63, 0.0 }
  0xf1   :  { %v475_v27 = vadd.f32 %v474_v18, %v473_v23  ;;  %v528_v28 = vadd.f32 %v527_v14, %v526_v21  ;;  %v511_v11 = vmul.f32 %v4070_v63, %v4070_v63  ;;  %v4082_v14 = vadd.f32 %v3924_v45, %v449_v6 }
  0xf2   :  { %v537_v13 = vsel %vm458_vm3, %v510_v2, 0.0  ;;  %v4086_v23 = vadd.f32 %v3516_v56, %v3924_v45 }
  0xf3   :  { %v530_v33 = vadd.f32 %v529_v25, %v528_v28  ;;  %v477_v35 = vadd.f32 %v476_v24, %v475_v27  ;;  %v539_v21 = vsel %vm458_vm3, %v511_v11, 0.0  ;;  %v486_v24 = vsel %vm458_vm3, %v4082_v14, 0.0 }
  0xf4   :  { %v512_v15 = vmul.f32 %v4082_v14, %v4082_v14  ;;  %v488_v28 = vsel %vm458_vm3, %v4086_v23, 0.0  ;;  %v513_v32 = vmul.f32 %v4086_v23, %v4086_v23 }
  0xf5   :  { %v479_v43 = vadd.f32 %v478_v39, %v477_v35  ;;  %v532_v44 = vadd.f32 %v531_v36, %v530_v33 }
  0xf6   :  { %v541_v33 = vsel %vm458_vm3, %v512_v15, 0.0  ;;  %v543_v45 = vsel %vm458_vm3, %v513_v32, 0.0 }
  0xf7   :  { %v534_v57 = vadd.f32 %v533_v50, %v532_v44  ;;  %v481_v58 = vadd.f32 %v480_v47, %v479_v43 }
  0xf9   :  { %v483_v7 = vadd.f32 %v482_v0, %v481_v58  ;;  %v536_v9 = vadd.f32 %v535_v60, %v534_v57 }
  0xfb   :  { %v538_v16 = vadd.f32 %v537_v13, %v536_v9  ;;  %v485_v18 = vadd.f32 %v484_v10, %v483_v7 }
  0xfd   :  { %v487_v25 = vadd.f32 %v486_v24, %v485_v18  ;;  %v540_v27 = vadd.f32 %v539_v21, %v538_v16 }
  0xff   :  { %v489_v35 = vadd.f32 %v488_v28, %v487_v25  ;;  %v542_v36 = vadd.f32 %v541_v33, %v540_v27 }
 0x101   :  { %v490_v39 = vrot.slane %v489_v35, 4  ;;  %v544_v41 = vadd.f32 %v543_v45, %v542_v36 }
 0x103   :  { %v491_v42 = vadd.f32 %v490_v39, %v489_v35  ;;  %v545_v43 = vrot.slane %v544_v41, 4 }
 0x105   :  { %v492_v44 = vrot.slane %v491_v42, 2  ;;  %v546_v47 = vadd.f32 %v545_v43, %v544_v41 }
 0x107   :  { %v493_v49 = vadd.f32 %v492_v44, %v491_v42  ;;  %v547_v50 = vrot.slane %v546_v47, 2 }
 0x109   :  { %v494_v56 = vrot.slane %v493_v49, 1  ;;  %v548_v57 = vadd.f32 %v547_v50, %v546_v47 }
 0x10b   :  { %v495_v58 = vadd.f32 %v494_v56, %v493_v49  ;;  %v549_v60 = vrot.slane %v548_v57, 1 }
 0x10d   :  { %v4098_v0 = vmul.f32 0.0078125, %v495_v58  ;;  %v550_v2 = vadd.f32 %v549_v60, %v548_v57 }
 0x10f   :  { %v551_v6 = vmul.f32 0.0078125, %v550_v2  ;;  %v552_v7 = vmul.f32 %v4098_v0, %v4098_v0  ;;  %v555_v16 = vsub.f32 %v3948_v1, %v4098_v0  ;;  %v556_v18 = vsub.f32 %v3933_v54, %v4098_v0 }
 0x110   :  { %v557_v21 = vsub.f32 %v3975_v17, %v4098_v0  ;;  %v558_v24 = vsub.f32 %v3957_v5, %v4098_v0  ;;  %v559_v25 = vsub.f32 %v3994_v29, %v4098_v0  ;;  %v560_v27 = vsub.f32 %v3983_v22, %v4098_v0 }
 0x111   :  { %v553_v9 = vsub.f32 %v551_v6, %v552_v7  ;;  %v561_v45 = vsub.f32 %v4017_v52, %v4098_v0  ;;  %v562_v39 = vsub.f32 %v4010_v46, %v4098_v0  ;;  %v563_v43 = vsub.f32 %v4020_v55, %v4098_v0 }
 0x112   :  { %v564_v44 = vsub.f32 %v4036_v8, %v4098_v0 }
 0x113   :  { %v554_v10 = vmax.f32 %v553_v9, 0.0 }
 0x115   :  { %v571_v11 = vadd.f32 1e-05, %v554_v10 }
 0x117   :  { %3661 = vrsqrt.f32 %v571_v11 }
 0x124   :  { %v4102_v13 = vpop.eup %3661 }
 0x125   :  { %v573_v15 = vmul.f32 %v4102_v13, %v555_v16  ;;  %v574_v28 = vmul.f32 %v4102_v13, %v556_v18  ;;  %v575_v32 = vmul.f32 %v4102_v13, %v557_v21  ;;  %v576_v33 = vmul.f32 %v4102_v13, %v558_v24 }
 0x126   :  { %v577_v35 = vmul.f32 %v4102_v13, %v559_v25  ;;  %v578_v36 = vmul.f32 %v4102_v13, %v560_v27  ;;  %v579_v42 = vmul.f32 %v4102_v13, %v561_v45  ;;  %v580_v56 = vmul.f32 %v4102_v13, %v562_v39 }
 0x127   :  { %v622_v41 = vmul.f32 %v3937_v59, %v573_v15  ;;  %v623_v47 = vmul.f32 %v3937_v59, %v574_v28  ;;  %v624_v49 = vmul.f32 %v3937_v59, %v575_v32  ;;  %v625_v50 = vmul.f32 %v3937_v59, %v576_v33 }
 0x128   :  { %v626_v58 = vmul.f32 %v3937_v59, %v577_v35  ;;  %v627_v60 = vmul.f32 %v3937_v59, %v578_v36  ;;  %v581_v2 = vmul.f32 %v4102_v13, %v563_v43  ;;  %v582_v6 = vmul.f32 %v4102_v13, %v564_v44 }
 0x129   :  { %v565_v21 = vsub.f32 %v4050_v26, %v4098_v0  ;;  %v628_v35 = vmul.f32 %v3937_v59, %v579_v42  ;;  %v629_v36 = vmul.f32 %v3937_v59, %v580_v56 }
 0x12a   :  { %v631_v43 = vmul.f32 %v3969_v12, %v582_v6 }
 0x152   :  { %v4136_v57 = vpop.permute.xlu0 %638 }
 0x153   :  { %v644_v7 = vadd.f32 %v4136_v57, %v622_v41  ;;  %v645_v9 = vadd.f32 %v4136_v57, %v623_v47  ;;  %v646_v10 = vadd.f32 %v4136_v57, %v624_v49  ;;  %v647_v11 = vadd.f32 %v4136_v57, %v625_v50 }
 0x154   :  { %v648_v16 = vadd.f32 %v4136_v57, %v626_v58  ;;  %v649_v18 = vadd.f32 %v4136_v57, %v627_v60  ;;  %v630_v41 = vmul.f32 %v3969_v12, %v581_v2  ;;  %v650_v44 = vadd.f32 %v4136_v57, %v628_v35 }
 0x155   :  { %v665_v24 = vmax.f32 %v644_v7, 0.0  ;;  %v666_v15 = vmax.f32 %v645_v9, 0.0  ;;  %v667_v25 = vmax.f32 %v646_v10, 0.0  ;;  %v668_v27 = vmax.f32 %v647_v11, 0.0 }
 0x156   :  { %v4150_v28 = vpop.permute.xlu0 %640  ;;  %v669_v32 = vmax.f32 %v648_v16, 0.0  ;;  %v670_v33 = vmax.f32 %v649_v18, 0.0  ;;  %v651_v47 = vadd.f32 %v4136_v57, %v629_v36  ;;  %v566_v49 = vsub.f32 %v4054_v37, %v4098_v0 }
 0x157   :  { %v681_v45 = vpack.c.bf16 %v666_v15, %v665_v24  ;;  %v682_v39 = vpack.c.bf16 %v668_v27, %v667_v25  ;;  %v567_v50 = vsub.f32 %v4066_v51, %v4098_v0  ;;  %v652_v56 = vadd.f32 %v4150_v28, %v630_v41 }
 0x158   :  { %v683_v42 = vpack.c.bf16 %v670_v33, %v669_v32  ;;  %v653_v58 = vadd.f32 %v4150_v28, %v631_v43  ;;  %v568_v60 = vsub.f32 %v4070_v63, %v4098_v0  ;;  %v583_v2 = vmul.f32 %v4102_v13, %v565_v21 }
 0x159   :  { %3521 = vmatprep.mubr.msk.bf16.mxu1 %vm458_vm3, %v681_v45  ;;  %v584_v6 = vmul.f32 %v4102_v13, %v566_v49  ;;  %v585_v7 = vmul.f32 %v4102_v13, %v567_v50  ;;  %v671_v10 = vmax.f32 %v650_v44, 0.0  ;;  %v672_v11 = vmax.f32 %v651_v47, 0.0 }
 0x15a   :  { %3522 = vmatmul.mubr.msk.bf16.vlgmr.msra.gmra.mxu1 %vm458_vm3, %v682_v39  ;;  %v586_v9 = vmul.f32 %v4102_v13, %v568_v60  ;;  %v673_v16 = vmax.f32 %v652_v56, 0.0  ;;  %v674_v18 = vmax.f32 %v653_v58, 0.0  ;;  %v569_v24 = vsub.f32 %v4082_v14, %v4098_v0 }
 0x15b   :  { %3525 = vmatprep.mubr.msk.bf16.mxu1 %vm458_vm3, %v683_v42  ;;  %v632_v15 = vmul.f32 %v3969_v12, %v583_v2  ;;  %v633_v25 = vmul.f32 %v3969_v12, %v584_v6  ;;  %v570_v21 = vsub.f32 %v4086_v23, %v4098_v0  ;;  %v634_v27 = vmul.f32 %v3969_v12, %v585_v7 }
 0x15c   :  { %v635_v32 = vmul.f32 %v3969_v12, %v586_v9  ;;  %v684_v33 = vpack.c.bf16 %v672_v11, %v671_v10  ;;  %v685_v45 = vpack.c.bf16 %v674_v18, %v673_v16  ;;  %v587_v43 = vmul.f32 %v4102_v13, %v569_v24  ;;  %v4199_v11 = vld [vmem:[%s5690_s7] ss:$0 sm:$0xff] }
 0x15d   :  { %v654_v35 = vadd.f32 %v4150_v28, %v632_v15  ;;  %v655_v36 = vadd.f32 %v4150_v28, %v633_v25  ;;  %v656_v39 = vadd.f32 %v4150_v28, %v634_v27  ;;  %v588_v0 = vmul.f32 %v4102_v13, %v570_v21 }
 0x15e   :  { %v657_v41 = vadd.f32 %v4150_v28, %v635_v32  ;;  %v636_v42 = vmul.f32 %v3969_v12, %v587_v43 }
 0x15f   :  { %v675_v44 = vmax.f32 %v654_v35, 0.0  ;;  %v676_v47 = vmax.f32 %v655_v36, 0.0  ;;  %v677_v49 = vmax.f32 %v656_v39, 0.0  ;;  %v637_v56 = vmul.f32 %v3969_v12, %v588_v0 }
 0x160   :  { %v678_v50 = vmax.f32 %v657_v41, 0.0  ;;  %v658_v60 = vadd.f32 %v4150_v28, %v636_v42 }
 0x161   :  { %v686_v58 = vpack.c.bf16 %v676_v47, %v675_v44  ;;  %v659_v2 = vadd.f32 %v4150_v28, %v637_v56 }
 0x162   :  { %3526 = vmatmul.mubr.msk.bf16.gmra.mxu1 %vm458_vm3, %v684_v33  ;;  %v687_v6 = vpack.c.bf16 %v678_v50, %v677_v49  ;;  %v679_v13 = vmax.f32 %v658_v60, 0.0 }
 0x163   :  { %3529 = vmatprep.mubr.msk.bf16.mxu1 %vm458_vm3, %v685_v45  ;;  %v680_v7 = vmax.f32 %v659_v2, 0.0 }
 0x165   :  { %v688_v9 = vpack.c.bf16 %v680_v7, %v679_v13 }
 0x16a   :  { %3530 = vmatmul.mubr.msk.bf16.gmra.mxu1 %vm458_vm3, %v686_v58 }
 0x16b   :  { %3533 = vmatprep.mubr.msk.bf16.mxu1 %vm458_vm3, %v687_v6 }
 0x172   :  { %3534 = vmatmul.mubr.msk.bf16.gmra.mxu1 %vm458_vm3, %v688_v9 }
 0x21a   :  { %v3523_v10 = vpop.f32.mrf.mxu1 }
 0x21b   :  { %v4205_v15 = vadd.f32 %v3523_v10, %v4199_v11 }
 0x21c   :  { %v765_v16 = vpop.f32.mrf.mxu1 }
 0x21d   :  { %v4202_v18 = vadd.f32 %v4199_v11, %v765_v16  ;;  %v868_v35 = vmul.f32 %v4205_v15, %v4205_v15  ;;  %v831_v41 = vsel %vm458_vm3, %v4205_v15, 0.0 }
 0x21e   :  { %v3524_v24 = vpop.f32.mrf.mxu1 }
 0x21f   :  { %v866_v21 = vmul.f32 %v4202_v18, %v4202_v18  ;;  %v4210_v27 = vadd.f32 %v3524_v24, %v4199_v11  ;;  %v828_v36 = vsel %vm458_vm3, %v4202_v18, 0.0  ;;  %v885_v60 = vsel %vm458_vm3, %v868_v35, 0.0 }
 0x220   :  { %v768_v25 = vpop.f32.mrf.mxu1 }
 0x221   :  { %v4213_v32 = vadd.f32 %v4199_v11, %v768_v25  ;;  %v882_v44 = vsel %vm458_vm3, %v866_v21, 0.0  ;;  %v869_v47 = vmul.f32 %v4210_v27, %v4210_v27  ;;  %v833_v2 = vsel %vm458_vm3, %v4210_v27, 0.0 }
 0x222   :  { %v3527_v33 = vpop.f32.mrf.mxu1 }
 0x223   :  { %v829_v45 = vsel %vm458_vm3, %v4213_v32, 0.0  ;;  %v867_v39 = vmul.f32 %v4213_v32, %v4213_v32  ;;  %v4236_v6 = vadd.f32 %v3527_v33, %v4199_v11  ;;  %v887_v16 = vsel %vm458_vm3, %v869_v47, 0.0 }
 0x224   :  { %v830_v43 = vadd.f32 %v829_v45, %v828_v36  ;;  %v781_v0 = vpop.f32.mrf.mxu1 }
 0x225   :  { %v883_v49 = vsel %vm458_vm3, %v867_v39, 0.0  ;;  %v4230_v50 = vadd.f32 %v4199_v11, %v781_v0  ;;  %v872_v45 = vmul.f32 %v4236_v6, %v4236_v6 }
 0x226   :  { %v832_v42 = vadd.f32 %v831_v41, %v830_v43  ;;  %v884_v56 = vadd.f32 %v883_v49, %v882_v44  ;;  %v3528_v58 = vpop.f32.mrf.mxu1  ;;  %v839_v49 = vsel %vm458_vm3, %v4236_v6, 0.0 }
 0x227   :  { %v870_v13 = vmul.f32 %v4230_v50, %v4230_v50  ;;  %v835_v24 = vsel %vm458_vm3, %v4230_v50, 0.0  ;;  %v4244_v25 = vadd.f32 %v3528_v58, %v4199_v11 }
 0x228   :  { %v886_v7 = vadd.f32 %v885_v60, %v884_v56  ;;  %v834_v9 = vadd.f32 %v833_v2, %v832_v42  ;;  %v784_v10 = vpop.f32.mrf.mxu1 }
 0x229   :  { %v4247_v21 = vadd.f32 %v4199_v11, %v784_v10  ;;  %v889_v39 = vsel %vm458_vm3, %v870_v13, 0.0  ;;  %v873_v42 = vmul.f32 %v4244_v25, %v4244_v25 }
 0x22a   :  { %v836_v35 = vadd.f32 %v835_v24, %v834_v9  ;;  %v888_v33 = vadd.f32 %v887_v16, %v886_v7  ;;  %v3531_v36 = vpop.f32.mrf.mxu1  ;;  %v893_v7 = vsel %vm458_vm3, %v872_v45, 0.0  ;;  %v841_v9 = vsel %vm458_vm3, %v4244_v25, 0.0 }
 0x22b   :  { %v837_v41 = vsel %vm458_vm3, %v4247_v21, 0.0  ;;  %v871_v43 = vmul.f32 %v4247_v21, %v4247_v21  ;;  %v4268_v10 = vadd.f32 %v3531_v36, %v4199_v11 }
 0x22c   :  { %v890_v0 = vadd.f32 %v889_v39, %v888_v33  ;;  %v838_v44 = vadd.f32 %v837_v41, %v836_v35  ;;  %v797_v47 = vpop.f32.mrf.mxu1  ;;  %v895_v39 = vsel %vm458_vm3, %v873_v42, 0.0 }
 0x22d   :  { %v891_v56 = vsel %vm458_vm3, %v871_v43, 0.0  ;;  %v4262_v58 = vadd.f32 %v4199_v11, %v797_v47  ;;  %v876_v47 = vmul.f32 %v4268_v10, %v4268_v10 }
 0x22e   :  { %v840_v60 = vadd.f32 %v839_v49, %v838_v44  ;;  %v892_v2 = vadd.f32 %v891_v56, %v890_v0  ;;  %v3532_v13 = vpop.f32.mrf.mxu1 }
 0x22f   :  { %v874_v16 = vmul.f32 %v4262_v58, %v4262_v58  ;;  %v843_v41 = vsel %vm458_vm3, %v4262_v58, 0.0  ;;  %v4276_v43 = vadd.f32 %v3532_v13, %v4199_v11 }
 0x230   :  { %v894_v24 = vadd.f32 %v893_v7, %v892_v2  ;;  %v842_v35 = vadd.f32 %v841_v9, %v840_v60  ;;  %v800_v33 = vpop.f32.mrf.mxu1  ;;  %v847_v7 = vsel %vm458_vm3, %v4268_v10, 0.0 }
 0x231   :  { %v4279_v45 = vadd.f32 %v4199_v11, %v800_v33  ;;  %v897_v49 = vsel %vm458_vm3, %v874_v16, 0.0  ;;  %v877_v9 = vmul.f32 %v4276_v43, %v4276_v43 }
 0x232   :  { %v844_v0 = vadd.f32 %v843_v41, %v842_v35  ;;  %v896_v36 = vadd.f32 %v895_v39, %v894_v24  ;;  %v3535_v44 = vpop.f32.mrf.mxu1  ;;  %v901_v41 = vsel %vm458_vm3, %v876_v47, 0.0 }
 0x233   :  { %v845_v42 = vsel %vm458_vm3, %v4279_v45, 0.0  ;;  %v875_v56 = vmul.f32 %v4279_v45, %v4279_v45 }
 0x234   :  { %v898_v60 = vadd.f32 %v897_v49, %v896_v36  ;;  %v846_v2 = vadd.f32 %v845_v42, %v844_v0  ;;  %v813_v13 = vpop.f32.mrf.mxu1  ;;  %v849_v0 = vsel %vm458_vm3, %v4276_v43, 0.0  ;;  %v4300_v36 = vadd.f32 %v3535_v44, %v4199_v11 }
 0x235   :  { %v899_v24 = vsel %vm458_vm3, %v875_v56, 0.0  ;;  %v4294_v35 = vadd.f32 %v4199_v11, %v813_v13  ;;  %v903_v13 = vsel %vm458_vm3, %v877_v9, 0.0 }
 0x236   :  { %v848_v16 = vadd.f32 %v847_v7, %v846_v2  ;;  %v900_v33 = vadd.f32 %v899_v24, %v898_v60  ;;  %v3536_v39 = vpop.f32.mrf.mxu1  ;;  %v880_v24 = vmul.f32 %v4300_v36, %v4300_v36 }
 0x237   :  { %v878_v49 = vmul.f32 %v4294_v35, %v4294_v35  ;;  %v851_v60 = vsel %vm458_vm3, %v4294_v35, 0.0  ;;  %v4308_v2 = vadd.f32 %v3536_v39, %v4199_v11  ;;  %v855_v39 = vsel %vm458_vm3, %v4300_v36, 0.0 }
 0x238   :  { %v902_v42 = vadd.f32 %v901_v41, %v900_v33  ;;  %v850_v30 = vadd.f32 %v849_v0, %v848_v16  ;;  %v816_v56 = vpop.f32.mrf.mxu1 }
 0x239   :  { %v4311_v47 = vadd.f32 %v4199_v11, %v816_v56  ;;  %v905_v33 = vsel %vm458_vm3, %v878_v49, 0.0  ;;  %v909_v49 = vsel %vm458_vm3, %v880_v24, 0.0 }
 0x23a   :  { %v852_v7 = vadd.f32 %v851_v60, %v850_v30  ;;  %v904_v44 = vadd.f32 %v903_v13, %v902_v42  ;;  %v881_v30 = vmul.f32 %v4308_v2, %v4308_v2  ;;  %v857_v13 = vsel %vm458_vm3, %v4308_v2, 0.0 }
 0x23b   :  { %v853_v16 = vsel %vm458_vm3, %v4311_v47, 0.0  ;;  %v879_v9 = vmul.f32 %v4311_v47, %v4311_v47 }
 0x23c   :  { %v906_v41 = vadd.f32 %v905_v33, %v904_v44  ;;  %v854_v0 = vadd.f32 %v853_v16, %v852_v7  ;;  %v911_v44 = vsel %vm458_vm3, %v881_v30, 0.0 }
 0x23d   :  { %v907_v11 = vsel %vm458_vm3, %v879_v9, 0.0 }
 0x23e   :  { %v856_v42 = vadd.f32 %v855_v39, %v854_v0  ;;  %v908_v56 = vadd.f32 %v907_v11, %v906_v41 }
 0x240   :  { %v858_v60 = vadd.f32 %v857_v13, %v856_v42  ;;  %v910_v48 = vadd.f32 %v909_v49, %v908_v56 }
 0x242   :  { %v859_v7 = vrot.slane %v858_v60, 4  ;;  %v912_v33 = vadd.f32 %v911_v44, %v910_v48 }
 0x244   :  { %v860_v16 = vadd.f32 %v859_v7, %v858_v60  ;;  %v913_v19 = vrot.slane %v912_v33, 4 }
 0x246   :  { %v861_v61 = vrot.slane %v860_v16, 2  ;;  %v914_v31 = vadd.f32 %v913_v19, %v912_v33 }
 0x248   :  { %v862_v62 = vadd.f32 %v861_v61, %v860_v16  ;;  %v915_v38 = vrot.slane %v914_v31, 2 }
 0x24a   :  { %v863_v9 = vrot.slane %v862_v62, 1  ;;  %v916_v0 = vadd.f32 %v915_v38, %v914_v31 }
 0x24c   :  { %v864_v41 = vadd.f32 %v863_v9, %v862_v62  ;;  %v917_v39 = vrot.slane %v916_v0, 1 }
 0x24e   :  { %v865_v24 = vmul.f32 0.0078125, %v864_v41  ;;  %v918_v11 = vadd.f32 %v917_v39, %v916_v0 }
 0x250   :  { %v919_v20 = vmul.f32 0.0078125, %v918_v11  ;;  %v920_v3 = vmul.f32 %v865_v24, %v865_v24  ;;  %v925_v48 = vsub.f32 %v4205_v15, %v865_v24  ;;  %v923_v30 = vsub.f32 %v4202_v18, %v865_v24 }
 0x251   :  { %v927_v31 = vsub.f32 %v4230_v50, %v865_v24  ;;  %v924_v38 = vsub.f32 %v4213_v32, %v865_v24  ;;  %v926_v18 = vsub.f32 %v4210_v27, %v865_v24  ;;  %v931_v50 = vsub.f32 %v4262_v58, %v865_v24 }
 0x252   :  { %v921_v42 = vsub.f32 %v919_v20, %v920_v3  ;;  %v929_v20 = vsub.f32 %v4236_v6, %v865_v24  ;;  %v928_v32 = vsub.f32 %v4247_v21, %v865_v24  ;;  %v933_v6 = vsub.f32 %v4268_v10, %v865_v24 }
 0x253   :  { %v930_v27 = vsub.f32 %v4244_v25, %v865_v24  ;;  %v935_v58 = vsub.f32 %v4294_v35, %v865_v24  ;;  %v932_v21 = vsub.f32 %v4279_v45, %v865_v24  ;;  %v937_v10 = vsub.f32 %v4300_v36, %v865_v24 }
 0x254   :  { %v922_v56 = vmax.f32 %v921_v42, 0.0  ;;  %v934_v25 = vsub.f32 %v4276_v43, %v865_v24  ;;  %v936_v35 = vsub.f32 %v4311_v47, %v865_v24  ;;  %v938_v45 = vsub.f32 %v4308_v2, %v865_v24 }
 0x256   :  { %v939_v49 = vadd.f32 1e-05, %v922_v56  ;;  %v3651_v56 = vld [vmem:[#allocation3 + $0x8] sm:$0xff]  }
 0x257   :  { %3537 = vmatprep.subr.bf16.mxu0 %v3651_v56 }
 0x258   :  { %3663 = vrsqrt.f32 %v939_v49  ;;  %v3652_v49 = vld [vmem:[#allocation3] sm:$0xff]   ;;  %3538 = vmatpush3.bf16.msra.mxu0 %v3651_v56 }
 0x259   :  { %3539 = vmatprep.subr.bf16.mxu0 %v3652_v49 }
 0x25c   :  { %3540 = vmatpush3.bf16.msra.mxu0 %v3652_v49 }
 0x265   :  { %v3664_v13 = vpop.eup %3663 }
 0x266   :  { %v943_v19 = vmul.f32 %v3664_v13, %v925_v48  ;;  %v941_v61 = vmul.f32 %v3664_v13, %v923_v30  ;;  %v945_v62 = vmul.f32 %v3664_v13, %v927_v31  ;;  %v942_v3 = vmul.f32 %v3664_v13, %v924_v38 }
 0x267   :  { %v947_v15 = vmul.f32 %v3664_v13, %v929_v20  ;;  %v944_v60 = vmul.f32 %v3664_v13, %v926_v18  ;;  %v949_v44 = vmul.f32 %v3664_v13, %v931_v50  ;;  %v946_v7 = vmul.f32 %v3664_v13, %v928_v32 }
 0x268   :  { %977 = vrot.lane.b32.xlu0 %v943_v19, %s3720_s26  ;;  %973 = vrot.lane.b32.xlu1 %v941_v61, %s3720_s26  ;;  %v951_v33 = vmul.f32 %v3664_v13, %v933_v6  ;;  %v948_v16 = vmul.f32 %v3664_v13, %v930_v27  ;;  %v953_v9 = vmul.f32 %v3664_v13, %v935_v58 }
 0x269   :  { %v950_v0 = vmul.f32 %v3664_v13, %v932_v21  ;;  %v955_v41 = vmul.f32 %v3664_v13, %v937_v10  ;;  %v952_v39 = vmul.f32 %v3664_v13, %v934_v25  ;;  %v954_v11 = vmul.f32 %v3664_v13, %v936_v35 }
 0x26a   :  { %v956_v42 = vmul.f32 %v3664_v13, %v938_v45 }
 0x26c   :  { %981 = vrot.lane.b32.xlu0 %v945_v62, %s3720_s26  ;;  %975 = vrot.lane.b32.xlu1 %v942_v3, %s3720_s26 }
 0x270   :  { %985 = vrot.lane.b32.xlu0 %v947_v15, %s3720_s26  ;;  %979 = vrot.lane.b32.xlu1 %v944_v60, %s3720_s26 }
 0x274   :  { %989 = vrot.lane.b32.xlu0 %v949_v44, %s3720_s26  ;;  %983 = vrot.lane.b32.xlu1 %v946_v7, %s3720_s26 }
 0x278   :  { %993 = vrot.lane.b32.xlu0 %v951_v33, %s3720_s26  ;;  %987 = vrot.lane.b32.xlu1 %v948_v16, %s3720_s26 }
 0x27c   :  { %997 = vrot.lane.b32.xlu0 %v953_v9, %s3720_s26  ;;  %991 = vrot.lane.b32.xlu1 %v950_v0, %s3720_s26 }
 0x280   :  { %1001 = vrot.lane.b32.xlu0 %v955_v41, %s3720_s26  ;;  %995 = vrot.lane.b32.xlu1 %v952_v39, %s3720_s26 }
 0x284   :  { %999 = vrot.lane.b32.xlu1 %v954_v11, %s3720_s26 }
 0x288   :  { %1003 = vrot.lane.b32.xlu1 %v956_v42, %s3720_s26 }
 0x2da   :  { %v978_v43 = vpop.permute.xlu0 %977  ;;  %v974_v36 = vpop.permute.xlu1 %973 }
 0x2db   :  { %v1021_v48 = vmul.f32 %v974_v36, %v3937_v59  ;;  %v1023_v19 = vmul.f32 %v978_v43, %v3937_v59 }
 0x2dd   :  { %v1037_v61 = vadd.f32 %v1021_v48, %v4136_v57  ;;  %v1039_v62 = vadd.f32 %v1023_v19, %v4136_v57 }
 0x2de   :  { %v982_v30 = vpop.permute.xlu0 %981  ;;  %v976_v47 = vpop.permute.xlu1 %975 }
 0x2df   :  { %v1022_v2 = vmul.f32 %v976_v47, %v3937_v59  ;;  %v1025_v13 = vmul.f32 %v982_v30, %v3937_v59  ;;  %v1058_v3 = vmax.f32 %v1037_v61, 0.0  ;;  %v1060_v7 = vmax.f32 %v1039_v62, 0.0 }
 0x2e1   :  { %v1038_v24 = vadd.f32 %v1022_v2, %v4136_v57  ;;  %v1041_v50 = vadd.f32 %v1025_v13, %v4136_v57 }
 0x2e2   :  { %v986_v31 = vpop.permute.xlu0 %985  ;;  %v980_v38 = vpop.permute.xlu1 %979 }
 0x2e3   :  { %v1059_v20 = vmax.f32 %v1038_v24, 0.0  ;;  %v1024_v18 = vmul.f32 %v980_v38, %v3937_v59  ;;  %v1027_v6 = vmul.f32 %v986_v31, %v3937_v59  ;;  %v1062_v21 = vmax.f32 %v1041_v50, 0.0 }
 0x2e5   :  { %v1040_v15 = vadd.f32 %v1024_v18, %v4136_v57  ;;  %v1074_v60 = vpack.c.bf16 %v1059_v20, %v1058_v3  ;;  %v1043_v10 = vadd.f32 %v1027_v6, %v4136_v57 }
 0x2e6   :  { %v990_v32 = vpop.permute.xlu0 %989  ;;  %v984_v44 = vpop.permute.xlu1 %983 }
 0x2e7   :  { %v1061_v27 = vmax.f32 %v1040_v15, 0.0  ;;  %v1026_v33 = vmul.f32 %v984_v44, %v3937_v59  ;;  %1096 = vrot.lane.b32.xlu0 %v1074_v60, %s3720_s26  ;;  %v1029_v25 = vmul.f32 %v990_v32, %v3969_v12  ;;  %v1064_v49 = vmax.f32 %v1043_v10, 0.0 }
 0x2e9   :  { %v1042_v16 = vadd.f32 %v1026_v33, %v4136_v57  ;;  %v1075_v58 = vpack.c.bf16 %v1061_v27, %v1060_v7  ;;  %v1045_v43 = vadd.f32 %v1029_v25, %v4150_v28 }
 0x2ea   :  { %v994_v9 = vpop.permute.xlu0 %993  ;;  %v988_v0 = vpop.permute.xlu1 %987 }
 0x2eb   :  { %v1063_v41 = vmax.f32 %v1042_v16, 0.0  ;;  %v1028_v39 = vmul.f32 %v988_v0, %v3937_v59  ;;  %1098 = vrot.lane.b32.xlu1 %v1075_v58, %s3720_s26  ;;  %v1031_v45 = vmul.f32 %v994_v9, %v3969_v12  ;;  %v5706_v0 = vrot.slane %v3930_v53, %v3919_v40 }
 0x2ed   :  { %v1044_v35 = vadd.f32 %v1028_v39, %v4136_v57  ;;  %v1076_v11 = vpack.c.bf16 %v1063_v41, %v1062_v21  ;;  %v1047_v47 = vadd.f32 %v1031_v45, %v4150_v28  ;;  %v1066_v57 = vmax.f32 %v1045_v43, 0.0  ;;  %v4432_v43 = vld [vmem:[%s5692_s9] ss:$0 sm:$0xff] }
 0x2ee   :  { %v998_v42 = vpop.permute.xlu0 %997  ;;  %v992_v56 = vpop.permute.xlu1 %991  ;;  %v4404_v10 = vrot.slane %v5706_v0, %v3910_v34 }
 0x2ef   :  { %v1065_v36 = vmax.f32 %v1044_v35, 0.0  ;;  %v1030_v48 = vmul.f32 %v992_v56, %v3969_v12  ;;  %1100 = vrot.lane.b32.xlu0 %v1076_v11, %s3720_s26  ;;  %v1033_v61 = vmul.f32 %v998_v42, %v3969_v12  ;;  %v1068_v62 = vmax.f32 %v1047_v47, 0.0  ;;  %v3653_v42 = vld [vmem:[%s5689_s6 + $0x18] sm:$0xff]   ;;  %v3654_v56 = vld [vmem:[%s5689_s6 + $0x10] sm:$0xff]  }
 0x2f0   :  { %3557 = vmatprep.subr.bf16.mxu1 %v3653_v42 }
 0x2f1   :  { %v1046_v30 = vadd.f32 %v1030_v48, %v4150_v28  ;;  %v1077_v59 = vpack.c.bf16 %v1065_v36, %v1064_v49  ;;  %v1049_v20 = vadd.f32 %v1033_v61, %v4150_v28  ;;  %3558 = vmatpush3.bf16.msra.mxu1 %v3653_v42 }
 0x2f2   :  { %v996_v19 = vpop.permute.xlu1 %995  ;;  %v1002_v13 = vpop.permute.xlu0 %1001  ;;  %3559 = vmatprep.subr.bf16.mxu1 %v3654_v56 }
 0x2f3   :  { %v1067_v2 = vmax.f32 %v1046_v30, 0.0  ;;  %v1032_v24 = vmul.f32 %v996_v19, %v3969_v12  ;;  %1102 = vrot.lane.b32.xlu1 %v1077_v59, %s3720_s26  ;;  %v1035_v18 = vmul.f32 %v1002_v13, %v3969_v12  ;;  %v1070_v7 = vmax.f32 %v1049_v20, 0.0 }
 0x2f5   :  { %v1048_v31 = vadd.f32 %v1032_v24, %v4150_v28  ;;  %v1078_v38 = vpack.c.bf16 %v1067_v2, %v1066_v57  ;;  %v1051_v6 = vadd.f32 %v1035_v18, %v4150_v28  ;;  %3560 = vmatpush3.bf16.msra.mxu1 %v3654_v56 }
 0x2f6   :  { %v1000_v3 = vpop.permute.xlu1 %999 }
 0x2f7   :  { %v1069_v15 = vmax.f32 %v1048_v31, 0.0  ;;  %v1034_v60 = vmul.f32 %v1000_v3, %v3969_v12  ;;  %1104 = vrot.lane.b32.xlu0 %v1078_v38, %s3720_s26  ;;  %v1072_v21 = vmax.f32 %v1051_v6, 0.0 }
 0x2f9   :  { %v1050_v50 = vadd.f32 %v1034_v60, %v4150_v28  ;;  %v1079_v32 = vpack.c.bf16 %v1069_v15, %v1068_v62 }
 0x2fa   :  { %v1004_v44 = vpop.permute.xlu1 %1003 }
 0x2fb   :  { %v1071_v27 = vmax.f32 %v1050_v50, 0.0  ;;  %v1036_v33 = vmul.f32 %v1004_v44, %v3969_v12  ;;  %1106 = vrot.lane.b32.xlu1 %v1079_v32, %s3720_s26  ;;  %v4411_v12 = vrot.slane %v3954_v4, %v3910_v34 }
 0x2fd   :  { %v1052_v16 = vadd.f32 %v1036_v33, %v4150_v28  ;;  %v1080_v58 = vpack.c.bf16 %v1071_v27, %v1070_v7 }
 0x2ff   :  { %v1073_v9 = vmax.f32 %v1052_v16, 0.0  ;;  %1108 = vrot.lane.b32.xlu0 %v1080_v58, %s3720_s26 }
 0x301   :  { %v1081_v25 = vpack.c.bf16 %v1073_v9, %v1072_v21 }
 0x303   :  { %1439 = vrot.lane.b32.xlu0 %v4404_v10, %s3724_s3  ;;  %1110 = vrot.lane.b32.xlu1 %v1081_v25, %s3720_s26 }
 0x307   :  { %1441 = vrot.lane.b32.xlu1 %v4411_v12, %s3724_s3 }
 0x359   :  { %v1097_v28 = vpop.permute.xlu0 %1096 }
 0x35a   :  { %3541 = vmatprep.mubr.msk.bf16.mxu0 %vm458_vm3, %v1097_v28 }
 0x35d   :  { %v1099_v41 = vpop.permute.xlu1 %1098 }
 0x35e   :  { %3542 = vmatmul.mubr.msk.bf16.vlgmr.msra.gmra.mxu0 %vm458_vm3, %v1099_v41 }
 0x361   :  { %v1101_v53 = vpop.permute.xlu0 %1100 }
 0x362   :  { %3545 = vmatprep.mubr.msk.bf16.mxu0 %vm458_vm3, %v1101_v53 }
 0x365   :  { %v1103_v39 = vpop.permute.xlu1 %1102 }
 0x366   :  { %3546 = vmatmul.mubr.msk.bf16.gmra.mxu0 %vm458_vm3, %v1103_v39 }
 0x369   :  { %v1105_v35 = vpop.permute.xlu0 %1104 }
 0x36a   :  { %3549 = vmatprep.mubr.msk.bf16.mxu0 %vm458_vm3, %v1105_v35 }
 0x36d   :  { %v1107_v4 = vpop.permute.xlu1 %1106 }
 0x36e   :  { %3550 = vmatmul.mubr.msk.bf16.gmra.mxu0 %vm458_vm3, %v1107_v4 }
 0x371   :  { %v1109_v11 = vpop.permute.xlu0 %1108 }
 0x372   :  { %3553 = vmatprep.mubr.msk.bf16.mxu0 %vm458_vm3, %v1109_v11 }
 0x375   :  { %v1111_v45 = vpop.permute.xlu1 %1110 }
 0x376   :  { %3554 = vmatmul.mubr.msk.bf16.gmra.mxu0 %vm458_vm3, %v1111_v45 }
 0x41e   :  { %v3543_v49 = vpop.f32.mrf.mxu0 }
 0x41f   :  { %v1191_v30 = vadd.f32 %v3543_v49, %v4432_v43 }
 0x420   :  { %v1182_v36 = vpop.f32.mrf.mxu0 }
 0x421   :  { %v1183_v48 = vadd.f32 %v4432_v43, %v1182_v36  ;;  %v4441_v61 = vadd.f32 %v1191_v30, %v3975_v17 }
 0x422   :  { %v3544_v59 = vpop.f32.mrf.mxu0 }
 0x423   :  { %v4437_v47 = vadd.f32 %v1183_v48, %v3948_v1  ;;  %v1194_v19 = vadd.f32 %v3544_v59, %v4432_v43  ;;  %v1301_v17 = vmul.f32 %v4441_v61, %v4441_v61 }
 0x424   :  { %v1185_v57 = vpop.f32.mrf.mxu0 }
 0x425   :  { %v1186_v2 = vadd.f32 %v4432_v43, %v1185_v57  ;;  %v1299_v13 = vmul.f32 %v4437_v47, %v4437_v47  ;;  %v4447_v31 = vadd.f32 %v1194_v19, %v3957_v5  ;;  %v1261_v20 = vsel %vm458_vm3, %v4437_v47, 0.0 }
 0x426   :  { %v3547_v24 = vpop.f32.mrf.mxu0  ;;  %v1318_v21 = vsel %vm458_vm3, %v1301_v17, 0.0 }
 0x427   :  { %v4450_v38 = vadd.f32 %v1186_v2, %v3933_v54  ;;  %v1207_v62 = vadd.f32 %v3547_v24, %v4432_v43  ;;  %v1264_v54 = vsel %vm458_vm3, %v4441_v61, 0.0  ;;  %v1315_v32 = vsel %vm458_vm3, %v1299_v13, 0.0 }
 0x428   :  { %v1198_v1 = vpop.f32.mrf.mxu0  ;;  %v1302_v44 = vmul.f32 %v4447_v31, %v4447_v31 }
 0x429   :  { %v1199_v3 = vadd.f32 %v4432_v43, %v1198_v1  ;;  %v1262_v18 = vsel %vm458_vm3, %v4450_v38, 0.0  ;;  %v1300_v5 = vmul.f32 %v4450_v38, %v4450_v38  ;;  %v4473_v58 = vadd.f32 %v1207_v62, %v4017_v52 }
 0x42a   :  { %v3548_v15 = vpop.f32.mrf.mxu0  ;;  %v1263_v60 = vadd.f32 %v1262_v18, %v1261_v20  ;;  %v1320_v53 = vsel %vm458_vm3, %v1302_v44, 0.0 }
 0x42b   :  { %v4465_v50 = vadd.f32 %v1199_v3, %v3994_v29  ;;  %v1316_v7 = vsel %vm458_vm3, %v1300_v5, 0.0  ;;  %v1210_v6 = vadd.f32 %v3548_v15, %v4432_v43  ;;  %v1266_v29 = vsel %vm458_vm3, %v4447_v31, 0.0 }
 0x42c   :  { %v1201_v27 = vpop.f32.mrf.mxu0  ;;  %v1265_v33 = vadd.f32 %v1264_v54, %v1263_v60  ;;  %v1317_v16 = vadd.f32 %v1316_v7, %v1315_v32  ;;  %v1305_v11 = vmul.f32 %v4473_v58, %v4473_v58  ;;  %v1272_v30 = vsel %vm458_vm3, %v4473_v58, 0.0 }
 0x42d   :  { %v1303_v9 = vmul.f32 %v4465_v50, %v4465_v50  ;;  %v1202_v0 = vadd.f32 %v4432_v43, %v1201_v27  ;;  %v1268_v39 = vsel %vm458_vm3, %v4465_v50, 0.0  ;;  %v4485_v52 = vadd.f32 %v1210_v6, %v4010_v46 }
 0x42e   :  { %v3551_v25 = vpop.f32.mrf.mxu0  ;;  %v1319_v28 = vadd.f32 %v1318_v21, %v1317_v16  ;;  %v1267_v41 = vadd.f32 %v1266_v29, %v1265_v33  ;;  %v1326_v20 = vsel %vm458_vm3, %v1305_v11, 0.0 }
 0x42f   :  { %v4488_v35 = vadd.f32 %v1202_v0, %v3983_v22  ;;  %v1322_v49 = vsel %vm458_vm3, %v1303_v9, 0.0  ;;  %v1223_v48 = vadd.f32 %v3551_v25, %v4432_v43  ;;  %v1306_v57 = vmul.f32 %v4485_v52, %v4485_v52 }
 0x430   :  { %v1214_v4 = vpop.f32.mrf.mxu0  ;;  %v1269_v45 = vadd.f32 %v1268_v39, %v1267_v41  ;;  %v1321_v42 = vadd.f32 %v1320_v53, %v1319_v28  ;;  %v1274_v18 = vsel %vm458_vm3, %v4485_v52, 0.0 }
 0x431   :  { %v1215_v56 = vadd.f32 %v4432_v43, %v1214_v4  ;;  %v1270_v36 = vsel %vm458_vm3, %v4488_v35, 0.0  ;;  %v1304_v46 = vmul.f32 %v4488_v35, %v4488_v35  ;;  %v4513_v5 = vadd.f32 %v1223_v48, %v4050_v26 }
 0x432   :  { %v3552_v22 = vpop.f32.mrf.mxu0  ;;  %v1323_v59 = vadd.f32 %v1322_v49, %v1321_v42  ;;  %v1271_v19 = vadd.f32 %v1270_v36, %v1269_v45  ;;  %v1328_v44 = vsel %vm458_vm3, %v1306_v57, 0.0 }
 0x433   :  { %v1324_v2 = vsel %vm458_vm3, %v1304_v46, 0.0  ;;  %v4505_v24 = vadd.f32 %v1215_v56, %v4020_v55  ;;  %v1226_v13 = vadd.f32 %v3552_v22, %v4432_v43  ;;  %v1280_v53 = vsel %vm458_vm3, %v4513_v5, 0.0 }
 0x434   :  { %v1217_v1 = vpop.f32.mrf.mxu0  ;;  %v1273_v62 = vadd.f32 %v1272_v30, %v1271_v19  ;;  %v1325_v3 = vadd.f32 %v1324_v2, %v1323_v59 }
 0x435   :  { %v1218_v17 = vadd.f32 %v4432_v43, %v1217_v1  ;;  %v1307_v15 = vmul.f32 %v4505_v24, %v4505_v24  ;;  %v1276_v7 = vsel %vm458_vm3, %v4505_v24, 0.0  ;;  %v4524_v6 = vadd.f32 %v1226_v13, %v4054_v37 }
 0x436   :  { %v3555_v55 = vpop.f32.mrf.mxu0  ;;  %v1327_v54 = vadd.f32 %v1326_v20, %v1325_v3  ;;  %v1275_v60 = vadd.f32 %v1274_v18, %v1273_v62 }
 0x437   :  { %v4518_v32 = vadd.f32 %v1218_v17, %v4036_v8  ;;  %v1309_v8 = vmul.f32 %v4513_v5, %v4513_v5  ;;  %v1330_v29 = vsel %vm458_vm3, %v1307_v15, 0.0  ;;  %v1239_v9 = vadd.f32 %v3555_v55, %v4432_v43 }
 0x438   :  { %v1230_v27 = vpop.f32.mrf.mxu0  ;;  %v1277_v26 = vadd.f32 %v1276_v7, %v1275_v60  ;;  %v1329_v33 = vadd.f32 %v1328_v44, %v1327_v54  ;;  %v1310_v39 = vmul.f32 %v4524_v6, %v4524_v6  ;;  %v1282_v46 = vsel %vm458_vm3, %v4524_v6, 0.0 }
 0x439   :  { %v1278_v16 = vsel %vm458_vm3, %v4518_v32, 0.0  ;;  %v1308_v21 = vmul.f32 %v4518_v32, %v4518_v32  ;;  %v1231_v0 = vadd.f32 %v4432_v43, %v1230_v27  ;;  %v1334_v36 = vsel %vm458_vm3, %v1309_v8, 0.0 }
 0x43a   :  { %v3556_v37 = vpop.f32.mrf.mxu0  ;;  %v1331_v25 = vadd.f32 %v1330_v29, %v1329_v33  ;;  %v1279_v28 = vadd.f32 %v1278_v16, %v1277_v26  ;;  %v4549_v48 = vadd.f32 %v1239_v9, %v4082_v14  ;;  %v1336_v59 = vsel %vm458_vm3, %v1310_v39, 0.0 }
 0x43b   :  { %v1332_v41 = vsel %vm458_vm3, %v1308_v21, 0.0  ;;  %v4541_v4 = vadd.f32 %v1231_v0, %v4066_v51  ;;  %v1242_v11 = vadd.f32 %v3556_v37, %v4432_v43 }
 0x43c   :  { %v1233_v45 = vpop.f32.mrf.mxu0  ;;  %v1281_v42 = vadd.f32 %v1280_v53, %v1279_v28  ;;  %v1333_v56 = vadd.f32 %v1332_v41, %v1331_v25  ;;  %v1313_v14 = vmul.f32 %v4549_v48, %v4549_v48 }
 0x43d   :  { %v1234_v49 = vadd.f32 %v4432_v43, %v1233_v45  ;;  %v1311_v22 = vmul.f32 %v4541_v4, %v4541_v4  ;;  %v1284_v19 = vsel %vm458_vm3, %v4541_v4, 0.0  ;;  %v4557_v43 = vadd.f32 %v1242_v11, %v4086_v23 }
 0x43e   :  { %v1335_v51 = vadd.f32 %v1334_v36, %v1333_v56  ;;  %v1283_v30 = vadd.f32 %v1282_v46, %v1281_v42  ;;  %v1288_v23 = vsel %vm458_vm3, %v4549_v48, 0.0  ;;  %v1342_v54 = vsel %vm458_vm3, %v1313_v14, 0.0 }
 0x43f   :  { %v4560_v57 = vadd.f32 %v1234_v49, %v4070_v63  ;;  %v1338_v1 = vsel %vm458_vm3, %v1311_v22, 0.0  ;;  %v1314_v63 = vmul.f32 %v4557_v43, %v4557_v43  ;;  %v1290_v60 = vsel %vm458_vm3, %v4557_v43, 0.0 }
 0x440   :  { %v1285_v2 = vadd.f32 %v1284_v19, %v1283_v30  ;;  %v1337_v13 = vadd.f32 %v1336_v59, %v1335_v51 }
 0x441   :  { %v1286_v62 = vsel %vm458_vm3, %v4560_v57, 0.0  ;;  %v1312_v3 = vmul.f32 %v4560_v57, %v4560_v57  ;;  %v1344_v27 = vsel %vm458_vm3, %v1314_v63, 0.0 }
 0x442   :  { %v1339_v17 = vadd.f32 %v1338_v1, %v1337_v13  ;;  %v1287_v20 = vadd.f32 %v1286_v62, %v1285_v2 }
 0x443   :  { %v1340_v18 = vsel %vm458_vm3, %v1312_v3, 0.0 }
 0x444   :  { %v1289_v15 = vadd.f32 %v1288_v23, %v1287_v20  ;;  %v1341_v55 = vadd.f32 %v1340_v18, %v1339_v17 }
 0x446   :  { %v1291_v44 = vadd.f32 %v1290_v60, %v1289_v15  ;;  %v1343_v7 = vadd.f32 %v1342_v54, %v1341_v55 }
 0x448   :  { %v1292_v26 = vrot.slane %v1291_v44, 4  ;;  %v1345_v33 = vadd.f32 %v1344_v27, %v1343_v7  ;;  %v4619_v27 = vpop.permute.xlu0 %1439 }
 0x44a   :  { %v1293_v16 = vadd.f32 %v1292_v26, %v1291_v44  ;;  %v1346_v21 = vrot.slane %v1345_v33, 4 }
 0x44c   :  { %v1294_v8 = vrot.slane %v1293_v16, 2  ;;  %v1347_v29 = vadd.f32 %v1346_v21, %v1345_v33 }
 0x44e   :  { %v1295_v9 = vadd.f32 %v1294_v8, %v1293_v16  ;;  %v1348_v0 = vrot.slane %v1347_v29, 2 }
 0x450   :  { %v1296_v37 = vrot.slane %v1295_v9, 1  ;;  %v1349_v25 = vadd.f32 %v1348_v0, %v1347_v29 }
 0x452   :  { %v1297_v28 = vadd.f32 %v1296_v37, %v1295_v9  ;;  %v1350_v41 = vrot.slane %v1349_v25, 1 }
 0x454   :  { %v4578_v53 = vmul.f32 0.0078125, %v1297_v28  ;;  %v1351_v39 = vadd.f32 %v1350_v41, %v1349_v25 }
 0x456   :  { %v1352_v11 = vmul.f32 0.0078125, %v1351_v39  ;;  %v1353_v45 = vmul.f32 %v4578_v53, %v4578_v53  ;;  %v1369_v36 = vsub.f32 %v4560_v57, %v4578_v53  ;;  %v1356_v46 = vsub.f32 %v4437_v47, %v4578_v53 }
 0x457   :  { %v1357_v22 = vsub.f32 %v4450_v38, %v4578_v53  ;;  %v1358_v51 = vsub.f32 %v4441_v61, %v4578_v53  ;;  %v1359_v30 = vsub.f32 %v4447_v31, %v4578_v53  ;;  %v1360_v59 = vsub.f32 %v4465_v50, %v4578_v53 }
 0x458   :  { %v1354_v42 = vsub.f32 %v1352_v11, %v1353_v45  ;;  %v1361_v19 = vsub.f32 %v4488_v35, %v4578_v53  ;;  %v1362_v13 = vsub.f32 %v4473_v58, %v4578_v53  ;;  %v1363_v14 = vsub.f32 %v4485_v52, %v4578_v53 }
 0x459   :  { %v1364_v1 = vsub.f32 %v4505_v24, %v4578_v53  ;;  %v1365_v62 = vsub.f32 %v4518_v32, %v4578_v53  ;;  %v1366_v23 = vsub.f32 %v4513_v5, %v4578_v53  ;;  %v1367_v41 = vsub.f32 %v4524_v6, %v4578_v53 }
 0x45a   :  { %v1355_v56 = vmax.f32 %v1354_v42, 0.0  ;;  %v1368_v42 = vsub.f32 %v4541_v4, %v4578_v53 }
 0x45c   :  { %v1372_v49 = vadd.f32 1e-05, %v1355_v56 }
 0x45e   :  { %3665 = vrsqrt.f32 %v1372_v49 }
 0x46b   :  { %v4596_v2 = vpop.eup %3665 }
 0x46c   :  { %v1374_v3 = vmul.f32 %v4596_v2, %v1356_v46  ;;  %v1375_v17 = vmul.f32 %v4596_v2, %v1357_v22  ;;  %v1376_v20 = vmul.f32 %v4596_v2, %v1358_v51  ;;  %v1377_v63 = vmul.f32 %v4596_v2, %v1359_v30 }
 0x46d   :  { %v1378_v18 = vmul.f32 %v4596_v2, %v1360_v59  ;;  %v1379_v15 = vmul.f32 %v4596_v2, %v1361_v19  ;;  %v1380_v55 = vmul.f32 %v4596_v2, %v1362_v13  ;;  %v1381_v7 = vmul.f32 %v4596_v2, %v1363_v14 }
 0x46e   :  { %v1423_v54 = vmul.f32 %v4404_v10, %v1374_v3  ;;  %v1424_v60 = vmul.f32 %v4404_v10, %v1375_v17  ;;  %v1425_v44 = vmul.f32 %v4404_v10, %v1376_v20  ;;  %v1426_v26 = vmul.f32 %v4404_v10, %v1377_v63 }
 0x46f   :  { %v1427_v33 = vmul.f32 %v4404_v10, %v1378_v18  ;;  %v1428_v16 = vmul.f32 %v4404_v10, %v1379_v15  ;;  %v1429_v21 = vmul.f32 %v4404_v10, %v1380_v55  ;;  %v1430_v0 = vmul.f32 %v4404_v10, %v1381_v7  ;;  %v4647_v55 = vpop.permute.xlu1 %1441 }
 0x470   :  { %v1445_v8 = vadd.f32 %v4619_v27, %v1423_v54  ;;  %v1446_v29 = vadd.f32 %v4619_v27, %v1424_v60  ;;  %v1447_v9 = vadd.f32 %v4619_v27, %v1425_v44  ;;  %v1448_v37 = vadd.f32 %v4619_v27, %v1426_v26 }
 0x471   :  { %v1449_v25 = vadd.f32 %v4619_v27, %v1427_v33  ;;  %v1450_v28 = vadd.f32 %v4619_v27, %v1428_v16  ;;  %v1451_v22 = vadd.f32 %v4619_v27, %v1429_v21  ;;  %v1452_v30 = vadd.f32 %v4619_v27, %v1430_v0 }
 0x472   :  { %v1468_v39 = vmax.f32 %v1445_v8, 0.0  ;;  %v1469_v11 = vmax.f32 %v1446_v29, 0.0  ;;  %v1470_v45 = vmax.f32 %v1447_v9, 0.0  ;;  %v1471_v56 = vmax.f32 %v1448_v37, 0.0 }
 0x473   :  { %v1472_v49 = vmax.f32 %v1449_v25, 0.0  ;;  %v1473_v46 = vmax.f32 %v1450_v28, 0.0  ;;  %v1382_v59 = vmul.f32 %v4596_v2, %v1364_v1  ;;  %v1383_v19 = vmul.f32 %v4596_v2, %v1365_v62 }
 0x474   :  { %v1484_v51 = vpack.c.bf16 %v1469_v11, %v1468_v39  ;;  %v1387_v13 = vmul.f32 %v4596_v2, %v1369_v36  ;;  %v1485_v14 = vpack.c.bf16 %v1471_v56, %v1470_v45  ;;  %v1384_v3 = vmul.f32 %v4596_v2, %v1366_v23 }
 0x475   :  { %v1385_v17 = vmul.f32 %v4596_v2, %v1367_v41  ;;  %v1486_v20 = vpack.c.bf16 %v1473_v46, %v1472_v49  ;;  %v1431_v63 = vmul.f32 %v4411_v12, %v1382_v59  ;;  %v1432_v18 = vmul.f32 %v4411_v12, %v1383_v19 }
 0x476   :  { %3561 = vmatprep.mubr.msk.bf16.mxu1 %vm458_vm3, %v1484_v51  ;;  %v1386_v15 = vmul.f32 %v4596_v2, %v1368_v42  ;;  %v1474_v36 = vmax.f32 %v1451_v22, 0.0  ;;  %v1475_v1 = vmax.f32 %v1452_v30, 0.0  ;;  %v1433_v54 = vmul.f32 %v4411_v12, %v1384_v3 }
 0x477   :  { %3562 = vmatmul.mubr.msk.bf16.vlgmr.msra.gmra.mxu1 %vm458_vm3, %v1485_v14  ;;  %v1453_v62 = vadd.f32 %v4647_v55, %v1431_v63  ;;  %v1454_v23 = vadd.f32 %v4647_v55, %v1432_v18  ;;  %v1434_v60 = vmul.f32 %v4411_v12, %v1385_v17  ;;  %v1436_v33 = vmul.f32 %v4411_v12, %v1387_v13  ;;  %v4679_v13 = vld [vmem:[%s5690_s7 + $0x1] ss:$0 sm:$0xff] }
 0x478   :  { %3565 = vmatprep.mubr.msk.bf16.mxu1 %vm458_vm3, %v1486_v20  ;;  %v1435_v26 = vmul.f32 %v4411_v12, %v1386_v15  ;;  %v1370_v16 = vsub.f32 %v4549_v48, %v4578_v53  ;;  %v1371_v21 = vsub.f32 %v4557_v43, %v4578_v53  ;;  %v1487_v8 = vpack.c.bf16 %v1475_v1, %v1474_v36 }
 0x479   :  { %v1476_v44 = vmax.f32 %v1453_v62, 0.0  ;;  %v1477_v7 = vmax.f32 %v1454_v23, 0.0  ;;  %v1455_v29 = vadd.f32 %v4647_v55, %v1433_v54  ;;  %v1456_v9 = vadd.f32 %v4647_v55, %v1434_v60 }
 0x47a   :  { %v1388_v0 = vmul.f32 %v4596_v2, %v1370_v16  ;;  %v1389_v37 = vmul.f32 %v4596_v2, %v1371_v21  ;;  %v1457_v28 = vadd.f32 %v4647_v55, %v1435_v26  ;;  %v1458_v41 = vadd.f32 %v4647_v55, %v1436_v33 }
 0x47b   :  { %v1488_v25 = vpack.c.bf16 %v1477_v7, %v1476_v44  ;;  %v1478_v39 = vmax.f32 %v1455_v29, 0.0  ;;  %v1479_v53 = vmax.f32 %v1456_v9, 0.0 }
 0x47c   :  { %v1437_v11 = vmul.f32 %v4411_v12, %v1388_v0  ;;  %v1438_v45 = vmul.f32 %v4411_v12, %v1389_v37  ;;  %v1480_v42 = vmax.f32 %v1457_v28, 0.0  ;;  %v1481_v56 = vmax.f32 %v1458_v41, 0.0 }
 0x47d   :  { %v1489_v49 = vpack.c.bf16 %v1479_v53, %v1478_v39 }
 0x47e   :  { %v1459_v2 = vadd.f32 %v4647_v55, %v1437_v11  ;;  %v1460_v46 = vadd.f32 %v4647_v55, %v1438_v45  ;;  %v1490_v22 = vpack.c.bf16 %v1481_v56, %v1480_v42 }
 0x47f   :  { %3566 = vmatmul.mubr.msk.bf16.gmra.mxu1 %vm458_vm3, %v1487_v8 }
 0x480   :  { %3569 = vmatprep.mubr.msk.bf16.mxu1 %vm458_vm3, %v1488_v25  ;;  %v1482_v51 = vmax.f32 %v1459_v2, 0.0  ;;  %v1483_v30 = vmax.f32 %v1460_v46, 0.0 }
 0x482   :  { %v1491_v59 = vpack.c.bf16 %v1483_v30, %v1482_v51 }
 0x487   :  { %3570 = vmatmul.mubr.msk.bf16.gmra.mxu1 %vm458_vm3, %v1489_v49 }
 0x488   :  { %3573 = vmatprep.mubr.msk.bf16.mxu1 %vm458_vm3, %v1490_v22 }
 0x48f   :  { %3574 = vmatmul.mubr.msk.bf16.gmra.mxu1 %vm458_vm3, %v1491_v59 }
 0x537   :  { %v3563_v19 = vpop.f32.mrf.mxu1 }
 0x538   :  { %v4685_v20 = vadd.f32 %v3563_v19, %v4679_v13 }
 0x539   :  { %v1568_v14 = vpop.f32.mrf.mxu1 }
 0x53a   :  { %v4682_v3 = vadd.f32 %v4679_v13, %v1568_v14  ;;  %v1671_v62 = vmul.f32 %v4685_v20, %v4685_v20  ;;  %v1634_v44 = vsel %vm458_vm3, %v4685_v20, 0.0 }
 0x53b   :  { %v3564_v17 = vpop.f32.mrf.mxu1 }
 0x53c   :  { %v1669_v18 = vmul.f32 %v4682_v3, %v4682_v3  ;;  %v4690_v15 = vadd.f32 %v3564_v17, %v4679_v13  ;;  %v1631_v23 = vsel %vm458_vm3, %v4682_v3, 0.0  ;;  %v1688_v37 = vsel %vm458_vm3, %v1671_v62, 0.0 }
 0x53d   :  { %v1571_v63 = vpop.f32.mrf.mxu1 }
 0x53e   :  { %v4693_v36 = vadd.f32 %v4679_v13, %v1571_v63  ;;  %v1685_v33 = vsel %vm458_vm3, %v1669_v18, 0.0  ;;  %v1672_v16 = vmul.f32 %v4690_v15, %v4690_v15  ;;  %v1636_v25 = vsel %vm458_vm3, %v4690_v15, 0.0 }
 0x53f   :  { %v3567_v1 = vpop.f32.mrf.mxu1 }
 0x540   :  { %v1632_v54 = vsel %vm458_vm3, %v4693_v36, 0.0  ;;  %v1670_v60 = vmul.f32 %v4693_v36, %v4693_v36  ;;  %v4716_v28 = vadd.f32 %v3567_v1, %v4679_v13  ;;  %v1690_v45 = vsel %vm458_vm3, %v1672_v16, 0.0 }
 0x541   :  { %v1633_v7 = vadd.f32 %v1632_v54, %v1631_v23  ;;  %v1584_v26 = vpop.f32.mrf.mxu1 }
 0x542   :  { %v1686_v21 = vsel %vm458_vm3, %v1670_v60, 0.0  ;;  %v4710_v8 = vadd.f32 %v4679_v13, %v1584_v26  ;;  %v1675_v51 = vmul.f32 %v4716_v28, %v4716_v28  ;;  %v1642_v18 = vsel %vm458_vm3, %v4716_v28, 0.0 }
 0x543   :  { %v1635_v29 = vadd.f32 %v1634_v44, %v1633_v7  ;;  %v1687_v9 = vadd.f32 %v1686_v21, %v1685_v33  ;;  %v3568_v0 = vpop.f32.mrf.mxu1 }
 0x544   :  { %v1673_v41 = vmul.f32 %v4710_v8, %v4710_v8  ;;  %v1638_v42 = vsel %vm458_vm3, %v4710_v8, 0.0  ;;  %v4724_v56 = vadd.f32 %v3568_v0, %v4679_v13  ;;  %v1696_v7 = vsel %vm458_vm3, %v1675_v51, 0.0 }
 0x545   :  { %v1689_v39 = vadd.f32 %v1688_v37, %v1687_v9  ;;  %v1637_v53 = vadd.f32 %v1636_v25, %v1635_v29  ;;  %v1587_v11 = vpop.f32.mrf.mxu1 }
 0x546   :  { %v4727_v49 = vadd.f32 %v4679_v13, %v1587_v11  ;;  %v1692_v30 = vsel %vm458_vm3, %v1673_v41, 0.0  ;;  %v1676_v1 = vmul.f32 %v4724_v56, %v4724_v56  ;;  %v1644_v26 = vsel %vm458_vm3, %v4724_v56, 0.0 }
 0x547   :  { %v1639_v2 = vadd.f32 %v1638_v42, %v1637_v53  ;;  %v1691_v46 = vadd.f32 %v1690_v45, %v1689_v39  ;;  %v3571_v22 = vpop.f32.mrf.mxu1 }
 0x548   :  { %v1640_v59 = vsel %vm458_vm3, %v4727_v49, 0.0  ;;  %v1674_v19 = vmul.f32 %v4727_v49, %v4727_v49  ;;  %v4748_v33 = vadd.f32 %v3571_v22, %v4679_v13  ;;  %v1698_v0 = vsel %vm458_vm3, %v1676_v1, 0.0 }
 0x549   :  { %v1693_v14 = vadd.f32 %v1692_v30, %v1691_v46  ;;  %v1641_v17 = vadd.f32 %v1640_v59, %v1639_v2  ;;  %v1600_v63 = vpop.f32.mrf.mxu1 }
 0x54a   :  { %v1694_v62 = vsel %vm458_vm3, %v1674_v19, 0.0  ;;  %v4742_v23 = vadd.f32 %v4679_v13, %v1600_v63  ;;  %v1679_v45 = vmul.f32 %v4748_v33, %v4748_v33  ;;  %v1650_v59 = vsel %vm458_vm3, %v4748_v33, 0.0 }
 0x54b   :  { %v1643_v54 = vadd.f32 %v1642_v18, %v1641_v17  ;;  %v1695_v60 = vadd.f32 %v1694_v62, %v1693_v14  ;;  %v3572_v44 = vpop.f32.mrf.mxu1 }
 0x54c   :  { %v1677_v16 = vmul.f32 %v4742_v23, %v4742_v23  ;;  %v1646_v37 = vsel %vm458_vm3, %v4742_v23, 0.0  ;;  %v4756_v25 = vadd.f32 %v3572_v44, %v4679_v13  ;;  %v1704_v62 = vsel %vm458_vm3, %v1679_v45, 0.0 }
 0x54d   :  { %v1697_v21 = vadd.f32 %v1696_v7, %v1695_v60  ;;  %v1645_v29 = vadd.f32 %v1644_v26, %v1643_v54  ;;  %v1603_v9 = vpop.f32.mrf.mxu1 }
 0x54e   :  { %v4759_v41 = vadd.f32 %v4679_v13, %v1603_v9  ;;  %v1700_v42 = vsel %vm458_vm3, %v1677_v16, 0.0  ;;  %v1680_v19 = vmul.f32 %v4756_v25, %v4756_v25  ;;  %v1652_v54 = vsel %vm458_vm3, %v4756_v25, 0.0 }
 0x54f   :  { %v1647_v39 = vadd.f32 %v1646_v37, %v1645_v29  ;;  %v1699_v53 = vadd.f32 %v1698_v0, %v1697_v21  ;;  %v3575_v11 = vpop.f32.mrf.mxu1 }
 0x550   :  { %v1648_v2 = vsel %vm458_vm3, %v4759_v41, 0.0  ;;  %v1678_v46 = vmul.f32 %v4759_v41, %v4759_v41  ;;  %v4780_v60 = vadd.f32 %v3575_v11, %v4679_v13  ;;  %v1706_v21 = vsel %vm458_vm3, %v1680_v19, 0.0 }
 0x551   :  { %v1701_v22 = vadd.f32 %v1700_v42, %v1699_v53  ;;  %v1649_v51 = vadd.f32 %v1648_v2, %v1647_v39  ;;  %v1616_v30 = vpop.f32.mrf.mxu1 }
 0x552   :  { %v1702_v14 = vsel %vm458_vm3, %v1678_v46, 0.0  ;;  %v4774_v17 = vadd.f32 %v4679_v13, %v1616_v30  ;;  %v1683_v53 = vmul.f32 %v4780_v60, %v4780_v60 }
 0x553   :  { %v1651_v63 = vadd.f32 %v1650_v59, %v1649_v51  ;;  %v1703_v18 = vadd.f32 %v1702_v14, %v1701_v22  ;;  %v3576_v1 = vpop.f32.mrf.mxu1  ;;  %v1658_v22 = vsel %vm458_vm3, %v4780_v60, 0.0 }
 0x554   :  { %v1681_v44 = vmul.f32 %v4774_v17, %v4774_v17  ;;  %v1654_v29 = vsel %vm458_vm3, %v4774_v17, 0.0  ;;  %v4788_v9 = vadd.f32 %v3576_v1, %v4679_v13  ;;  %v1712_v19 = vsel %vm458_vm3, %v1683_v53, 0.0 }
 0x555   :  { %v1705_v7 = vadd.f32 %v1704_v62, %v1703_v18  ;;  %v1653_v26 = vadd.f32 %v1652_v54, %v1651_v63  ;;  %v1619_v16 = vpop.f32.mrf.mxu1 }
 0x556   :  { %v4791_v0 = vadd.f32 %v4679_v13, %v1619_v16  ;;  %v1708_v11 = vsel %vm458_vm3, %v1681_v44, 0.0  ;;  %v1684_v13 = vmul.f32 %v4788_v9, %v4788_v9  ;;  %v1660_v14 = vsel %vm458_vm3, %v4788_v9, 0.0 }
 0x557   :  { %v1655_v37 = vadd.f32 %v1654_v29, %v1653_v26  ;;  %v1707_v39 = vadd.f32 %v1706_v21, %v1705_v7 }
 0x558   :  { %v1656_v45 = vsel %vm458_vm3, %v4791_v0, 0.0  ;;  %v1682_v42 = vmul.f32 %v4791_v0, %v4791_v0  ;;  %v1714_v1 = vsel %vm458_vm3, %v1684_v13, 0.0 }
 0x559   :  { %v1709_v2 = vadd.f32 %v1708_v11, %v1707_v39  ;;  %v1657_v46 = vadd.f32 %v1656_v45, %v1655_v37 }
 0x55a   :  { %v1710_v51 = vsel %vm458_vm3, %v1682_v42, 0.0 }
 0x55b   :  { %v1659_v30 = vadd.f32 %v1658_v22, %v1657_v46  ;;  %v1711_v59 = vadd.f32 %v1710_v51, %v1709_v2 }
 0x55d   :  { %v1661_v63 = vadd.f32 %v1660_v14, %v1659_v30  ;;  %v1713_v18 = vadd.f32 %v1712_v19, %v1711_v59 }
 0x55f   :  { %v1662_v62 = vrot.slane %v1661_v63, 4  ;;  %v1715_v54 = vadd.f32 %v1714_v1, %v1713_v18 }
 0x561   :  { %v1663_v44 = vadd.f32 %v1662_v62, %v1661_v63  ;;  %v1716_v7 = vrot.slane %v1715_v54, 4 }
 0x563   :  { %v1664_v26 = vrot.slane %v1663_v44, 2  ;;  %v1717_v16 = vadd.f32 %v1716_v7, %v1715_v54 }
 0x565   :  { %v1665_v21 = vadd.f32 %v1664_v26, %v1663_v44  ;;  %v1718_v29 = vrot.slane %v1717_v16, 2 }
 0x567   :  { %v1666_v37 = vrot.slane %v1665_v21, 1  ;;  %v1719_v39 = vadd.f32 %v1718_v29, %v1717_v16 }
 0x569   :  { %v1667_v11 = vadd.f32 %v1666_v37, %v1665_v21  ;;  %v1720_v45 = vrot.slane %v1719_v39, 1 }
 0x56b   :  { %v1668_v53 = vmul.f32 0.0078125, %v1667_v11  ;;  %v1721_v42 = vadd.f32 %v1720_v45, %v1719_v39 }
 0x56d   :  { %v1722_v2 = vmul.f32 0.0078125, %v1721_v42  ;;  %v1723_v46 = vmul.f32 %v1668_v53, %v1668_v53  ;;  %v1727_v13 = vsub.f32 %v4693_v36, %v1668_v53  ;;  %v1726_v59 = vsub.f32 %v4682_v3, %v1668_v53 }
 0x56e   :  { %v1729_v18 = vsub.f32 %v4690_v15, %v1668_v53  ;;  %v1728_v1 = vsub.f32 %v4685_v20, %v1668_v53  ;;  %v1731_v36 = vsub.f32 %v4727_v49, %v1668_v53  ;;  %v1730_v3 = vsub.f32 %v4710_v8, %v1668_v53 }
 0x56f   :  { %v1724_v22 = vsub.f32 %v1722_v2, %v1723_v46  ;;  %v1733_v15 = vsub.f32 %v4724_v56, %v1668_v53  ;;  %v1732_v20 = vsub.f32 %v4716_v28, %v1668_v53  ;;  %v1735_v49 = vsub.f32 %v4759_v41, %v1668_v53  ;;  %v3655_v46 = vld [vmem:[#allocation3 + $0x18] sm:$0xff]  }
 0x570   :  { %v1734_v8 = vsub.f32 %v4742_v23, %v1668_v53  ;;  %v1737_v56 = vsub.f32 %v4756_v25, %v1668_v53  ;;  %v1736_v28 = vsub.f32 %v4748_v33, %v1668_v53  ;;  %v1739_v41 = vsub.f32 %v4791_v0, %v1668_v53  ;;  %3577 = vmatprep.subr.bf16.mxu0 %v3655_v46 }
 0x571   :  { %v1725_v51 = vmax.f32 %v1724_v22, 0.0  ;;  %v1738_v23 = vsub.f32 %v4774_v17, %v1668_v53  ;;  %v1741_v25 = vsub.f32 %v4788_v9, %v1668_v53  ;;  %v1740_v33 = vsub.f32 %v4780_v60, %v1668_v53  ;;  %v3656_v22 = vld [vmem:[#allocation3 + $0x10] sm:$0xff]   ;;  %3578 = vmatpush3.bf16.msra.mxu0 %v3655_v46 }
 0x572   :  { %3579 = vmatprep.subr.bf16.mxu0 %v3656_v22 }
 0x573   :  { %v1742_v30 = vadd.f32 1e-05, %v1725_v51 }
 0x575   :  { %3667 = vrsqrt.f32 %v1742_v30  ;;  %3580 = vmatpush3.bf16.msra.mxu0 %v3656_v22 }
 0x582   :  { %v3668_v19 = vpop.eup %3667 }
 0x583   :  { %v1745_v14 = vmul.f32 %v3668_v19, %v1727_v13  ;;  %v1744_v63 = vmul.f32 %v3668_v19, %v1726_v59  ;;  %v1747_v62 = vmul.f32 %v3668_v19, %v1729_v18  ;;  %v1746_v54 = vmul.f32 %v3668_v19, %v1728_v1 }
 0x584   :  { %v1749_v44 = vmul.f32 %v3668_v19, %v1731_v36  ;;  %v1748_v7 = vmul.f32 %v3668_v19, %v1730_v3  ;;  %v1751_v26 = vmul.f32 %v3668_v19, %v1733_v15  ;;  %v1750_v16 = vmul.f32 %v3668_v19, %v1732_v20 }
 0x585   :  { %1778 = vrot.lane.b32.xlu1 %v1745_v14, %s3720_s26  ;;  %1776 = vrot.lane.b32.xlu0 %v1744_v63, %s3720_s26  ;;  %v1753_v21 = vmul.f32 %v3668_v19, %v1735_v49  ;;  %v1752_v29 = vmul.f32 %v3668_v19, %v1734_v8  ;;  %v1755_v37 = vmul.f32 %v3668_v19, %v1737_v56 }
 0x586   :  { %v1754_v39 = vmul.f32 %v3668_v19, %v1736_v28  ;;  %v1757_v11 = vmul.f32 %v3668_v19, %v1739_v41  ;;  %v1756_v45 = vmul.f32 %v3668_v19, %v1738_v23  ;;  %v1759_v42 = vmul.f32 %v3668_v19, %v1741_v25 }
 0x587   :  { %v1758_v2 = vmul.f32 %v3668_v19, %v1740_v33 }
 0x589   :  { %1782 = vrot.lane.b32.xlu1 %v1747_v62, %s3720_s26  ;;  %1780 = vrot.lane.b32.xlu0 %v1746_v54, %s3720_s26 }
 0x58d   :  { %1786 = vrot.lane.b32.xlu1 %v1749_v44, %s3720_s26  ;;  %1784 = vrot.lane.b32.xlu0 %v1748_v7, %s3720_s26 }
 0x591   :  { %1790 = vrot.lane.b32.xlu1 %v1751_v26, %s3720_s26  ;;  %1788 = vrot.lane.b32.xlu0 %v1750_v16, %s3720_s26 }
 0x595   :  { %1794 = vrot.lane.b32.xlu1 %v1753_v21, %s3720_s26  ;;  %1792 = vrot.lane.b32.xlu0 %v1752_v29, %s3720_s26 }
 0x599   :  { %1798 = vrot.lane.b32.xlu1 %v1755_v37, %s3720_s26  ;;  %1796 = vrot.lane.b32.xlu0 %v1754_v39, %s3720_s26 }
 0x59d   :  { %1802 = vrot.lane.b32.xlu1 %v1757_v11, %s3720_s26  ;;  %1800 = vrot.lane.b32.xlu0 %v1756_v45, %s3720_s26 }
 0x5a1   :  { %1806 = vrot.lane.b32.xlu1 %v1759_v42, %s3720_s26  ;;  %1804 = vrot.lane.b32.xlu0 %v1758_v2, %s3720_s26 }
 0x5f7   :  { %v1779_v17 = vpop.permute.xlu1 %1778  ;;  %v1777_v0 = vpop.permute.xlu0 %1776 }
 0x5f8   :  { %v1825_v51 = vmul.f32 %v1779_v17, %v4404_v10  ;;  %v1824_v9 = vmul.f32 %v1777_v0, %v4404_v10 }
 0x5fa   :  { %v1841_v60 = vadd.f32 %v1825_v51, %v4619_v27  ;;  %v1840_v53 = vadd.f32 %v1824_v9, %v4619_v27 }
 0x5fb   :  { %v1783_v30 = vpop.permute.xlu1 %1782  ;;  %v1781_v13 = vpop.permute.xlu0 %1780 }
 0x5fc   :  { %v1864_v59 = vmax.f32 %v1841_v60, 0.0  ;;  %v1863_v19 = vmax.f32 %v1840_v53, 0.0  ;;  %v1827_v14 = vmul.f32 %v1783_v30, %v4404_v10  ;;  %v1826_v63 = vmul.f32 %v1781_v13, %v4404_v10 }
 0x5fe   :  { %v1843_v18 = vadd.f32 %v1827_v14, %v4619_v27  ;;  %v1842_v1 = vadd.f32 %v1826_v63, %v4619_v27  ;;  %v1879_v62 = vpack.c.bf16 %v1864_v59, %v1863_v19 }
 0x5ff   :  { %v1787_v54 = vpop.permute.xlu1 %1786  ;;  %v1785_v36 = vpop.permute.xlu0 %1784 }
 0x600   :  { %v1866_v3 = vmax.f32 %v1843_v18, 0.0  ;;  %v1865_v44 = vmax.f32 %v1842_v1, 0.0  ;;  %v1829_v7 = vmul.f32 %v1787_v54, %v4404_v10  ;;  %v1828_v15 = vmul.f32 %v1785_v36, %v4404_v10  ;;  %1901 = vrot.lane.b32.xlu0 %v1879_v62, %s3720_s26 }
 0x602   :  { %v1845_v20 = vadd.f32 %v1829_v7, %v4619_v27  ;;  %v1844_v26 = vadd.f32 %v1828_v15, %v4619_v27  ;;  %v1880_v16 = vpack.c.bf16 %v1866_v3, %v1865_v44 }
 0x603   :  { %v1791_v49 = vpop.permute.xlu1 %1790  ;;  %v1789_v8 = vpop.permute.xlu0 %1788 }
 0x604   :  { %v1868_v21 = vmax.f32 %v1845_v20, 0.0  ;;  %v1867_v29 = vmax.f32 %v1844_v26, 0.0  ;;  %v1831_v56 = vmul.f32 %v1791_v49, %v4404_v10  ;;  %v1830_v28 = vmul.f32 %v1789_v8, %v4404_v10  ;;  %1903 = vrot.lane.b32.xlu1 %v1880_v16, %s3720_s26 }
 0x606   :  { %v1847_v37 = vadd.f32 %v1831_v56, %v4619_v27  ;;  %v1846_v39 = vadd.f32 %v1830_v28, %v4619_v27  ;;  %v1881_v41 = vpack.c.bf16 %v1868_v21, %v1867_v29  ;;  %v5707_v29 = vld [vmem:[#allocation10_spill] sm:$0xff] }
 0x607   :  { %v1795_v23 = vpop.permute.xlu1 %1794  ;;  %v1793_v11 = vpop.permute.xlu0 %1792  ;;  %v5708_v56 = vrot.slane %v5707_v29, %v3919_v40 }
 0x608   :  { %v1870_v45 = vmax.f32 %v1847_v37, 0.0  ;;  %v1869_v25 = vmax.f32 %v1846_v39, 0.0  ;;  %v1833_v33 = vmul.f32 %v1795_v23, %v4411_v12  ;;  %v1832_v42 = vmul.f32 %v1793_v11, %v4411_v12  ;;  %1905 = vrot.lane.b32.xlu0 %v1881_v41, %s3720_s26 }
 0x609   :  { %v4884_v28 = vrot.slane %v5708_v56, %v3910_v34 }
 0x60a   :  { %v1849_v2 = vadd.f32 %v1833_v33, %v4647_v55  ;;  %v1848_v10 = vadd.f32 %v1832_v42, %v4647_v55  ;;  %v1882_v46 = vpack.c.bf16 %v1870_v45, %v1869_v25 }
 0x60b   :  { %v1799_v22 = vpop.permute.xlu1 %1798  ;;  %v1797_v17 = vpop.permute.xlu0 %1796 }
 0x60c   :  { %v1872_v0 = vmax.f32 %v1849_v2, 0.0  ;;  %v1871_v27 = vmax.f32 %v1848_v10, 0.0  ;;  %v1835_v51 = vmul.f32 %v1799_v22, %v4411_v12  ;;  %v1834_v9 = vmul.f32 %v1797_v17, %v4411_v12  ;;  %1907 = vrot.lane.b32.xlu1 %v1882_v46, %s3720_s26  ;;  %v3657_v2 = vld [vmem:[%s5689_s6 + $0x28] sm:$0xff]   ;;  %v3658_v10 = vld [vmem:[%s5689_s6 + $0x20] sm:$0xff]  }
 0x60d   :  { %3597 = vmatprep.subr.bf16.mxu1 %v3657_v2  ;;  %v4912_v22 = vld [vmem:[%s5692_s9 + $0x1] ss:$0 sm:$0xff] }
 0x60e   :  { %v1851_v60 = vadd.f32 %v1835_v51, %v4647_v55  ;;  %v1850_v53 = vadd.f32 %v1834_v9, %v4647_v55  ;;  %v1883_v30 = vpack.c.bf16 %v1872_v0, %v1871_v27  ;;  %3598 = vmatpush3.bf16.msra.mxu1 %v3657_v2 }
 0x60f   :  { %v1803_v13 = vpop.permute.xlu1 %1802  ;;  %v1801_v59 = vpop.permute.xlu0 %1800  ;;  %3599 = vmatprep.subr.bf16.mxu1 %v3658_v10 }
 0x610   :  { %v1874_v19 = vmax.f32 %v1851_v60, 0.0  ;;  %v1873_v14 = vmax.f32 %v1850_v53, 0.0  ;;  %v1837_v63 = vmul.f32 %v1803_v13, %v4411_v12  ;;  %v1836_v18 = vmul.f32 %v1801_v59, %v4411_v12  ;;  %1909 = vrot.lane.b32.xlu0 %v1883_v30, %s3720_s26 }
 0x612   :  { %v1853_v1 = vadd.f32 %v1837_v63, %v4647_v55  ;;  %v1852_v62 = vadd.f32 %v1836_v18, %v4647_v55  ;;  %v1884_v54 = vpack.c.bf16 %v1874_v19, %v1873_v14  ;;  %3600 = vmatpush3.bf16.msra.mxu1 %v3658_v10 }
 0x613   :  { %v1807_v36 = vpop.permute.xlu1 %1806  ;;  %v1805_v3 = vpop.permute.xlu0 %1804 }
 0x614   :  { %v1876_v44 = vmax.f32 %v1853_v1, 0.0  ;;  %v1875_v7 = vmax.f32 %v1852_v62, 0.0  ;;  %v1839_v15 = vmul.f32 %v1807_v36, %v4411_v12  ;;  %v1838_v20 = vmul.f32 %v1805_v3, %v4411_v12  ;;  %1911 = vrot.lane.b32.xlu1 %v1884_v54, %s3720_s26  ;;  %v5709_v12 = vld [vmem:[#allocation11_spill] sm:$0xff] }
 0x616   :  { %v1855_v26 = vadd.f32 %v1839_v15, %v4647_v55  ;;  %v1854_v16 = vadd.f32 %v1838_v20, %v4647_v55  ;;  %v1885_v49 = vpack.c.bf16 %v1876_v44, %v1875_v7  ;;  %v4891_v55 = vrot.slane %v5709_v12, %v3910_v34 }
 0x618   :  { %v1878_v8 = vmax.f32 %v1855_v26, 0.0  ;;  %v1877_v21 = vmax.f32 %v1854_v16, 0.0  ;;  %1913 = vrot.lane.b32.xlu0 %v1885_v49, %s3720_s26 }
 0x61a   :  { %v1886_v37 = vpack.c.bf16 %v1878_v8, %v1877_v21 }
 0x61c   :  { %2244 = vrot.lane.b32.xlu0 %v4884_v28, %s3724_s3  ;;  %1915 = vrot.lane.b32.xlu1 %v1886_v37, %s3720_s26 }
 0x620   :  { %2246 = vrot.lane.b32.xlu1 %v4891_v55, %s3724_s3 }
 0x672   :  { %v1902_v39 = vpop.permute.xlu0 %1901 }
 0x673   :  { %3581 = vmatprep.mubr.msk.bf16.mxu0 %vm458_vm3, %v1902_v39 }
 0x676   :  { %v1904_v41 = vpop.permute.xlu1 %1903 }
 0x677   :  { %3582 = vmatmul.mubr.msk.bf16.vlgmr.msra.gmra.mxu0 %vm458_vm3, %v1904_v41 }
 0x67a   :  { %v1906_v23 = vpop.permute.xlu0 %1905 }
 0x67b   :  { %3585 = vmatprep.mubr.msk.bf16.mxu0 %vm458_vm3, %v1906_v23 }
 0x67e   :  { %v1908_v11 = vpop.permute.xlu1 %1907 }
 0x67f   :  { %3586 = vmatmul.mubr.msk.bf16.gmra.mxu0 %vm458_vm3, %v1908_v11 }
 0x682   :  { %v1910_v45 = vpop.permute.xlu0 %1909 }
 0x683   :  { %3589 = vmatprep.mubr.msk.bf16.mxu0 %vm458_vm3, %v1910_v45 }
 0x686   :  { %v1912_v25 = vpop.permute.xlu1 %1911 }
 0x687   :  { %3590 = vmatmul.mubr.msk.bf16.gmra.mxu0 %vm458_vm3, %v1912_v25 }
 0x68a   :  { %v1914_v33 = vpop.permute.xlu0 %1913 }
 0x68b   :  { %3593 = vmatprep.mubr.msk.bf16.mxu0 %vm458_vm3, %v1914_v33 }
 0x68e   :  { %v1916_v42 = vpop.permute.xlu1 %1915 }
 0x68f   :  { %3594 = vmatmul.mubr.msk.bf16.gmra.mxu0 %vm458_vm3, %v1916_v42 }
 0x737   :  { %v3583_v46 = vpop.f32.mrf.mxu0 }
 0x738   :  { %v1996_v27 = vadd.f32 %v3583_v46, %v4912_v22 }
 0x739   :  { %v1987_v17 = vpop.f32.mrf.mxu0 }
 0x73a   :  { %v1988_v0 = vadd.f32 %v4912_v22, %v1987_v17  ;;  %v4921_v30 = vadd.f32 %v1996_v27, %v4441_v61 }
 0x73b   :  { %v3584_v51 = vpop.f32.mrf.mxu0 }
 0x73c   :  { %v4917_v9 = vadd.f32 %v1988_v0, %v4437_v47  ;;  %v1999_v60 = vadd.f32 %v3584_v51, %v4912_v22  ;;  %v2106_v61 = vmul.f32 %v4921_v30, %v4921_v30 }
 0x73d   :  { %v1990_v53 = vpop.f32.mrf.mxu0 }
 0x73e   :  { %v1991_v13 = vadd.f32 %v4912_v22, %v1990_v53  ;;  %v2104_v19 = vmul.f32 %v4917_v9, %v4917_v9  ;;  %v4927_v14 = vadd.f32 %v1999_v60, %v4447_v31  ;;  %v2066_v62 = vsel %vm458_vm3, %v4917_v9, 0.0 }
 0x73f   :  { %v3587_v59 = vpop.f32.mrf.mxu0  ;;  %v2123_v29 = vsel %vm458_vm3, %v2106_v61, 0.0 }
 0x740   :  { %v4930_v63 = vadd.f32 %v1991_v13, %v4450_v38  ;;  %v2012_v18 = vadd.f32 %v3587_v59, %v4912_v22  ;;  %v2069_v38 = vsel %vm458_vm3, %v4921_v30, 0.0  ;;  %v2120_v7 = vsel %vm458_vm3, %v2104_v19, 0.0 }
 0x741   :  { %v2003_v47 = vpop.f32.mrf.mxu0  ;;  %v2107_v15 = vmul.f32 %v4927_v14, %v4927_v14 }
 0x742   :  { %v2004_v1 = vadd.f32 %v4912_v22, %v2003_v47  ;;  %v2067_v54 = vsel %vm458_vm3, %v4930_v63, 0.0  ;;  %v2105_v31 = vmul.f32 %v4930_v63, %v4930_v63  ;;  %v4953_v21 = vadd.f32 %v2012_v18, %v4473_v58 }
 0x743   :  { %v3588_v36 = vpop.f32.mrf.mxu0  ;;  %v2068_v3 = vadd.f32 %v2067_v54, %v2066_v62  ;;  %v2125_v23 = vsel %vm458_vm3, %v2107_v15, 0.0 }
 0x744   :  { %v4945_v44 = vadd.f32 %v2004_v1, %v4465_v50  ;;  %v2121_v20 = vsel %vm458_vm3, %v2105_v31, 0.0  ;;  %v2015_v26 = vadd.f32 %v3588_v36, %v4912_v22  ;;  %v2071_v50 = vsel %vm458_vm3, %v4927_v14, 0.0 }
 0x745   :  { %v2006_v16 = vpop.f32.mrf.mxu0  ;;  %v2070_v49 = vadd.f32 %v2069_v38, %v2068_v3  ;;  %v2122_v8 = vadd.f32 %v2121_v20, %v2120_v7  ;;  %v2110_v33 = vmul.f32 %v4953_v21, %v4953_v21  ;;  %v2077_v27 = vsel %vm458_vm3, %v4953_v21, 0.0 }
 0x746   :  { %v2108_v56 = vmul.f32 %v4945_v44, %v4945_v44  ;;  %v2007_v37 = vadd.f32 %v4912_v22, %v2006_v16  ;;  %v2073_v11 = vsel %vm458_vm3, %v4945_v44, 0.0  ;;  %v4965_v58 = vadd.f32 %v2015_v26, %v4485_v52 }
 0x747   :  { %v3591_v12 = vpop.f32.mrf.mxu0  ;;  %v2124_v39 = vadd.f32 %v2123_v29, %v2122_v8  ;;  %v2072_v41 = vadd.f32 %v2071_v50, %v2070_v49  ;;  %v2131_v62 = vsel %vm458_vm3, %v2110_v33, 0.0 }
 0x748   :  { %v4968_v45 = vadd.f32 %v2007_v37, %v4488_v35  ;;  %v2127_v46 = vsel %vm458_vm3, %v2108_v56, 0.0  ;;  %v2028_v0 = vadd.f32 %v3591_v12, %v4912_v22  ;;  %v2111_v53 = vmul.f32 %v4965_v58, %v4965_v58 }
 0x749   :  { %v2019_v25 = vpop.f32.mrf.mxu0  ;;  %v2074_v42 = vadd.f32 %v2073_v11, %v2072_v41  ;;  %v2126_v2 = vadd.f32 %v2125_v23, %v2124_v39  ;;  %v2079_v54 = vsel %vm458_vm3, %v4965_v58, 0.0 }
 0x74a   :  { %v2020_v10 = vadd.f32 %v4912_v22, %v2019_v25  ;;  %v2075_v17 = vsel %vm458_vm3, %v4968_v45, 0.0  ;;  %v2109_v52 = vmul.f32 %v4968_v45, %v4968_v45  ;;  %v4993_v31 = vadd.f32 %v2028_v0, %v4513_v5 }
 0x74b   :  { %v3592_v35 = vpop.f32.mrf.mxu0  ;;  %v2128_v51 = vadd.f32 %v2127_v46, %v2126_v2  ;;  %v2076_v60 = vadd.f32 %v2075_v17, %v2074_v42  ;;  %v2133_v15 = vsel %vm458_vm3, %v2111_v53, 0.0 }
 0x74c   :  { %v2129_v13 = vsel %vm458_vm3, %v2109_v52, 0.0  ;;  %v4985_v59 = vadd.f32 %v2020_v10, %v4505_v24  ;;  %v2031_v19 = vadd.f32 %v3592_v35, %v4912_v22  ;;  %v2085_v23 = vsel %vm458_vm3, %v4993_v31, 0.0 }
 0x74d   :  { %v2022_v47 = vpop.f32.mrf.mxu0  ;;  %v2078_v18 = vadd.f32 %v2077_v27, %v2076_v60  ;;  %v2130_v1 = vadd.f32 %v2129_v13, %v2128_v51 }
 0x74e   :  { %v2023_v61 = vadd.f32 %v4912_v22, %v2022_v47  ;;  %v2112_v36 = vmul.f32 %v4985_v59, %v4985_v59  ;;  %v2081_v20 = vsel %vm458_vm3, %v4985_v59, 0.0  ;;  %v5004_v26 = vadd.f32 %v2031_v19, %v4524_v6 }
 0x74f   :  { %v3595_v24 = vpop.f32.mrf.mxu0  ;;  %v2132_v38 = vadd.f32 %v2131_v62, %v2130_v1  ;;  %v2080_v3 = vadd.f32 %v2079_v54, %v2078_v18 }
 0x750   :  { %v4998_v7 = vadd.f32 %v2023_v61, %v4518_v32  ;;  %v2114_v32 = vmul.f32 %v4993_v31, %v4993_v31  ;;  %v2135_v50 = vsel %vm458_vm3, %v2112_v36, 0.0  ;;  %v2044_v56 = vadd.f32 %v3595_v24, %v4912_v22 }
 0x751   :  { %v2035_v16 = vpop.f32.mrf.mxu0  ;;  %v2082_v5 = vadd.f32 %v2081_v20, %v2080_v3  ;;  %v2134_v49 = vadd.f32 %v2133_v15, %v2132_v38  ;;  %v2115_v11 = vmul.f32 %v5004_v26, %v5004_v26  ;;  %v2087_v52 = vsel %vm458_vm3, %v5004_v26, 0.0 }
 0x752   :  { %v2083_v8 = vsel %vm458_vm3, %v4998_v7, 0.0  ;;  %v2113_v29 = vmul.f32 %v4998_v7, %v4998_v7  ;;  %v2036_v37 = vadd.f32 %v4912_v22, %v2035_v16  ;;  %v2139_v17 = vsel %vm458_vm3, %v2114_v32, 0.0 }
 0x753   :  { %v3596_v6 = vpop.f32.mrf.mxu0  ;;  %v2136_v12 = vadd.f32 %v2135_v50, %v2134_v49  ;;  %v2084_v39 = vadd.f32 %v2083_v8, %v2082_v5  ;;  %v5029_v0 = vadd.f32 %v2044_v56, %v4549_v48  ;;  %v2141_v51 = vsel %vm458_vm3, %v2115_v11, 0.0 }
 0x754   :  { %v2137_v41 = vsel %vm458_vm3, %v2113_v29, 0.0  ;;  %v5021_v25 = vadd.f32 %v2036_v37, %v4541_v4  ;;  %v2047_v33 = vadd.f32 %v3596_v6, %v4912_v22 }
 0x755   :  { %v2038_v42 = vpop.f32.mrf.mxu0  ;;  %v2086_v2 = vadd.f32 %v2085_v23, %v2084_v39  ;;  %v2138_v10 = vadd.f32 %v2137_v41, %v2136_v12  ;;  %v2118_v48 = vmul.f32 %v5029_v0, %v5029_v0 }
 0x756   :  { %v2039_v46 = vadd.f32 %v4912_v22, %v2038_v42  ;;  %v2116_v35 = vmul.f32 %v5021_v25, %v5021_v25  ;;  %v2089_v60 = vsel %vm458_vm3, %v5021_v25, 0.0  ;;  %v5037_v22 = vadd.f32 %v2047_v33, %v4557_v43 }
 0x757   :  { %v2140_v4 = vadd.f32 %v2139_v17, %v2138_v10  ;;  %v2088_v27 = vadd.f32 %v2087_v52, %v2086_v2  ;;  %v2093_v43 = vsel %vm458_vm3, %v5029_v0, 0.0  ;;  %v2147_v38 = vsel %vm458_vm3, %v2118_v48, 0.0 }
 0x758   :  { %v5040_v53 = vadd.f32 %v2039_v46, %v4560_v57  ;;  %v2143_v47 = vsel %vm458_vm3, %v2116_v35, 0.0  ;;  %v2119_v57 = vmul.f32 %v5037_v22, %v5037_v22  ;;  %v2095_v3 = vsel %vm458_vm3, %v5037_v22, 0.0 }
 0x759   :  { %v2090_v13 = vadd.f32 %v2089_v60, %v2088_v27  ;;  %v2142_v19 = vadd.f32 %v2141_v51, %v2140_v4 }
 0x75a   :  { %v2091_v18 = vsel %vm458_vm3, %v5040_v53, 0.0  ;;  %v2117_v1 = vmul.f32 %v5040_v53, %v5040_v53  ;;  %v2149_v16 = vsel %vm458_vm3, %v2119_v57, 0.0 }
 0x75b   :  { %v2144_v61 = vadd.f32 %v2143_v47, %v2142_v19  ;;  %v2092_v62 = vadd.f32 %v2091_v18, %v2090_v13 }
 0x75c   :  { %v2145_v54 = vsel %vm458_vm3, %v2117_v1, 0.0 }
 0x75d   :  { %v2094_v36 = vadd.f32 %v2093_v43, %v2092_v62  ;;  %v2146_v24 = vadd.f32 %v2145_v54, %v2144_v61 }
 0x75f   :  { %v2096_v15 = vadd.f32 %v2095_v3, %v2094_v36  ;;  %v2148_v20 = vadd.f32 %v2147_v38, %v2146_v24 }
 0x761   :  { %v2097_v5 = vrot.slane %v2096_v15, 4  ;;  %v2150_v49 = vadd.f32 %v2149_v16, %v2148_v20  ;;  %v5099_v16 = vpop.permute.xlu0 %2244 }
 0x763   :  { %v2098_v8 = vadd.f32 %v2097_v5, %v2096_v15  ;;  %v2151_v29 = vrot.slane %v2150_v49, 4 }
 0x765   :  { %v2099_v32 = vrot.slane %v2098_v8, 2  ;;  %v2152_v50 = vadd.f32 %v2151_v29, %v2150_v49 }
 0x767   :  { %v2100_v56 = vadd.f32 %v2099_v32, %v2098_v8  ;;  %v2153_v37 = vrot.slane %v2152_v50, 2 }
 0x769   :  { %v2101_v6 = vrot.slane %v2100_v56, 1  ;;  %v2154_v12 = vadd.f32 %v2153_v37, %v2152_v50 }
 0x76b   :  { %v2102_v39 = vadd.f32 %v2101_v6, %v2100_v56  ;;  %v2155_v41 = vrot.slane %v2154_v12, 1 }
 0x76d   :  { %v5058_v23 = vmul.f32 0.0078125, %v2102_v39  ;;  %v2156_v11 = vadd.f32 %v2155_v41, %v2154_v12 }
 0x76f   :  { %v2157_v33 = vmul.f32 0.0078125, %v2156_v11  ;;  %v2158_v42 = vmul.f32 %v5058_v23, %v5058_v23  ;;  %v2174_v17 = vsub.f32 %v5040_v53, %v5058_v23  ;;  %v2161_v52 = vsub.f32 %v4917_v9, %v5058_v23 }
 0x770   :  { %v2162_v35 = vsub.f32 %v4930_v63, %v5058_v23  ;;  %v2163_v4 = vsub.f32 %v4921_v30, %v5058_v23  ;;  %v2164_v27 = vsub.f32 %v4927_v14, %v5058_v23  ;;  %v2165_v51 = vsub.f32 %v4945_v44, %v5058_v23 }
 0x771   :  { %v2159_v2 = vsub.f32 %v2157_v33, %v2158_v42  ;;  %v2166_v60 = vsub.f32 %v4968_v45, %v5058_v23  ;;  %v2167_v19 = vsub.f32 %v4953_v21, %v5058_v23  ;;  %v2168_v48 = vsub.f32 %v4965_v58, %v5058_v23 }
 0x772   :  { %v2169_v47 = vsub.f32 %v4985_v59, %v5058_v23  ;;  %v2170_v18 = vsub.f32 %v4998_v7, %v5058_v23  ;;  %v2171_v43 = vsub.f32 %v4993_v31, %v5058_v23  ;;  %v2172_v41 = vsub.f32 %v5004_v26, %v5058_v23 }
 0x773   :  { %v2160_v10 = vmax.f32 %v2159_v2, 0.0  ;;  %v2173_v2 = vsub.f32 %v5021_v25, %v5058_v23 }
 0x775   :  { %v2177_v46 = vadd.f32 1e-05, %v2160_v10 }
 0x777   :  { %3669 = vrsqrt.f32 %v2177_v46 }
 0x784   :  { %v5076_v13 = vpop.eup %3669 }
 0x785   :  { %v2179_v1 = vmul.f32 %v5076_v13, %v2161_v52  ;;  %v2180_v61 = vmul.f32 %v5076_v13, %v2162_v35  ;;  %v2181_v62 = vmul.f32 %v5076_v13, %v2163_v4  ;;  %v2182_v57 = vmul.f32 %v5076_v13, %v2164_v27 }
 0x786   :  { %v2183_v54 = vmul.f32 %v5076_v13, %v2165_v51  ;;  %v2184_v36 = vmul.f32 %v5076_v13, %v2166_v60  ;;  %v2185_v24 = vmul.f32 %v5076_v13, %v2167_v19  ;;  %v2186_v20 = vmul.f32 %v5076_v13, %v2168_v48 }
 0x787   :  { %v2228_v38 = vmul.f32 %v4884_v28, %v2179_v1  ;;  %v2229_v3 = vmul.f32 %v4884_v28, %v2180_v61  ;;  %v2230_v15 = vmul.f32 %v4884_v28, %v2181_v62  ;;  %v2231_v5 = vmul.f32 %v4884_v28, %v2182_v57 }
 0x788   :  { %v2232_v49 = vmul.f32 %v4884_v28, %v2183_v54  ;;  %v2233_v8 = vmul.f32 %v4884_v28, %v2184_v36  ;;  %v2234_v29 = vmul.f32 %v4884_v28, %v2185_v24  ;;  %v2235_v37 = vmul.f32 %v4884_v28, %v2186_v20  ;;  %v5127_v24 = vpop.permute.xlu1 %2246 }
 0x789   :  { %v2250_v32 = vadd.f32 %v5099_v16, %v2228_v38  ;;  %v2251_v50 = vadd.f32 %v5099_v16, %v2229_v3  ;;  %v2252_v56 = vadd.f32 %v5099_v16, %v2230_v15  ;;  %v2253_v6 = vadd.f32 %v5099_v16, %v2231_v5 }
 0x78a   :  { %v2254_v12 = vadd.f32 %v5099_v16, %v2232_v49  ;;  %v2255_v39 = vadd.f32 %v5099_v16, %v2233_v8  ;;  %v2256_v35 = vadd.f32 %v5099_v16, %v2234_v29  ;;  %v2257_v27 = vadd.f32 %v5099_v16, %v2235_v37 }
 0x78b   :  { %v2273_v11 = vmax.f32 %v2250_v32, 0.0  ;;  %v2274_v33 = vmax.f32 %v2251_v50, 0.0  ;;  %v2275_v42 = vmax.f32 %v2252_v56, 0.0  ;;  %v2276_v10 = vmax.f32 %v2253_v6, 0.0 }
 0x78c   :  { %v2277_v46 = vmax.f32 %v2254_v12, 0.0  ;;  %v2278_v52 = vmax.f32 %v2255_v39, 0.0  ;;  %v2187_v51 = vmul.f32 %v5076_v13, %v2169_v47  ;;  %v2188_v60 = vmul.f32 %v5076_v13, %v2170_v18 }
 0x78d   :  { %v2289_v4 = vpack.c.bf16 %v2274_v33, %v2273_v11  ;;  %v2192_v19 = vmul.f32 %v5076_v13, %v2174_v17  ;;  %v2290_v48 = vpack.c.bf16 %v2276_v10, %v2275_v42  ;;  %v2189_v1 = vmul.f32 %v5076_v13, %v2171_v43 }
 0x78e   :  { %v2190_v61 = vmul.f32 %v5076_v13, %v2172_v41  ;;  %v2291_v62 = vpack.c.bf16 %v2278_v52, %v2277_v46  ;;  %v2236_v57 = vmul.f32 %v4891_v55, %v2187_v51  ;;  %v2237_v54 = vmul.f32 %v4891_v55, %v2188_v60 }
 0x78f   :  { %3601 = vmatprep.mubr.msk.bf16.mxu1 %vm458_vm3, %v2289_v4  ;;  %v2191_v36 = vmul.f32 %v5076_v13, %v2173_v2  ;;  %v2279_v17 = vmax.f32 %v2256_v35, 0.0  ;;  %v2280_v47 = vmax.f32 %v2257_v27, 0.0  ;;  %v2238_v38 = vmul.f32 %v4891_v55, %v2189_v1 }
 0x790   :  { %3602 = vmatmul.mubr.msk.bf16.vlgmr.msra.gmra.mxu1 %vm458_vm3, %v2290_v48  ;;  %v2258_v18 = vadd.f32 %v5127_v24, %v2236_v57  ;;  %v2259_v43 = vadd.f32 %v5127_v24, %v2237_v54  ;;  %v2239_v3 = vmul.f32 %v4891_v55, %v2190_v61  ;;  %v2241_v49 = vmul.f32 %v4891_v55, %v2192_v19  ;;  %v5159_v19 = vld [vmem:[%s5690_s7 + $0x2] ss:$0 sm:$0xff] }
 0x791   :  { %3605 = vmatprep.mubr.msk.bf16.mxu1 %vm458_vm3, %v2291_v62  ;;  %v2240_v5 = vmul.f32 %v4891_v55, %v2191_v36  ;;  %v2175_v8 = vsub.f32 %v5029_v0, %v5058_v23  ;;  %v2176_v29 = vsub.f32 %v5037_v22, %v5058_v23  ;;  %v2292_v32 = vpack.c.bf16 %v2280_v47, %v2279_v17 }
 0x792   :  { %v2281_v15 = vmax.f32 %v2258_v18, 0.0  ;;  %v2282_v20 = vmax.f32 %v2259_v43, 0.0  ;;  %v2260_v50 = vadd.f32 %v5127_v24, %v2238_v38  ;;  %v2261_v56 = vadd.f32 %v5127_v24, %v2239_v3 }
 0x793   :  { %v2193_v37 = vmul.f32 %v5076_v13, %v2175_v8  ;;  %v2194_v6 = vmul.f32 %v5076_v13, %v2176_v29  ;;  %v2262_v39 = vadd.f32 %v5127_v24, %v2240_v5  ;;  %v2263_v41 = vadd.f32 %v5127_v24, %v2241_v49 }
 0x794   :  { %v2293_v12 = vpack.c.bf16 %v2282_v20, %v2281_v15  ;;  %v2283_v11 = vmax.f32 %v2260_v50, 0.0  ;;  %v2284_v23 = vmax.f32 %v2261_v56, 0.0 }
 0x795   :  { %v2242_v33 = vmul.f32 %v4891_v55, %v2193_v37  ;;  %v2243_v42 = vmul.f32 %v4891_v55, %v2194_v6  ;;  %v2285_v2 = vmax.f32 %v2262_v39, 0.0  ;;  %v2286_v10 = vmax.f32 %v2263_v41, 0.0 }
 0x796   :  { %v2294_v46 = vpack.c.bf16 %v2284_v23, %v2283_v11 }
 0x797   :  { %v2264_v13 = vadd.f32 %v5127_v24, %v2242_v33  ;;  %v2265_v52 = vadd.f32 %v5127_v24, %v2243_v42  ;;  %v2295_v35 = vpack.c.bf16 %v2286_v10, %v2285_v2 }
 0x798   :  { %3606 = vmatmul.mubr.msk.bf16.gmra.mxu1 %vm458_vm3, %v2292_v32 }
 0x799   :  { %3609 = vmatprep.mubr.msk.bf16.mxu1 %vm458_vm3, %v2293_v12  ;;  %v2287_v4 = vmax.f32 %v2264_v13, 0.0  ;;  %v2288_v27 = vmax.f32 %v2265_v52, 0.0 }
 0x79b   :  { %v2296_v51 = vpack.c.bf16 %v2288_v27, %v2287_v4 }
 0x7a0   :  { %3610 = vmatmul.mubr.msk.bf16.gmra.mxu1 %vm458_vm3, %v2294_v46 }
 0x7a1   :  { %3613 = vmatprep.mubr.msk.bf16.mxu1 %vm458_vm3, %v2295_v35 }
 0x7a8   :  { %3614 = vmatmul.mubr.msk.bf16.gmra.mxu1 %vm458_vm3, %v2296_v51 }
 0x850   :  { %v3603_v60 = vpop.f32.mrf.mxu1 }
 0x851   :  { %v5165_v62 = vadd.f32 %v3603_v60, %v5159_v19 }
 0x852   :  { %v2373_v48 = vpop.f32.mrf.mxu1 }
 0x853   :  { %v5162_v1 = vadd.f32 %v5159_v19, %v2373_v48  ;;  %v2476_v18 = vmul.f32 %v5165_v62, %v5165_v62  ;;  %v2439_v15 = vsel %vm458_vm3, %v5165_v62, 0.0 }
 0x854   :  { %v3604_v61 = vpop.f32.mrf.mxu1 }
 0x855   :  { %v2474_v54 = vmul.f32 %v5162_v1, %v5162_v1  ;;  %v5170_v36 = vadd.f32 %v3604_v61, %v5159_v19  ;;  %v2436_v43 = vsel %vm458_vm3, %v5162_v1, 0.0  ;;  %v2493_v6 = vsel %vm458_vm3, %v2476_v18, 0.0 }
 0x856   :  { %v2376_v57 = vpop.f32.mrf.mxu1 }
 0x857   :  { %v5173_v17 = vadd.f32 %v5159_v19, %v2376_v57  ;;  %v2490_v49 = vsel %vm458_vm3, %v2474_v54, 0.0  ;;  %v2477_v8 = vmul.f32 %v5170_v36, %v5170_v36  ;;  %v2441_v12 = vsel %vm458_vm3, %v5170_v36, 0.0 }
 0x858   :  { %v3607_v47 = vpop.f32.mrf.mxu1 }
 0x859   :  { %v2437_v38 = vsel %vm458_vm3, %v5173_v17, 0.0  ;;  %v2475_v3 = vmul.f32 %v5173_v17, %v5173_v17  ;;  %v5196_v39 = vadd.f32 %v3607_v47, %v5159_v19  ;;  %v2495_v42 = vsel %vm458_vm3, %v2477_v8, 0.0 }
 0x85a   :  { %v2438_v20 = vadd.f32 %v2437_v38, %v2436_v43  ;;  %v2389_v5 = vpop.f32.mrf.mxu1 }
 0x85b   :  { %v2491_v29 = vsel %vm458_vm3, %v2475_v3, 0.0  ;;  %v5190_v32 = vadd.f32 %v5159_v19, %v2389_v5  ;;  %v2480_v4 = vmul.f32 %v5196_v39, %v5196_v39  ;;  %v2447_v54 = vsel %vm458_vm3, %v5196_v39, 0.0 }
 0x85c   :  { %v2440_v50 = vadd.f32 %v2439_v15, %v2438_v20  ;;  %v2492_v56 = vadd.f32 %v2491_v29, %v2490_v49  ;;  %v3608_v37 = vpop.f32.mrf.mxu1 }
 0x85d   :  { %v2478_v41 = vmul.f32 %v5190_v32, %v5190_v32  ;;  %v2443_v2 = vsel %vm458_vm3, %v5190_v32, 0.0  ;;  %v5204_v10 = vadd.f32 %v3608_v37, %v5159_v19  ;;  %v2501_v20 = vsel %vm458_vm3, %v2480_v4, 0.0 }
 0x85e   :  { %v2494_v11 = vadd.f32 %v2493_v6, %v2492_v56  ;;  %v2442_v23 = vadd.f32 %v2441_v12, %v2440_v50  ;;  %v2392_v33 = vpop.f32.mrf.mxu1 }
 0x85f   :  { %v5207_v46 = vadd.f32 %v5159_v19, %v2392_v33  ;;  %v2497_v27 = vsel %vm458_vm3, %v2478_v41, 0.0  ;;  %v2481_v47 = vmul.f32 %v5204_v10, %v5204_v10  ;;  %v2449_v5 = vsel %vm458_vm3, %v5204_v10, 0.0 }
 0x860   :  { %v2444_v13 = vadd.f32 %v2443_v2, %v2442_v23  ;;  %v2496_v52 = vadd.f32 %v2495_v42, %v2494_v11  ;;  %v3611_v35 = vpop.f32.mrf.mxu1 }
 0x861   :  { %v2445_v51 = vsel %vm458_vm3, %v5207_v46, 0.0  ;;  %v2479_v60 = vmul.f32 %v5207_v46, %v5207_v46  ;;  %v5228_v49 = vadd.f32 %v3611_v35, %v5159_v19  ;;  %v2503_v37 = vsel %vm458_vm3, %v2481_v47, 0.0 }
 0x862   :  { %v2498_v48 = vadd.f32 %v2497_v27, %v2496_v52  ;;  %v2446_v61 = vadd.f32 %v2445_v51, %v2444_v13  ;;  %v2405_v57 = vpop.f32.mrf.mxu1 }
 0x863   :  { %v2499_v18 = vsel %vm458_vm3, %v2479_v60, 0.0  ;;  %v5222_v43 = vadd.f32 %v5159_v19, %v2405_v57  ;;  %v2484_v42 = vmul.f32 %v5228_v49, %v5228_v49  ;;  %v2455_v51 = vsel %vm458_vm3, %v5228_v49, 0.0 }
 0x864   :  { %v2448_v38 = vadd.f32 %v2447_v54, %v2446_v61  ;;  %v2500_v3 = vadd.f32 %v2499_v18, %v2498_v48  ;;  %v3612_v15 = vpop.f32.mrf.mxu1 }
 0x865   :  { %v2482_v8 = vmul.f32 %v5222_v43, %v5222_v43  ;;  %v2451_v6 = vsel %vm458_vm3, %v5222_v43, 0.0  ;;  %v5236_v12 = vadd.f32 %v3612_v15, %v5159_v19  ;;  %v2509_v18 = vsel %vm458_vm3, %v2484_v42, 0.0 }
 0x866   :  { %v2502_v29 = vadd.f32 %v2501_v20, %v2500_v3  ;;  %v2450_v50 = vadd.f32 %v2449_v5, %v2448_v38  ;;  %v2408_v56 = vpop.f32.mrf.mxu1 }
 0x867   :  { %v5239_v41 = vadd.f32 %v5159_v19, %v2408_v56  ;;  %v2505_v2 = vsel %vm458_vm3, %v2482_v8, 0.0  ;;  %v2485_v60 = vmul.f32 %v5236_v12, %v5236_v12  ;;  %v2457_v38 = vsel %vm458_vm3, %v5236_v12, 0.0 }
 0x868   :  { %v2452_v11 = vadd.f32 %v2451_v6, %v2450_v50  ;;  %v2504_v23 = vadd.f32 %v2503_v37, %v2502_v29  ;;  %v3615_v33 = vpop.f32.mrf.mxu1 }
 0x869   :  { %v2453_v13 = vsel %vm458_vm3, %v5239_v41, 0.0  ;;  %v2483_v52 = vmul.f32 %v5239_v41, %v5239_v41  ;;  %v5260_v3 = vadd.f32 %v3615_v33, %v5159_v19  ;;  %v2511_v29 = vsel %vm458_vm3, %v2485_v60, 0.0 }
 0x86a   :  { %v2506_v35 = vadd.f32 %v2505_v2, %v2504_v23  ;;  %v2454_v4 = vadd.f32 %v2453_v13, %v2452_v11  ;;  %v2421_v27 = vpop.f32.mrf.mxu1 }
 0x86b   :  { %v2507_v48 = vsel %vm458_vm3, %v2483_v52, 0.0  ;;  %v5254_v61 = vadd.f32 %v5159_v19, %v2421_v27  ;;  %v2488_v23 = vmul.f32 %v5260_v3, %v5260_v3 }
 0x86c   :  { %v2456_v57 = vadd.f32 %v2455_v51, %v2454_v4  ;;  %v2508_v54 = vadd.f32 %v2507_v48, %v2506_v35  ;;  %v3616_v47 = vpop.f32.mrf.mxu1  ;;  %v2463_v35 = vsel %vm458_vm3, %v5260_v3, 0.0 }
 0x86d   :  { %v2486_v15 = vmul.f32 %v5254_v61, %v5254_v61  ;;  %v2459_v50 = vsel %vm458_vm3, %v5254_v61, 0.0  ;;  %v5268_v56 = vadd.f32 %v3616_v47, %v5159_v19  ;;  %v2517_v60 = vsel %vm458_vm3, %v2488_v23, 0.0 }
 0x86e   :  { %v2510_v20 = vadd.f32 %v2509_v18, %v2508_v54  ;;  %v2458_v5 = vadd.f32 %v2457_v38, %v2456_v57  ;;  %v2424_v8 = vpop.f32.mrf.mxu1 }
 0x86f   :  { %v5271_v37 = vadd.f32 %v5159_v19, %v2424_v8  ;;  %v2513_v33 = vsel %vm458_vm3, %v2486_v15, 0.0  ;;  %v2489_v19 = vmul.f32 %v5268_v56, %v5268_v56  ;;  %v2465_v48 = vsel %vm458_vm3, %v5268_v56, 0.0 }
 0x870   :  { %v2460_v6 = vadd.f32 %v2459_v50, %v2458_v5  ;;  %v2512_v11 = vadd.f32 %v2511_v29, %v2510_v20 }
 0x871   :  { %v2461_v42 = vsel %vm458_vm3, %v5271_v37, 0.0  ;;  %v2487_v2 = vmul.f32 %v5271_v37, %v5271_v37  ;;  %v2519_v47 = vsel %vm458_vm3, %v2489_v19, 0.0 }
 0x872   :  { %v2514_v13 = vadd.f32 %v2513_v33, %v2512_v11  ;;  %v2462_v52 = vadd.f32 %v2461_v42, %v2460_v6 }
 0x873   :  { %v2515_v4 = vsel %vm458_vm3, %v2487_v2, 0.0 }
 0x874   :  { %v2464_v27 = vadd.f32 %v2463_v35, %v2462_v52  ;;  %v2516_v51 = vadd.f32 %v2515_v4, %v2514_v13 }
 0x876   :  { %v2466_v57 = vadd.f32 %v2465_v48, %v2464_v27  ;;  %v2518_v54 = vadd.f32 %v2517_v60, %v2516_v51 }
 0x878   :  { %v2467_v18 = vrot.slane %v2466_v57, 4  ;;  %v2520_v38 = vadd.f32 %v2519_v47, %v2518_v54 }
 0x87a   :  { %v2468_v15 = vadd.f32 %v2467_v18, %v2466_v57  ;;  %v2521_v20 = vrot.slane %v2520_v38, 4 }
 0x87c   :  { %v2469_v5 = vrot.slane %v2468_v15, 2  ;;  %v2522_v8 = vadd.f32 %v2521_v20, %v2520_v38 }
 0x87e   :  { %v2470_v29 = vadd.f32 %v2469_v5, %v2468_v15  ;;  %v2523_v50 = vrot.slane %v2522_v8, 2 }
 0x880   :  { %v2471_v6 = vrot.slane %v2470_v29, 1  ;;  %v2524_v11 = vadd.f32 %v2523_v50, %v2522_v8 }
 0x882   :  { %v2472_v33 = vadd.f32 %v2471_v6, %v2470_v29  ;;  %v2525_v42 = vrot.slane %v2524_v11, 1 }
 0x884   :  { %v2473_v23 = vmul.f32 0.0078125, %v2472_v33  ;;  %v2526_v2 = vadd.f32 %v2525_v42, %v2524_v11 }
 0x886   :  { %v2527_v13 = vmul.f32 0.0078125, %v2526_v2  ;;  %v2528_v52 = vmul.f32 %v2473_v23, %v2473_v23  ;;  %v2532_v19 = vsub.f32 %v5173_v17, %v2473_v23  ;;  %v2531_v51 = vsub.f32 %v5162_v1, %v2473_v23 }
 0x887   :  { %v2534_v54 = vsub.f32 %v5170_v36, %v2473_v23  ;;  %v2533_v47 = vsub.f32 %v5165_v62, %v2473_v23  ;;  %v2536_v17 = vsub.f32 %v5207_v46, %v2473_v23  ;;  %v2535_v1 = vsub.f32 %v5190_v32, %v2473_v23 }
 0x888   :  { %v2529_v35 = vsub.f32 %v2527_v13, %v2528_v52  ;;  %v2538_v36 = vsub.f32 %v5204_v10, %v2473_v23  ;;  %v2537_v62 = vsub.f32 %v5196_v39, %v2473_v23  ;;  %v2540_v46 = vsub.f32 %v5239_v41, %v2473_v23  ;;  %v3659_v52 = vld [vmem:[#allocation3 + $0x28] sm:$0xff]  }
 0x889   :  { %v2539_v32 = vsub.f32 %v5222_v43, %v2473_v23  ;;  %v2542_v10 = vsub.f32 %v5236_v12, %v2473_v23  ;;  %v2541_v39 = vsub.f32 %v5228_v49, %v2473_v23  ;;  %v2544_v41 = vsub.f32 %v5271_v37, %v2473_v23  ;;  %3617 = vmatprep.subr.bf16.mxu0 %v3659_v52 }
 0x88a   :  { %v2530_v4 = vmax.f32 %v2529_v35, 0.0  ;;  %v2543_v43 = vsub.f32 %v5254_v61, %v2473_v23  ;;  %v2546_v12 = vsub.f32 %v5268_v56, %v2473_v23  ;;  %v2545_v49 = vsub.f32 %v5260_v3, %v2473_v23  ;;  %v3660_v35 = vld [vmem:[#allocation3 + $0x20] sm:$0xff]   ;;  %3618 = vmatpush3.bf16.msra.mxu0 %v3659_v52 }
 0x88b   :  { %3619 = vmatprep.subr.bf16.mxu0 %v3660_v35 }
 0x88c   :  { %v2547_v27 = vadd.f32 1e-05, %v2530_v4 }
 0x88e   :  { %3671 = vrsqrt.f32 %v2547_v27  ;;  %3620 = vmatpush3.bf16.msra.mxu0 %v3660_v35 }
 0x89b   :  { %v3672_v60 = vpop.eup %3671 }
 0x89c   :  { %v2550_v48 = vmul.f32 %v3672_v60, %v2532_v19  ;;  %v2549_v57 = vmul.f32 %v3672_v60, %v2531_v51  ;;  %v2552_v18 = vmul.f32 %v3672_v60, %v2534_v54  ;;  %v2551_v38 = vmul.f32 %v3672_v60, %v2533_v47 }
 0x89d   :  { %v2554_v15 = vmul.f32 %v3672_v60, %v2536_v17  ;;  %v2553_v20 = vmul.f32 %v3672_v60, %v2535_v1  ;;  %v2556_v5 = vmul.f32 %v3672_v60, %v2538_v36  ;;  %v2555_v8 = vmul.f32 %v3672_v60, %v2537_v62 }
 0x89e   :  { %2583 = vrot.lane.b32.xlu1 %v2550_v48, %s3720_s26  ;;  %2581 = vrot.lane.b32.xlu0 %v2549_v57, %s3720_s26  ;;  %v2558_v29 = vmul.f32 %v3672_v60, %v2540_v46  ;;  %v2557_v50 = vmul.f32 %v3672_v60, %v2539_v32  ;;  %v2560_v6 = vmul.f32 %v3672_v60, %v2542_v10 }
 0x89f   :  { %v2559_v11 = vmul.f32 %v3672_v60, %v2541_v39  ;;  %v2562_v33 = vmul.f32 %v3672_v60, %v2544_v41  ;;  %v2561_v42 = vmul.f32 %v3672_v60, %v2543_v43  ;;  %v2564_v2 = vmul.f32 %v3672_v60, %v2546_v12 }
 0x8a0   :  { %v2563_v13 = vmul.f32 %v3672_v60, %v2545_v49 }
 0x8a2   :  { %2587 = vrot.lane.b32.xlu1 %v2552_v18, %s3720_s26  ;;  %2585 = vrot.lane.b32.xlu0 %v2551_v38, %s3720_s26 }
 0x8a6   :  { %2591 = vrot.lane.b32.xlu1 %v2554_v15, %s3720_s26  ;;  %2589 = vrot.lane.b32.xlu0 %v2553_v20, %s3720_s26 }
 0x8aa   :  { %2595 = vrot.lane.b32.xlu1 %v2556_v5, %s3720_s26  ;;  %2593 = vrot.lane.b32.xlu0 %v2555_v8, %s3720_s26 }
 0x8ae   :  { %2599 = vrot.lane.b32.xlu1 %v2558_v29, %s3720_s26  ;;  %2597 = vrot.lane.b32.xlu0 %v2557_v50, %s3720_s26 }
 0x8b2   :  { %2603 = vrot.lane.b32.xlu1 %v2560_v6, %s3720_s26  ;;  %2601 = vrot.lane.b32.xlu0 %v2559_v11, %s3720_s26 }
 0x8b6   :  { %2607 = vrot.lane.b32.xlu1 %v2562_v33, %s3720_s26  ;;  %2605 = vrot.lane.b32.xlu0 %v2561_v42, %s3720_s26 }
 0x8ba   :  { %2611 = vrot.lane.b32.xlu1 %v2564_v2, %s3720_s26  ;;  %2609 = vrot.lane.b32.xlu0 %v2563_v13, %s3720_s26 }
 0x910   :  { %v2584_v61 = vpop.permute.xlu1 %2583  ;;  %v2582_v37 = vpop.permute.xlu0 %2581 }
 0x911   :  { %v2630_v4 = vmul.f32 %v2584_v61, %v4884_v28  ;;  %v2629_v56 = vmul.f32 %v2582_v37, %v4884_v28 }
 0x913   :  { %v2646_v3 = vadd.f32 %v2630_v4, %v5099_v16  ;;  %v2645_v23 = vadd.f32 %v2629_v56, %v5099_v16 }
 0x914   :  { %v2588_v27 = vpop.permute.xlu1 %2587  ;;  %v2586_v19 = vpop.permute.xlu0 %2585 }
 0x915   :  { %v2669_v51 = vmax.f32 %v2646_v3, 0.0  ;;  %v2668_v60 = vmax.f32 %v2645_v23, 0.0  ;;  %v2632_v48 = vmul.f32 %v2588_v27, %v4884_v28  ;;  %v2631_v57 = vmul.f32 %v2586_v19, %v4884_v28 }
 0x917   :  { %v2648_v54 = vadd.f32 %v2632_v48, %v5099_v16  ;;  %v2647_v47 = vadd.f32 %v2631_v57, %v5099_v16  ;;  %v2684_v18 = vpack.c.bf16 %v2669_v51, %v2668_v60 }
 0x918   :  { %v2592_v38 = vpop.permute.xlu1 %2591  ;;  %v2590_v17 = vpop.permute.xlu0 %2589 }
 0x919   :  { %v2671_v1 = vmax.f32 %v2648_v54, 0.0  ;;  %v2670_v15 = vmax.f32 %v2647_v47, 0.0  ;;  %v2634_v20 = vmul.f32 %v2592_v38, %v4884_v28  ;;  %v2633_v36 = vmul.f32 %v2590_v17, %v4884_v28  ;;  %2706 = vrot.lane.b32.xlu0 %v2684_v18, %s3720_s26 }
 0x91b   :  { %v2650_v62 = vadd.f32 %v2634_v20, %v5099_v16  ;;  %v2649_v5 = vadd.f32 %v2633_v36, %v5099_v16  ;;  %v2685_v8 = vpack.c.bf16 %v2671_v1, %v2670_v15 }
 0x91c   :  { %v2596_v46 = vpop.permute.xlu1 %2595  ;;  %v2594_v32 = vpop.permute.xlu0 %2593 }
 0x91d   :  { %v2673_v29 = vmax.f32 %v2650_v62, 0.0  ;;  %v2672_v50 = vmax.f32 %v2649_v5, 0.0  ;;  %v2636_v10 = vmul.f32 %v2596_v46, %v4884_v28  ;;  %v2635_v39 = vmul.f32 %v2594_v32, %v4884_v28  ;;  %2708 = vrot.lane.b32.xlu1 %v2685_v8, %s3720_s26 }
 0x91f   :  { %v2652_v6 = vadd.f32 %v2636_v10, %v5099_v16  ;;  %v2651_v11 = vadd.f32 %v2635_v39, %v5099_v16  ;;  %v2686_v41 = vpack.c.bf16 %v2673_v29, %v2672_v50  ;;  %v5710_v50 = vld [vmem:[#allocation12_spill] sm:$0xff] }
 0x920   :  { %v2600_v43 = vpop.permute.xlu1 %2599  ;;  %v2598_v33 = vpop.permute.xlu0 %2597  ;;  %v5711_v10 = vrot.slane %v5710_v50, %v3919_v40 }
 0x921   :  { %v2675_v42 = vmax.f32 %v2652_v6, 0.0  ;;  %v2674_v12 = vmax.f32 %v2651_v11, 0.0  ;;  %v2638_v49 = vmul.f32 %v2600_v43, %v4891_v55  ;;  %v2637_v2 = vmul.f32 %v2598_v33, %v4891_v55  ;;  %2710 = vrot.lane.b32.xlu0 %v2686_v41, %s3720_s26 }
 0x922   :  { %v5364_v39 = vrot.slane %v5711_v10, %v3910_v34 }
 0x923   :  { %v2654_v13 = vadd.f32 %v2638_v49, %v5127_v24  ;;  %v2653_v28 = vadd.f32 %v2637_v2, %v5127_v24  ;;  %v2687_v52 = vpack.c.bf16 %v2675_v42, %v2674_v12  ;;  %v3725_v49 = vmov 0  }
 0x924   :  { %v2604_v35 = vpop.permute.xlu1 %2603  ;;  %v2602_v61 = vpop.permute.xlu0 %2601  ;;  %3647 = vset.pattern.permute.xlu1 %v3725_v49  ;;  %3648 = vset.pattern.permute.xlu0 %v3725_v49 }
 0x925   :  { %v2677_v37 = vmax.f32 %v2654_v13, 0.0  ;;  %v2676_v16 = vmax.f32 %v2653_v28, 0.0  ;;  %v2640_v4 = vmul.f32 %v2604_v35, %v4891_v55  ;;  %v2639_v56 = vmul.f32 %v2602_v61, %v4891_v55  ;;  %2712 = vrot.lane.b32.xlu1 %v2687_v52, %s3720_s26  ;;  %v5386_v13 = vld [vmem:[%s5692_s9 + $0x2] ss:$0 sm:$0xff] }
 0x927   :  { %v2656_v3 = vadd.f32 %v2640_v4, %v5127_v24  ;;  %v2655_v23 = vadd.f32 %v2639_v56, %v5127_v24  ;;  %v2688_v27 = vpack.c.bf16 %v2677_v37, %v2676_v16 }
 0x928   :  { %v2608_v19 = vpop.permute.xlu1 %2607  ;;  %v2606_v51 = vpop.permute.xlu0 %2605 }
 0x929   :  { %v2679_v60 = vmax.f32 %v2656_v3, 0.0  ;;  %v2678_v48 = vmax.f32 %v2655_v23, 0.0  ;;  %v2642_v57 = vmul.f32 %v2608_v19, %v4891_v55  ;;  %v2641_v54 = vmul.f32 %v2606_v51, %v4891_v55  ;;  %2714 = vrot.lane.b32.xlu0 %v2688_v27, %s3720_s26 }
 0x92b   :  { %v2658_v47 = vadd.f32 %v2642_v57, %v5127_v24  ;;  %v2657_v18 = vadd.f32 %v2641_v54, %v5127_v24  ;;  %v2689_v38 = vpack.c.bf16 %v2679_v60, %v2678_v48 }
 0x92c   :  { %v2612_v17 = vpop.permute.xlu1 %2611  ;;  %v2610_v1 = vpop.permute.xlu0 %2609 }
 0x92d   :  { %v2681_v15 = vmax.f32 %v2658_v47, 0.0  ;;  %v2680_v20 = vmax.f32 %v2657_v18, 0.0  ;;  %v2644_v36 = vmul.f32 %v2612_v17, %v4891_v55  ;;  %v2643_v62 = vmul.f32 %v2610_v1, %v4891_v55  ;;  %2716 = vrot.lane.b32.xlu1 %v2689_v38, %s3720_s26  ;;  %v5712_v55 = vld [vmem:[#allocation13_spill] sm:$0xff] }
 0x92f   :  { %v2660_v5 = vadd.f32 %v2644_v36, %v5127_v24  ;;  %v2659_v8 = vadd.f32 %v2643_v62, %v5127_v24  ;;  %v2690_v46 = vpack.c.bf16 %v2681_v15, %v2680_v20  ;;  %v5371_v24 = vrot.slane %v5712_v55, %v3910_v34 }
 0x931   :  { %v2683_v32 = vmax.f32 %v2660_v5, 0.0  ;;  %v2682_v29 = vmax.f32 %v2659_v8, 0.0  ;;  %2718 = vrot.lane.b32.xlu0 %v2690_v46, %s3720_s26 }
 0x933   :  { %v2691_v6 = vpack.c.bf16 %v2683_v32, %v2682_v29 }
 0x935   :  { %3049 = vrot.lane.b32.xlu0 %v5364_v39, %s3724_s3  ;;  %2720 = vrot.lane.b32.xlu1 %v2691_v6, %s3720_s26 }
 0x939   :  { %3051 = vrot.lane.b32.xlu1 %v5371_v24, %s3724_s3 }
 0x98b   :  { %v2707_v11 = vpop.permute.xlu0 %2706 }
 0x98c   :  { %3621 = vmatprep.mubr.msk.bf16.mxu0 %vm458_vm3, %v2707_v11 }
 0x98f   :  { %v2709_v41 = vpop.permute.xlu1 %2708 }
 0x990   :  { %3622 = vmatmul.mubr.msk.bf16.vlgmr.msra.gmra.mxu0 %vm458_vm3, %v2709_v41 }
 0x993   :  { %v2711_v40 = vpop.permute.xlu0 %2710 }
 0x994   :  { %3625 = vmatprep.mubr.msk.bf16.mxu0 %vm458_vm3, %v2711_v40 }
 0x997   :  { %v2713_v43 = vpop.permute.xlu1 %2712 }
 0x998   :  { %3626 = vmatmul.mubr.msk.bf16.gmra.mxu0 %vm458_vm3, %v2713_v43 }
 0x99b   :  { %v2715_v33 = vpop.permute.xlu0 %2714 }
 0x99c   :  { %3629 = vmatprep.mubr.msk.bf16.mxu0 %vm458_vm3, %v2715_v33 }
 0x99f   :  { %v2717_v34 = vpop.permute.xlu1 %2716 }
 0x9a0   :  { %3630 = vmatmul.mubr.msk.bf16.gmra.mxu0 %vm458_vm3, %v2717_v34 }
 0x9a3   :  { %v2719_v42 = vpop.permute.xlu0 %2718 }
 0x9a4   :  { %3633 = vmatprep.mubr.msk.bf16.mxu0 %vm458_vm3, %v2719_v42 }
 0x9a7   :  { %v2721_v12 = vpop.permute.xlu1 %2720 }
 0x9a8   :  { %3634 = vmatmul.mubr.msk.bf16.gmra.mxu0 %vm458_vm3, %v2721_v12 }
 0xa50   :  { %v3623_v2 = vpop.f32.mrf.mxu0 }
 0xa51   :  { %v2801_v35 = vadd.f32 %v3623_v2, %v5386_v13 }
 0xa52   :  { %v2792_v28 = vpop.f32.mrf.mxu0 }
 0xa53   :  { %v2793_v52 = vadd.f32 %v5386_v13, %v2792_v28  ;;  %v5395_v56 = vadd.f32 %v2801_v35, %v4921_v30 }
 0xa54   :  { %v3624_v61 = vpop.f32.mrf.mxu0 }
 0xa55   :  { %v5391_v37 = vadd.f32 %v2793_v52, %v4917_v9  ;;  %v2804_v16 = vadd.f32 %v3624_v61, %v5386_v13  ;;  %v2911_v30 = vmul.f32 %v5395_v56, %v5395_v56 }
 0xa56   :  { %v2795_v4 = vpop.f32.mrf.mxu0 }
 0xa57   :  { %v2796_v3 = vadd.f32 %v5386_v13, %v2795_v4  ;;  %v2909_v27 = vmul.f32 %v5391_v37, %v5391_v37  ;;  %v5401_v19 = vadd.f32 %v2804_v16, %v4927_v14  ;;  %v2871_v57 = vsel %vm458_vm3, %v5391_v37, 0.0 }
 0xa58   :  { %v3627_v23 = vpop.f32.mrf.mxu0  ;;  %v2928_v46 = vsel %vm458_vm3, %v2911_v30, 0.0 }
 0xa59   :  { %v5404_v51 = vadd.f32 %v2796_v3, %v4930_v63  ;;  %v2817_v60 = vadd.f32 %v3627_v23, %v5386_v13  ;;  %v2874_v63 = vsel %vm458_vm3, %v5395_v56, 0.0  ;;  %v2925_v17 = vsel %vm458_vm3, %v2909_v27, 0.0 }
 0xa5a   :  { %v2808_v9 = vpop.f32.mrf.mxu0  ;;  %v2912_v1 = vmul.f32 %v5401_v19, %v5401_v19 }
 0xa5b   :  { %v2809_v48 = vadd.f32 %v5386_v13, %v2808_v9  ;;  %v2872_v54 = vsel %vm458_vm3, %v5404_v51, 0.0  ;;  %v2910_v14 = vmul.f32 %v5404_v51, %v5404_v51  ;;  %v5427_v8 = vadd.f32 %v2817_v60, %v4953_v21 }
 0xa5c   :  { %v3628_v47 = vpop.f32.mrf.mxu0  ;;  %v2873_v18 = vadd.f32 %v2872_v54, %v2871_v57  ;;  %v2930_v55 = vsel %vm458_vm3, %v2912_v1, 0.0 }
 0xa5d   :  { %v5419_v38 = vadd.f32 %v2809_v48, %v4945_v44  ;;  %v2926_v15 = vsel %vm458_vm3, %v2910_v14, 0.0  ;;  %v2820_v20 = vadd.f32 %v3628_v47, %v5386_v13  ;;  %v2876_v44 = vsel %vm458_vm3, %v5401_v19, 0.0 }
 0xa5e   :  { %v2811_v36 = vpop.f32.mrf.mxu0  ;;  %v2875_v62 = vadd.f32 %v2874_v63, %v2873_v18  ;;  %v2927_v5 = vadd.f32 %v2926_v15, %v2925_v17  ;;  %v2915_v43 = vmul.f32 %v5427_v8, %v5427_v8  ;;  %v2882_v28 = vsel %vm458_vm3, %v5427_v8, 0.0 }
 0xa5f   :  { %v2913_v32 = vmul.f32 %v5419_v38, %v5419_v38  ;;  %v2812_v29 = vadd.f32 %v5386_v13, %v2811_v36  ;;  %v2878_v11 = vsel %vm458_vm3, %v5419_v38, 0.0  ;;  %v5439_v21 = vadd.f32 %v2820_v20, %v4965_v58 }
 0xa60   :  { %v3631_v50 = vpop.f32.mrf.mxu0  ;;  %v2929_v10 = vadd.f32 %v2928_v46, %v2927_v5  ;;  %v2877_v6 = vadd.f32 %v2876_v44, %v2875_v62  ;;  %v2936_v48 = vsel %vm458_vm3, %v2915_v43, 0.0 }
 0xa61   :  { %v5442_v41 = vadd.f32 %v2812_v29, %v4968_v45  ;;  %v2932_v12 = vsel %vm458_vm3, %v2913_v32, 0.0  ;;  %v2833_v2 = vadd.f32 %v3631_v50, %v5386_v13  ;;  %v2916_v61 = vmul.f32 %v5439_v21, %v5439_v21 }
 0xa62   :  { %v2824_v40 = vpop.f32.mrf.mxu0  ;;  %v2879_v33 = vadd.f32 %v2878_v11, %v2877_v6  ;;  %v2931_v34 = vadd.f32 %v2930_v55, %v2929_v10  ;;  %v2884_v30 = vsel %vm458_vm3, %v5439_v21, 0.0 }
 0xa63   :  { %v2825_v42 = vadd.f32 %v5386_v13, %v2824_v40  ;;  %v2880_v49 = vsel %vm458_vm3, %v5442_v41, 0.0  ;;  %v2914_v58 = vmul.f32 %v5442_v41, %v5442_v41  ;;  %v5467_v57 = vadd.f32 %v2833_v2, %v4993_v31 }
 0xa64   :  { %v3632_v45 = vpop.f32.mrf.mxu0  ;;  %v2933_v52 = vadd.f32 %v2932_v12, %v2931_v34  ;;  %v2881_v35 = vadd.f32 %v2880_v49, %v2879_v33  ;;  %v2938_v18 = vsel %vm458_vm3, %v2916_v61, 0.0 }
 0xa65   :  { %v2934_v16 = vsel %vm458_vm3, %v2914_v58, 0.0  ;;  %v5459_v4 = vadd.f32 %v2825_v42, %v4985_v59  ;;  %v2836_v3 = vadd.f32 %v3632_v45, %v5386_v13  ;;  %v2890_v10 = vsel %vm458_vm3, %v5467_v57, 0.0 }
 0xa66   :  { %v2827_v23 = vpop.f32.mrf.mxu0  ;;  %v2883_v27 = vadd.f32 %v2882_v28, %v2881_v35  ;;  %v2935_v9 = vadd.f32 %v2934_v16, %v2933_v52 }
 0xa67   :  { %v2828_v60 = vadd.f32 %v5386_v13, %v2827_v23  ;;  %v2917_v54 = vmul.f32 %v5459_v4, %v5459_v4  ;;  %v2886_v17 = vsel %vm458_vm3, %v5459_v4, 0.0  ;;  %v5478_v1 = vadd.f32 %v2836_v3, %v5004_v26 }
 0xa68   :  { %v3635_v59 = vpop.f32.mrf.mxu0  ;;  %v2937_v14 = vadd.f32 %v2936_v48, %v2935_v9  ;;  %v2885_v47 = vadd.f32 %v2884_v30, %v2883_v27 }
 0xa69   :  { %v5472_v63 = vadd.f32 %v2828_v60, %v4998_v7  ;;  %v2919_v7 = vmul.f32 %v5467_v57, %v5467_v57  ;;  %v2940_v5 = vsel %vm458_vm3, %v2917_v54, 0.0  ;;  %v2849_v46 = vadd.f32 %v3635_v59, %v5386_v13 }
 0xa6a   :  { %v2840_v15 = vpop.f32.mrf.mxu0  ;;  %v2887_v31 = vadd.f32 %v2886_v17, %v2885_v47  ;;  %v2939_v20 = vadd.f32 %v2938_v18, %v2937_v14  ;;  %v2920_v6 = vmul.f32 %v5478_v1, %v5478_v1  ;;  %v2892_v12 = vsel %vm458_vm3, %v5478_v1, 0.0 }
 0xa6b   :  { %v2888_v36 = vsel %vm458_vm3, %v5472_v63, 0.0  ;;  %v2918_v62 = vmul.f32 %v5472_v63, %v5472_v63  ;;  %v2841_v44 = vadd.f32 %v5386_v13, %v2840_v15  ;;  %v2944_v42 = vsel %vm458_vm3, %v2919_v7, 0.0 }
 0xa6c   :  { %v3636_v26 = vpop.f32.mrf.mxu0  ;;  %v2941_v32 = vadd.f32 %v2940_v5, %v2939_v20  ;;  %v2889_v29 = vadd.f32 %v2888_v36, %v2887_v31  ;;  %v5503_v49 = vadd.f32 %v2849_v46, %v5029_v0  ;;  %v2946_v45 = vsel %vm458_vm3, %v2920_v6, 0.0 }
 0xa6d   :  { %v2942_v50 = vsel %vm458_vm3, %v2918_v62, 0.0  ;;  %v5495_v55 = vadd.f32 %v2841_v44, %v5021_v25  ;;  %v2852_v11 = vadd.f32 %v3636_v26, %v5386_v13 }
 0xa6e   :  { %v2843_v40 = vpop.f32.mrf.mxu0  ;;  %v2891_v43 = vadd.f32 %v2890_v10, %v2889_v29  ;;  %v2943_v33 = vadd.f32 %v2942_v50, %v2941_v32  ;;  %v2923_v0 = vmul.f32 %v5503_v49, %v5503_v49 }
 0xa6f   :  { %v2844_v34 = vadd.f32 %v5386_v13, %v2843_v40  ;;  %v2921_v58 = vmul.f32 %v5495_v55, %v5495_v55  ;;  %v2894_v28 = vsel %vm458_vm3, %v5495_v55, 0.0  ;;  %v5511_v13 = vadd.f32 %v2852_v11, %v5037_v22 }
 0xa70   :  { %v2945_v25 = vadd.f32 %v2944_v42, %v2943_v33  ;;  %v2893_v2 = vadd.f32 %v2892_v12, %v2891_v43  ;;  %v2898_v22 = vsel %vm458_vm3, %v5503_v49, 0.0  ;;  %v2952_v54 = vsel %vm458_vm3, %v2923_v0, 0.0 }
 0xa71   :  { %v5514_v52 = vadd.f32 %v2844_v34, %v5040_v53  ;;  %v2948_v16 = vsel %vm458_vm3, %v2921_v58, 0.0  ;;  %v2924_v53 = vmul.f32 %v5511_v13, %v5511_v13  ;;  %v2900_v59 = vsel %vm458_vm3, %v5511_v13, 0.0 }
 0xa72   :  { %v2895_v35 = vadd.f32 %v2894_v28, %v2893_v2  ;;  %v2947_v61 = vadd.f32 %v2946_v45, %v2945_v25 }
 0xa73   :  { %v2896_v3 = vsel %vm458_vm3, %v5514_v52, 0.0  ;;  %v2922_v23 = vmul.f32 %v5514_v52, %v5514_v52  ;;  %v2954_v18 = vsel %vm458_vm3, %v2924_v53, 0.0 }
 0xa74   :  { %v2949_v27 = vadd.f32 %v2948_v16, %v2947_v61  ;;  %v2897_v9 = vadd.f32 %v2896_v3, %v2895_v35  ;;  %v5566_v3 = vpop.permute.xlu0 %3049 }
 0xa75   :  { %v2950_v60 = vsel %vm458_vm3, %v2922_v23, 0.0  ;;  %v5568_v23 = vpop.permute.xlu1 %3051 }
 0xa76   :  { %v2899_v48 = vadd.f32 %v2898_v22, %v2897_v9  ;;  %v2951_v30 = vadd.f32 %v2950_v60, %v2949_v27 }
 0xa78   :  { %v2901_v14 = vadd.f32 %v2900_v59, %v2899_v48  ;;  %v2953_v47 = vadd.f32 %v2952_v54, %v2951_v30  ;;  %v5581_v59 = vld [vmem:[%s5693_s10] ss:$0 sm:$0xff]  ;;  %s3726_s10 = smov [#allocation6]  }
 0xa79   :  { %s3305_s2 = sshll.u32 %s3726_s10, 4  ;;  %s3306_s2 = int_to_ptr.vmem [resolvable:$true] %s3305_s2 }
 0xa7a   :  { %v2902_v17 = vrot.slane %v2901_v14, 4  ;;  %v2955_v15 = vadd.f32 %v2954_v18, %v2953_v47  ;;  %s3695_s21 = scalar_lea.vmem %s3306_s2, 32  ;;  %p3700_p6 = scmp.lt.s32.totalorder %s3306_s2, %s3306_s2 }
 0xa7b   :  { %p3696_p5 = scmp.ne.s32.totalorder %s3306_s2, %s3695_s21  ;;  %p3701_p7 = scmp.lt.s32.totalorder %s3695_s21, %s3695_s21 }
 0xa7c   :  { %v2903_v31 = vadd.f32 %v2902_v17, %v2901_v14  ;;  %v2956_v20 = vrot.slane %v2955_v15, 4 }
 0xa7d   :  { %p3702_p8 = por %p3701_p7, %p3700_p6 }
 0xa7e   :  { %v2904_v36 = vrot.slane %v2903_v31, 2  ;;  %v2957_v62 = vadd.f32 %v2956_v20, %v2955_v15 }
 0xa7f   :  { %p3703_p9 = pnand %p3702_p8, %p3696_p5 }
 0xa80   :  { %v2905_v7 = vadd.f32 %v2904_v36, %v2903_v31  ;;  %v2958_v5 = vrot.slane %v2957_v62, 2 }
 0xa82   :  { %v2906_v46 = vrot.slane %v2905_v7, 1  ;;  %v2959_v44 = vadd.f32 %v2958_v5, %v2957_v62 }
 0xa84   :  { %v2907_v26 = vadd.f32 %v2906_v46, %v2905_v7  ;;  %v2960_v32 = vrot.slane %v2959_v44, 1 }
 0xa86   :  { %v5532_v29 = vmul.f32 0.0078125, %v2907_v26  ;;  %v2961_v50 = vadd.f32 %v2960_v32, %v2959_v44 }
 0xa88   :  { %v2962_v10 = vmul.f32 0.0078125, %v2961_v50  ;;  %v2963_v6 = vmul.f32 %v5532_v29, %v5532_v29  ;;  %v2967_v33 = vsub.f32 %v5404_v51, %v5532_v29  ;;  %v2966_v34 = vsub.f32 %v5391_v37, %v5532_v29 }
 0xa89   :  { %v2968_v42 = vsub.f32 %v5395_v56, %v5532_v29  ;;  %v2974_v12 = vsub.f32 %v5459_v4, %v5532_v29  ;;  %v2969_v25 = vsub.f32 %v5401_v19, %v5532_v29  ;;  %v2975_v2 = vsub.f32 %v5472_v63, %v5532_v29 }
 0xa8a   :  { %v2964_v11 = vsub.f32 %v2962_v10, %v2963_v6  ;;  %v2970_v51 = vsub.f32 %v5419_v38, %v5532_v29  ;;  %v2976_v37 = vsub.f32 %v5467_v57, %v5532_v29  ;;  %v2979_v5 = vsub.f32 %v5514_v52, %v5532_v29 }
 0xa8b   :  { %v2971_v26 = vsub.f32 %v5442_v41, %v5532_v29  ;;  %v2977_v10 = vsub.f32 %v5478_v1, %v5532_v29  ;;  %v2972_v6 = vsub.f32 %v5427_v8, %v5532_v29  ;;  %v2973_v41 = vsub.f32 %v5439_v21, %v5532_v29 }
 0xa8c   :  { %v2965_v40 = vmax.f32 %v2964_v11, 0.0 }
 0xa8e   :  { %v2982_v43 = vadd.f32 1e-05, %v2965_v40  ;;  %v2978_v40 = vsub.f32 %v5495_v55, %v5532_v29 }
 0xa90   :  { %3673 = vrsqrt.f32 %v2982_v43 }
 0xa9d   :  { %v5544_v58 = vpop.eup %3673 }
 0xa9e   :  { %v2985_v45 = vmul.f32 %v5544_v58, %v2967_v33  ;;  %v2984_v56 = vmul.f32 %v5544_v58, %v2966_v34  ;;  %v2986_v4 = vmul.f32 %v5544_v58, %v2968_v42  ;;  %v2992_v28 = vmul.f32 %v5544_v58, %v2974_v12 }
 0xa9f   :  { %v2987_v35 = vmul.f32 %v5544_v58, %v2969_v25  ;;  %v2993_v19 = vmul.f32 %v5544_v58, %v2975_v2  ;;  %v2988_v63 = vmul.f32 %v5544_v58, %v2970_v51  ;;  %v2994_v61 = vmul.f32 %v5544_v58, %v2976_v37 }
 0xaa0   :  { %v3034_v38 = vmul.f32 %v5364_v39, %v2985_v45  ;;  %v3033_v57 = vmul.f32 %v5364_v39, %v2984_v56  ;;  %v3035_v0 = vmul.f32 %v5364_v39, %v2986_v4  ;;  %v3041_v16 = vmul.f32 %v5371_v24, %v2992_v28 }
 0xaa1   :  { %v3036_v27 = vmul.f32 %v5364_v39, %v2987_v35  ;;  %v3042_v9 = vmul.f32 %v5371_v24, %v2993_v19  ;;  %v3037_v22 = vmul.f32 %v5364_v39, %v2988_v63  ;;  %v3043_v53 = vmul.f32 %v5371_v24, %v2994_v61 }
 0xaa2   :  { %v3056_v60 = vadd.f32 %v5566_v3, %v3034_v38  ;;  %v3055_v48 = vadd.f32 %v5566_v3, %v3033_v57  ;;  %v3057_v30 = vadd.f32 %v5566_v3, %v3035_v0  ;;  %v3063_v54 = vadd.f32 %v5568_v23, %v3041_v16 }
 0xaa3   :  { %v3058_v14 = vadd.f32 %v5566_v3, %v3036_v27  ;;  %v3064_v47 = vadd.f32 %v5568_v23, %v3042_v9  ;;  %v3059_v62 = vadd.f32 %v5566_v3, %v3037_v22  ;;  %v3065_v7 = vadd.f32 %v5568_v23, %v3043_v53 }
 0xaa4   :  { %v3072_v18 = vmax.f32 %v3056_v60, 0.0  ;;  %v3071_v17 = vmax.f32 %v3055_v48, 0.0  ;;  %v3073_v15 = vmax.f32 %v3057_v30, 0.0  ;;  %v3079_v31 = vmax.f32 %v3063_v54, 0.0 }
 0xaa5   :  { %v3074_v20 = vmax.f32 %v3058_v14, 0.0  ;;  %v3080_v36 = vmax.f32 %v3064_v47, 0.0  ;;  %v3075_v1 = vmax.f32 %v3059_v62, 0.0  ;;  %v3081_v34 = vmax.f32 %v3065_v7, 0.0 }
 0xaa6   :  { %v3095_v46 = vmul.f32 %v5581_v59, %v3072_v18  ;;  %v3094_v44 = vmul.f32 %v5581_v59, %v3071_v17  ;;  %v3096_v32 = vmul.f32 %v5581_v59, %v3073_v15  ;;  %v3102_v50 = vmul.f32 %v5581_v59, %v3079_v31 }
 0xaa7   :  { %v3097_v43 = vmul.f32 %v5581_v59, %v3074_v20  ;;  %v3103_v33 = vmul.f32 %v5581_v59, %v3080_v36  ;;  %v2989_v8 = vmul.f32 %v5544_v58, %v2971_v26  ;;  %v2995_v42 = vmul.f32 %v5544_v58, %v2977_v10 }
 0xaa8   :  { %v3113_v11 = vsel %vm458_vm3, %v3095_v46, 0.0  ;;  %v3110_v52 = vsel %vm458_vm3, %v3094_v44, 0.0  ;;  %v2990_v12 = vmul.f32 %v5544_v58, %v2972_v6  ;;  %v2996_v25 = vmul.f32 %v5544_v58, %v2978_v40 }
 0xaa9   :  { %3114 = vadd.xlane.f32.xlu1 %v3113_v11  ;;  %3111 = vadd.xlane.f32.xlu0 %v3110_v52  ;;  %v3116_v55 = vsel %vm458_vm3, %v3096_v32, 0.0  ;;  %v3134_v21 = vsel %vm458_vm3, %v3102_v50, 0.0  ;;  %v2991_v2 = vmul.f32 %v5544_v58, %v2973_v41  ;;  %v2997_v51 = vmul.f32 %v5544_v58, %v2979_v5  ;;  %v3413_v41 = vld [vmem:[#allocation2] ss:$0 sm:$0xff] }
 0xaaa   :  { %v3038_v37 = vmul.f32 %v5364_v39, %v2989_v8  ;;  %v3044_v45 = vmul.f32 %v5371_v24, %v2995_v42  ;;  %v3039_v56 = vmul.f32 %v5364_v39, %v2990_v12  ;;  %v3045_v4 = vmul.f32 %v5371_v24, %v2996_v25 }
 0xaab   :  { %v3098_v28 = vmul.f32 %v5581_v59, %v3075_v1  ;;  %v2980_v35 = vsub.f32 %v5503_v49, %v5532_v29  ;;  %v3119_v19 = vsel %vm458_vm3, %v3097_v43, 0.0  ;;  %v3104_v63 = vmul.f32 %v5581_v59, %v3081_v34 }
 0xaac   :  { %v3060_v61 = vadd.f32 %v5566_v3, %v3038_v37  ;;  %v3066_v38 = vadd.f32 %v5568_v23, %v3044_v45  ;;  %v3137_v57 = vsel %vm458_vm3, %v3103_v33, 0.0  ;;  %v3040_v0 = vmul.f32 %v5364_v39, %v2991_v2 }
 0xaad   :  { %3117 = vadd.xlane.f32.xlu1 %v3116_v55  ;;  %3135 = vadd.xlane.f32.xlu0 %v3134_v21  ;;  %v3046_v16 = vmul.f32 %v5371_v24, %v2997_v51  ;;  %v2998_v27 = vmul.f32 %v5544_v58, %v2980_v35  ;;  %v3061_v49 = vadd.f32 %v5566_v3, %v3039_v56  ;;  %v3122_v48 = vsel %vm458_vm3, %v3098_v28, 0.0 }
 0xaae   :  { %v3076_v9 = vmax.f32 %v3060_v61, 0.0  ;;  %v3082_v22 = vmax.f32 %v3066_v38, 0.0  ;;  %v3067_v53 = vadd.f32 %v5568_v23, %v3045_v4  ;;  %v2981_v60 = vsub.f32 %v5511_v13, %v5532_v29  ;;  %v5714_v61 = vld [vmem:[#allocation9_spill] sm:$0xff] }
 0xaaf   :  { %v3140_v30 = vsel %vm458_vm3, %v3104_v63, 0.0  ;;  %v3062_v39 = vadd.f32 %v5566_v3, %v3040_v0  ;;  %v3068_v54 = vadd.f32 %v5568_v23, %v3046_v16  ;;  %v3047_v14 = vmul.f32 %v5371_v24, %v2998_v27 }
 0xab0   :  { %v2999_v47 = vmul.f32 %v5544_v58, %v2981_v60  ;;  %v3099_v18 = vmul.f32 %v5581_v59, %v3076_v9  ;;  %v3105_v17 = vmul.f32 %v5581_v59, %v3082_v22  ;;  %v3077_v15 = vmax.f32 %v3061_v49, 0.0 }
 0xab1   :  { %3120 = vadd.xlane.f32.xlu1 %v3119_v19  ;;  %3138 = vadd.xlane.f32.xlu0 %v3137_v57  ;;  %v3083_v31 = vmax.f32 %v3067_v53, 0.0  ;;  %v3078_v13 = vmax.f32 %v3062_v39, 0.0  ;;  %v3084_v29 = vmax.f32 %v3068_v54, 0.0  ;;  %v3069_v20 = vadd.f32 %v5568_v23, %v3047_v14 }
 0xab2   :  { %v3048_v3 = vmul.f32 %v5371_v24, %v2999_v47  ;;  %v3125_v36 = vsel %vm458_vm3, %v3099_v18, 0.0  ;;  %v3143_v62 = vsel %vm458_vm3, %v3105_v17, 0.0  ;;  %v3100_v58 = vmul.f32 %v5581_v59, %v3077_v15 }
 0xab3   :  { %v3106_v7 = vmul.f32 %v5581_v59, %v3083_v31  ;;  %v3085_v5 = vmax.f32 %v3069_v20, 0.0  ;;  %v3101_v32 = vmul.f32 %v5581_v59, %v3078_v13  ;;  %v3107_v24 = vmul.f32 %v5581_v59, %v3084_v29 }
 0xab4   :  { %v3070_v46 = vadd.f32 %v5568_v23, %v3048_v3  ;;  %v3128_v44 = vsel %vm458_vm3, %v3100_v58, 0.0  ;;  %v5713_v2 = vlaneseq }
 0xab5   :  { %3123 = vadd.xlane.f32.xlu1 %v3122_v48  ;;  %3141 = vadd.xlane.f32.xlu0 %v3140_v30  ;;  %v3146_v26 = vsel %vm458_vm3, %v3106_v7, 0.0  ;;  %v3131_v50 = vsel %vm458_vm3, %v3101_v32, 0.0  ;;  %v3149_v10 = vsel %vm458_vm3, %v3107_v24, 0.0  ;;  %v3108_v6 = vmul.f32 %v5581_v59, %v3085_v5 }
 0xab6   :  { %v3086_v11 = vmax.f32 %v3070_v46, 0.0  ;;  %v3201_v51 = vand.u32 127, %v5713_v2 }
 0xab7   :  { %v3152_v23 = vsel %vm458_vm3, %v3108_v6, 0.0 }
 0xab8   :  { %v3109_v52 = vmul.f32 %v5581_v59, %v3086_v11  ;;  %v3206_v45 = vadd.s32 4294967288, %v3201_v51  ;;  %v3213_v56 = vadd.s32 4294967280, %v3201_v51  ;;  %v3220_v35 = vadd.s32 4294967272, %v3201_v51 }
 0xab9   :  { %3126 = vadd.xlane.f32.xlu1 %v3125_v36  ;;  %3144 = vadd.xlane.f32.xlu0 %v3143_v62  ;;  %v3227_v19 = vadd.s32 4294967264, %v3201_v51  ;;  %v3234_v63 = vadd.s32 4294967256, %v3201_v51  ;;  %v3204_v38 = vsub.s32 %v3201_v51, %v5714_v61  ;;  %v3241_v9 = vadd.s32 4294967248, %v3201_v51 }
 0xaba   :  { %v3155_v40 = vsel %vm458_vm3, %v3109_v52, 0.0  ;;  %v3209_v57 = vsub.s32 %v3206_v45, %v5714_v61  ;;  %v3216_v0 = vsub.s32 %v3213_v56, %v5714_v61  ;;  %v3223_v27 = vsub.s32 %v3220_v35, %v5714_v61 }
 0xabb   :  { %v3230_v48 = vsub.s32 %v3227_v19, %v5714_v61  ;;  %v3237_v54 = vsub.s32 %v3234_v63, %v5714_v61  ;;  %v3244_v15 = vsub.s32 %v3241_v9, %v5714_v61  ;;  %v3248_v13 = vadd.s32 4294967240, %v3201_v51 }
 0xabd   :  { %3129 = vadd.xlane.f32.xlu1 %v3128_v44  ;;  %3147 = vadd.xlane.f32.xlu0 %v3146_v26 }
 0xac1   :  { %3132 = vadd.xlane.f32.xlu1 %v3131_v50  ;;  %3150 = vadd.xlane.f32.xlu0 %v3149_v10 }
 0xac5   :  { %3153 = vadd.xlane.f32.xlu0 %v3152_v23 }
 0xac9   :  { %3156 = vadd.xlane.f32.xlu0 %v3155_v40 }
 0xad2   :  { %3165 = vperm.xlu1 %3647, %v3413_v41  }
 0xb32   :  { %v3115_v43 = vpop.xlane.xlu1 %3114  ;;  %v3112_v33 = vpop.xlane.xlu0 %3111 }
 0xb36   :  { %v3118_v1 = vpop.xlane.xlu1 %3117  ;;  %v3136_v34 = vpop.xlane.xlu0 %3135 }
 0xb3a   :  { %v3121_v8 = vpop.xlane.xlu1 %3120  ;;  %v3139_v42 = vpop.xlane.xlu0 %3138 }
 0xb3e   :  { %v3124_v12 = vpop.xlane.xlu1 %3123  ;;  %v3142_v25 = vpop.xlane.xlu0 %3141 }
 0xb42   :  { %v3127_v55 = vpop.xlane.xlu1 %3126  ;;  %v3145_v21 = vpop.xlane.xlu0 %3144 }
 0xb46   :  { %v3130_v37 = vpop.xlane.xlu1 %3129  ;;  %v3148_v59 = vpop.xlane.xlu0 %3147 }
 0xb4a   :  { %v3133_v4 = vpop.xlane.xlu1 %3132  ;;  %v3151_v28 = vpop.xlane.xlu0 %3150 }
 0xb4e   :  { %v3166_v16 = vpop.permute.xlu1 %3165  ;;  %v3154_v22 = vpop.xlane.xlu0 %3153 }
 0xb4f   :  { %v3176_v49 = vadd.f32 %v3166_v16, %v3136_v34  ;;  %v3177_v53 = vadd.f32 %v3166_v16, %v3139_v42  ;;  %v3178_v60 = vadd.f32 %v3166_v16, %v3142_v25  ;;  %v3179_v30 = vadd.f32 %v3166_v16, %v3145_v21 }
 0xb50   :  { %v3180_v39 = vadd.f32 %v3166_v16, %v3148_v59  ;;  %v3181_v14 = vadd.f32 %v3166_v16, %v3151_v28  ;;  %v3182_v31 = vadd.f32 %v3166_v16, %v3154_v22  ;;  %v3168_v62 = vadd.f32 %v3166_v16, %v3112_v33 }
 0xb51   :  { %v3258_v47 = vrot.slane %v3176_v49, %v3204_v38  ;;  %v3262_v18 = vrot.slane %v3177_v53, %v3209_v57  ;;  %v3267_v17 = vrot.slane %v3178_v60, %v3216_v0  ;;  %v3272_v3 = vrot.slane %v3179_v30, %v3223_v27 }
 0xb52   :  { %v3157_v29 = vpop.xlane.xlu0 %3156  ;;  %v3277_v36 = vrot.slane %v3180_v39, %v3230_v48  ;;  %v3169_v7 = vadd.f32 %v3166_v16, %v3115_v43  ;;  %v3170_v5 = vadd.f32 %v3166_v16, %v3118_v1  ;;  %v3171_v46 = vadd.f32 %v3166_v16, %v3121_v8 }
 0xb53   :  { %v3263_v20 = vsel %vm3211_vm4, %v3262_v18, %v3258_v47  ;;  %v3282_v26 = vrot.slane %v3181_v14, %v3237_v54  ;;  %v3183_v32 = vadd.f32 %v3166_v16, %v3157_v29  ;;  %v3172_v24 = vadd.f32 %v3166_v16, %v3124_v12 }
 0xb54   :  { %v3268_v58 = vsel %vm3218_vm5, %v3267_v17, %v3263_v20  ;;  %v3173_v10 = vadd.f32 %v3166_v16, %v3127_v55  ;;  %v3205_v6 = vrot.slane %v3168_v62, %v3204_v38  ;;  %v3210_v11 = vrot.slane %v3169_v7, %v3209_v57 }
 0xb55   :  { %v3273_v44 = vsel %vm3225_vm6, %v3272_v3, %v3268_v58  ;;  %v3174_v23 = vadd.f32 %v3166_v16, %v3130_v37  ;;  %v3287_v40 = vrot.slane %v3182_v31, %v3244_v15  ;;  %v3217_v41 = vrot.slane %v3170_v5, %v3216_v0 }
 0xb56   :  { %v3278_v50 = vsel %vm3232_vm7, %v3277_v36, %v3273_v44  ;;  %v3175_v33 = vadd.f32 %v3166_v16, %v3133_v4  ;;  %v3251_v43 = vsub.s32 %v3248_v13, %v5714_v61  ;;  %v3212_v1 = vsel %vm3211_vm4, %v3210_v11, %v3205_v6 }
 0xb57   :  { %v3283_v52 = vsel %vm3239_vm8, %v3282_v26, %v3278_v50  ;;  %v3224_v34 = vrot.slane %v3171_v46, %v3223_v27  ;;  %v3219_v42 = vsel %vm3218_vm5, %v3217_v41, %v3212_v1  ;;  %v3231_v12 = vrot.slane %v3172_v24, %v3230_v48 }
 0xb58   :  { %v3288_v8 = vsel %vm3246_vm9, %v3287_v40, %v3283_v52  ;;  %v3292_v25 = vrot.slane %v3183_v32, %v3251_v43  ;;  %v3238_v21 = vrot.slane %v3173_v10, %v3237_v54  ;;  %v3245_v2 = vrot.slane %v3174_v23, %v3244_v15 }
 0xb59   :  { %v3226_v55 = vsel %vm3225_vm6, %v3224_v34, %v3219_v42  ;;  %v3252_v37 = vrot.slane %v3175_v33, %v3251_v43 }
 0xb5a   :  { %v3233_v51 = vsel %vm3232_vm7, %v3231_v12, %v3226_v55  ;;  %v3293_v45 = vsel %vm3253_vm10, %v3292_v25, %v3288_v8 }
 0xb5b   :  { %v3240_v59 = vsel %vm3239_vm8, %v3238_v21, %v3233_v51 }
 0xb5c   :  { %v3247_v56 = vsel %vm3246_vm9, %v3245_v2, %v3240_v59 }
 0xb5d   :  { %v3254_v4 = vsel %vm3253_vm10, %v3252_v37, %v3247_v56 }
 0xb5e   :  { %v3295_v28 = vsel %vm3294_vm11, %v3293_v45, %v3254_v4 }
 0xb5f   :  { %3298 = vst.msk [vmem:[#allocation6] sm:$0x3] %vm3297_vm12, %v3295_v28 }
 0xb60   :  { %3706 = shalt.err (!%p3703_p9)
}
 0xb61   :  { %3308 = dma.vmem_to_hbm [thread:$0]  %s3306_s2, 32, %s5695_s12, [#allocation5]  }
 0xb62   :  { %3717 = dma.done.wait [#allocation5], 32  }
 0xb63   :  { %3718 = vsyncadd [#allocation5], 4294967264 }
 0xb64   :  { %3312 = vsyncpa [#allocation4], 1 }
 0xb65   :  { %3313 = vsyncpa [#allocation5], 1 }

</bundles_post_ra>
